<compile_context>
chip_gen: v7x
topology: tpu7x:2x2x1
jax: 0.10.0
libtpu: 0.0.40
codegen_flags: <defaults>
</compile_context>

<pallas_src>
import jax
import jax.numpy as jnp
from jax.experimental import pallas as pl
from jax.experimental.pallas import tpu as pltpu

# ----------------------------- problem constants -----------------------------
D_COEF = 0.001            # self.D
NX, NY = 10, 10           # spatial grid; interior is (NX-2) x (NY-2)
DX2, DY2 = 1.0, 1.0       # dx**2, dy**2 (module-level globals, undefined in the
                          # original snippet; assumed 1.0)
H1, H2, H3, C = 50, 50, 20, 2
BLOCK_BATCH = 32          # samples per grid step -> 32 * 100 = 3200 lanes (25 * 128)


# --------------------------------- kernel ------------------------------------
def hybrid_ode_kernel(x_ref, w1_ref, b1_ref, w2_ref, b2_ref,
                      w3_ref, b3_ref, w4_ref, b4_ref, out_ref):
    # x_ref block: (2, P) channel-first flat points, P = BLOCK_BATCH*NX*NY, flat
    # index f = b*NX*NY + i*NY + j (j fastest).  P is a multiple of 128.
    x = x_ref[...]
    p = x.shape[-1]

    # ---- 5-point Laplacian via lane rotations (XLU slot).  The stencil is symmetric
    # in +-shift, so rotation direction does not matter; wrap-around only corrupts
    # boundary points (i=0/NX-1 or j=0/NY-1), which are sliced off in the wrapper.
    lap_i = pltpu.roll(x, shift=NY, axis=1) + pltpu.roll(x, shift=p - NY, axis=1) - 2.0 * x
    lap_j = pltpu.roll(x, shift=1, axis=1) + pltpu.roll(x, shift=p - 1, axis=1) - 2.0 * x
    diff = D_COEF * (lap_i / DX2 + lap_j / DY2)              # (2, P)

    # ---- fused pointwise MLP, transposed (hidden, points) layout: 4 matmuls total,
    # points on the lane axis so tanh (EUP) and bias adds (VPU) are fully lane-dense.
    h = jnp.tanh(jnp.dot(w1_ref[...], x,
                         preferred_element_type=jnp.float32) + b1_ref[...])   # (50, P)
    h = jnp.tanh(jnp.dot(w2_ref[...], h,
                         preferred_element_type=jnp.float32) + b2_ref[...])   # (50, P)
    h = jnp.tanh(jnp.dot(w3_ref[...], h,
                         preferred_element_type=jnp.float32) + b3_ref[...])   # (20, P)
    net = jnp.dot(w4_ref[...], h,
                  preferred_element_type=jnp.float32) + b4_ref[...]           # (2, P)

    # ---- Laplacian + MLP fused directly into the lane-dense output store.
    out_ref[...] = diff + net


# --------------------------------- wrapper -----------------------------------
def hybrid_ode_forward(t, y, params, *, block_batch=BLOCK_BATCH):
    """t unused (mirrors the PyTorch signature). y: (B, NX, NY, 2) float32."""
    del t
    w1, b1, w2, b2, w3, b3, w4, b4 = params   # weights stored (in, out), biases (1, out)
    B, nx, ny, c = y.shape
    assert c == 2

    # Pad batch so every grid step owns exactly `block_batch` samples; with
    # block_batch=32 the flat lane dim per block (32*100=3200) is a multiple of 128.
    bb = block_batch
    pad = (-B) % bb
    if pad:
        y = jnp.concatenate([y, jnp.zeros((pad, nx, ny, c), y.dtype)], axis=0)
    bp = B + pad
    npts = nx * ny
    pblk = bb * npts

    # Channel-first, flattened, lane-dense view: (2, bp*nx*ny), flat = (b, i, j) j-fastest.
    x_flat = jnp.transpose(y, (3, 0, 1, 2)).reshape(2, bp * npts)

    # Transposed weights (out, in) and column biases (out, 1) for W^T @ X.
    w1t, w2t, w3t, w4t = w1.T, w2.T, w3.T, w4.T
    b1c, b2c, b3c, b4c = (jnp.reshape(b, (-1, 1)) for b in (b1, b2, b3, b4))

    def wspec(shape):
        return pl.BlockSpec(shape, lambda g: (0, 0))

    out_flat = pl.pallas_call(
        hybrid_ode_kernel,
        out_shape=jax.ShapeDtypeStruct((2, bp * npts), jnp.float32),
        grid_spec=pltpu.PrefetchScalarGridSpec(
            num_scalar_prefetch=0,
            grid=(bp // bb,),
            in_specs=[
                pl.BlockSpec((2, pblk), lambda g: (0, g)),
                wspec((H1, C)),  wspec((H1, 1)),
                wspec((H2, H1)), wspec((H2, 1)),
                wspec((H3, H2)), wspec((H3, 1)),
                wspec((C, H3)),  wspec((C, 1)),
            ],
            out_specs=pl.BlockSpec((2, pblk), lambda g: (0, g)),
        ),
        compiler_params=pltpu.CompilerParams(
            dimension_semantics=("parallel",)),
    )(x_flat, w1t, b1c, w2t, b2c, w3t, b3c, w4t, b4c)

    # Back to channel-last spatial layout; keep only real samples and the interior.
    out_full = out_flat.reshape(2, bp, nx, ny).transpose(1, 2, 3, 0)   # (bp, nx, ny, 2)
    return out_full[:B, 1:-1, 1:-1, :]


# ------------------------------ pure-JAX reference ----------------------------
def hybrid_ode_reference(t, y, params):
    del t
    w1, b1, w2, b2, w3, b3, w4, b4 = params
    u = y[..., 0]
    v = y[..., 1]
    du = D_COEF * ((u[..., 2:, 1:-1] - 2 * u[..., 1:-1, 1:-1] + u[..., :-2, 1:-1]) / DX2
                   + (u[..., 1:-1, 2:] - 2 * u[..., 1:-1, 1:-1] + u[..., 1:-1, :-2]) / DY2)
    dv = D_COEF * ((v[..., 2:, 1:-1] - 2 * v[..., 1:-1, 1:-1] + v[..., :-2, 1:-1]) / DX2
                   + (v[..., 1:-1, 2:] - 2 * v[..., 1:-1, 1:-1] + v[..., 1:-1, :-2]) / DY2)
    h = jnp.tanh(y @ w1 + b1[0])
    h = jnp.tanh(h @ w2 + b2[0])
    h = jnp.tanh(h @ w3 + b3[0])
    net = h @ w4 + b4[0]
    return jnp.stack([du, dv], axis=-1) + net[..., 1:-1, 1:-1, :]


# ---------------------------------- main --------------------------------------
if __name__ == "__main__":
    B = 64   # 2 grid steps of 32 samples -> both v7x TensorCores get work
    key = jax.random.PRNGKey(0)
    k_w1, k_w2, k_w3, k_w4, k_y = jax.random.split(key, 5)

    # nn.init.normal_(weight, mean=0, std=0.1); bias = 0.  Stored (in, out).
    w1 = 0.1 * jax.random.normal(k_w1, (2, H1), jnp.float32)
    b1 = jnp.zeros((1, H1), jnp.float32)
    w2 = 0.1 * jax.random.normal(k_w2, (H1, H2), jnp.float32)
    b2 = jnp.zeros((1, H2), jnp.float32)
    w3 = 0.1 * jax.random.normal(k_w3, (H2, H3), jnp.float32)
    b3 = jnp.zeros((1, H3), jnp.float32)
    w4 = 0.1 * jax.random.normal(k_w4, (H3, C), jnp.float32)
    b4 = jnp.zeros((1, C), jnp.float32)
    params = (w1, b1, w2, b2, w3, b3, w4, b4)

    y = jax.random.normal(k_y, (B, NX, NY, 2), jnp.float32)
    t = jnp.float32(0.0)

    out = jax.block_until_ready(hybrid_ode_forward(t, y, params))
    ref = jax.block_until_ready(hybrid_ode_reference(t, y, params))

    assert out.shape == (B, NX - 2, NY - 2, 2), out.shape
    assert out.dtype == jnp.float32
    if not bool(jnp.allclose(out, ref, atol=2e-5, rtol=2e-4)):
        err = float(jnp.max(jnp.abs(out - ref)))
        raise AssertionError(
            f"Pallas kernel output mismatch vs JAX reference (max abs err {err})")

    print("KERNEL_OK")
</pallas_src>

<mosaic_0001>
module attributes {stable_mosaic.version = 11 : i64} {
  func.func @hybrid_ode_kernel(%arg0: i32, %arg1: memref<2x3200xf32, #tpu.memory_space<vmem>>, %arg2: memref<50x2xf32, #tpu.memory_space<vmem>>, %arg3: memref<50x1xf32, #tpu.memory_space<vmem>>, %arg4: memref<50x50xf32, #tpu.memory_space<vmem>>, %arg5: memref<50x1xf32, #tpu.memory_space<vmem>>, %arg6: memref<20x50xf32, #tpu.memory_space<vmem>>, %arg7: memref<20x1xf32, #tpu.memory_space<vmem>>, %arg8: memref<2x20xf32, #tpu.memory_space<vmem>>, %arg9: memref<2x1xf32, #tpu.memory_space<vmem>>, %arg10: memref<2x3200xf32, #tpu.memory_space<vmem>>) attributes {dimension_semantics = [#tpu.dimension_semantics<parallel>], iteration_bounds = array<i64: 2>, scalar_prefetch = 0 : i64, scratch_operands = 0 : i64, tpu.core_type = #tpu.core_type<tc>, window_params = [{transform_indices = @transform_0, window_bounds = array<i64: 2, 3200>}, {pipeline_mode = #tpu.pipeline_mode<synchronous>, transform_indices = @transform_1, window_bounds = array<i64: 50, 2>}, {pipeline_mode = #tpu.pipeline_mode<synchronous>, transform_indices = @transform_2, window_bounds = array<i64: 50, 1>}, {pipeline_mode = #tpu.pipeline_mode<synchronous>, transform_indices = @transform_3, window_bounds = array<i64: 50, 50>}, {pipeline_mode = #tpu.pipeline_mode<synchronous>, transform_indices = @transform_4, window_bounds = array<i64: 50, 1>}, {pipeline_mode = #tpu.pipeline_mode<synchronous>, transform_indices = @transform_5, window_bounds = array<i64: 20, 50>}, {pipeline_mode = #tpu.pipeline_mode<synchronous>, transform_indices = @transform_6, window_bounds = array<i64: 20, 1>}, {pipeline_mode = #tpu.pipeline_mode<synchronous>, transform_indices = @transform_7, window_bounds = array<i64: 2, 20>}, {pipeline_mode = #tpu.pipeline_mode<synchronous>, transform_indices = @transform_8, window_bounds = array<i64: 2, 1>}, {transform_indices = @transform_9, window_bounds = array<i64: 2, 3200>}]} {
    %c0 = arith.constant 0 : index
    %c0_0 = arith.constant 0 : index
    %0 = vector.load %arg1[%c0, %c0_0] : memref<2x3200xf32, #tpu.memory_space<vmem>>, vector<2x3200xf32>
    %c10_i32 = arith.constant 10 : i32
    %1 = tpu.dynamic_rotate %0 by %c10_i32 dim 1 : vector<2x3200xf32>, i32 -> vector<2x3200xf32>
    %c3190_i32 = arith.constant 3190 : i32
    %2 = tpu.dynamic_rotate %0 by %c3190_i32 dim 1 : vector<2x3200xf32>, i32 -> vector<2x3200xf32>
    %3 = arith.addf %1, %2 : vector<2x3200xf32>
    %cst = arith.constant 2.000000e+00 : f32
    %4 = vector.broadcast %cst : f32 to vector<2x3200xf32>
    %5 = arith.mulf %4, %0 : vector<2x3200xf32>
    %6 = arith.subf %3, %5 : vector<2x3200xf32>
    %c1_i32 = arith.constant 1 : i32
    %7 = tpu.dynamic_rotate %0 by %c1_i32 dim 1 : vector<2x3200xf32>, i32 -> vector<2x3200xf32>
    %c3199_i32 = arith.constant 3199 : i32
    %8 = tpu.dynamic_rotate %0 by %c3199_i32 dim 1 : vector<2x3200xf32>, i32 -> vector<2x3200xf32>
    %9 = arith.addf %7, %8 : vector<2x3200xf32>
    %cst_1 = arith.constant 2.000000e+00 : f32
    %10 = vector.broadcast %cst_1 : f32 to vector<2x3200xf32>
    %11 = arith.mulf %10, %0 : vector<2x3200xf32>
    %12 = arith.subf %9, %11 : vector<2x3200xf32>
    %cst_2 = arith.constant 1.000000e+00 : f32
    %13 = vector.broadcast %cst_2 : f32 to vector<2x3200xf32>
    %14 = arith.divf %6, %13 : vector<2x3200xf32>
    %cst_3 = arith.constant 1.000000e+00 : f32
    %15 = vector.broadcast %cst_3 : f32 to vector<2x3200xf32>
    %16 = arith.divf %12, %15 : vector<2x3200xf32>
    %17 = arith.addf %14, %16 : vector<2x3200xf32>
    %cst_4 = arith.constant 1.000000e-03 : f32
    %18 = vector.broadcast %cst_4 : f32 to vector<2x3200xf32>
    %19 = arith.mulf %18, %17 : vector<2x3200xf32>
    %c0_5 = arith.constant 0 : index
    %c0_6 = arith.constant 0 : index
    %20 = vector.load %arg2[%c0_5, %c0_6] : memref<50x2xf32, #tpu.memory_space<vmem>>, vector<50x2xf32>
    %cst_7 = arith.constant dense<0.000000e+00> : vector<50x3200xf32>
    %21 = tpu.matmul %20, %0, %cst_7 {dimension_numbers = #tpu.dot_dimension_numbers<[1], [0], [0], [1], [0, 0, 1, 1], [], []>} : vector<50x2xf32>, vector<2x3200xf32>, vector<50x3200xf32> -> vector<50x3200xf32>
    %c0_8 = arith.constant 0 : index
    %c0_9 = arith.constant 0 : index
    %22 = vector.load %arg3[%c0_8, %c0_9] : memref<50x1xf32, #tpu.memory_space<vmem>>, vector<50x1xf32>
    %23 = vector.broadcast %22 : vector<50x1xf32> to vector<50x3200xf32>
    %24 = arith.addf %21, %23 : vector<50x3200xf32>
    %25 = math.tanh %24 : vector<50x3200xf32>
    %c0_10 = arith.constant 0 : index
    %c0_11 = arith.constant 0 : index
    %26 = vector.load %arg4[%c0_10, %c0_11] : memref<50x50xf32, #tpu.memory_space<vmem>>, vector<50x50xf32>
    %cst_12 = arith.constant dense<0.000000e+00> : vector<50x3200xf32>
    %27 = tpu.matmul %26, %25, %cst_12 {dimension_numbers = #tpu.dot_dimension_numbers<[1], [0], [0], [1], [0, 0, 1, 1], [], []>} : vector<50x50xf32>, vector<50x3200xf32>, vector<50x3200xf32> -> vector<50x3200xf32>
    %c0_13 = arith.constant 0 : index
    %c0_14 = arith.constant 0 : index
    %28 = vector.load %arg5[%c0_13, %c0_14] : memref<50x1xf32, #tpu.memory_space<vmem>>, vector<50x1xf32>
    %29 = vector.broadcast %28 : vector<50x1xf32> to vector<50x3200xf32>
    %30 = arith.addf %27, %29 : vector<50x3200xf32>
    %31 = math.tanh %30 : vector<50x3200xf32>
    %c0_15 = arith.constant 0 : index
    %c0_16 = arith.constant 0 : index
    %32 = vector.load %arg6[%c0_15, %c0_16] : memref<20x50xf32, #tpu.memory_space<vmem>>, vector<20x50xf32>
    %cst_17 = arith.constant dense<0.000000e+00> : vector<20x3200xf32>
    %33 = tpu.matmul %32, %31, %cst_17 {dimension_numbers = #tpu.dot_dimension_numbers<[1], [0], [0], [1], [0, 0, 1, 1], [], []>} : vector<20x50xf32>, vector<50x3200xf32>, vector<20x3200xf32> -> vector<20x3200xf32>
    %c0_18 = arith.constant 0 : index
    %c0_19 = arith.constant 0 : index
    %34 = vector.load %arg7[%c0_18, %c0_19] : memref<20x1xf32, #tpu.memory_space<vmem>>, vector<20x1xf32>
    %35 = vector.broadcast %34 : vector<20x1xf32> to vector<20x3200xf32>
    %36 = arith.addf %33, %35 : vector<20x3200xf32>
    %37 = math.tanh %36 : vector<20x3200xf32>
    %c0_20 = arith.constant 0 : index
    %c0_21 = arith.constant 0 : index
    %38 = vector.load %arg8[%c0_20, %c0_21] : memref<2x20xf32, #tpu.memory_space<vmem>>, vector<2x20xf32>
    %cst_22 = arith.constant dense<0.000000e+00> : vector<2x3200xf32>
    %39 = tpu.matmul %38, %37, %cst_22 {dimension_numbers = #tpu.dot_dimension_numbers<[1], [0], [0], [1], [0, 0, 1, 1], [], []>} : vector<2x20xf32>, vector<20x3200xf32>, vector<2x3200xf32> -> vector<2x3200xf32>
    %c0_23 = arith.constant 0 : index
    %c0_24 = arith.constant 0 : index
    %40 = vector.load %arg9[%c0_23, %c0_24] : memref<2x1xf32, #tpu.memory_space<vmem>>, vector<2x1xf32>
    %41 = vector.broadcast %40 : vector<2x1xf32> to vector<2x3200xf32>
    %42 = arith.addf %39, %41 : vector<2x3200xf32>
    %43 = arith.addf %19, %42 : vector<2x3200xf32>
    %c0_25 = arith.constant 0 : index
    %c0_26 = arith.constant 0 : index
    %44 = vector.load %arg10[%c0_25, %c0_26] : memref<2x3200xf32, #tpu.memory_space<vmem>>, vector<2x3200xf32>
    tpu.vector_store %arg10[%c0_25, %c0_26], %43 {strides = array<i32>} : memref<2x3200xf32, #tpu.memory_space<vmem>>, vector<2x3200xf32>,
    return
  }
  func.func @transform_0(%arg0: i32) -> (i32, i32) {
    %c0_i32 = arith.constant 0 : i32
    %c0_i32_0 = arith.constant 0 : i32
    return %c0_i32, %arg0 : i32, i32
  }
  func.func @transform_1(%arg0: i32) -> (i32, i32) {
    %c0_i32 = arith.constant 0 : i32
    %c0_i32_0 = arith.constant 0 : i32
    %c0_i32_1 = arith.constant 0 : i32
    return %c0_i32, %c0_i32_0 : i32, i32
  }
  func.func @transform_2(%arg0: i32) -> (i32, i32) {
    %c0_i32 = arith.constant 0 : i32
    %c0_i32_0 = arith.constant 0 : i32
    %c0_i32_1 = arith.constant 0 : i32
    return %c0_i32, %c0_i32_0 : i32, i32
  }
  func.func @transform_3(%arg0: i32) -> (i32, i32) {
    %c0_i32 = arith.constant 0 : i32
    %c0_i32_0 = arith.constant 0 : i32
    %c0_i32_1 = arith.constant 0 : i32
    return %c0_i32, %c0_i32_0 : i32, i32
  }
  func.func @transform_4(%arg0: i32) -> (i32, i32) {
    %c0_i32 = arith.constant 0 : i32
    %c0_i32_0 = arith.constant 0 : i32
    %c0_i32_1 = arith.constant 0 : i32
    return %c0_i32, %c0_i32_0 : i32, i32
  }
  func.func @transform_5(%arg0: i32) -> (i32, i32) {
    %c0_i32 = arith.constant 0 : i32
    %c0_i32_0 = arith.constant 0 : i32
    %c0_i32_1 = arith.constant 0 : i32
    return %c0_i32, %c0_i32_0 : i32, i32
  }
  func.func @transform_6(%arg0: i32) -> (i32, i32) {
    %c0_i32 = arith.constant 0 : i32
    %c0_i32_0 = arith.constant 0 : i32
    %c0_i32_1 = arith.constant 0 : i32
    return %c0_i32, %c0_i32_0 : i32, i32
  }
  func.func @transform_7(%arg0: i32) -> (i32, i32) {
    %c0_i32 = arith.constant 0 : i32
    %c0_i32_0 = arith.constant 0 : i32
    %c0_i32_1 = arith.constant 0 : i32
    return %c0_i32, %c0_i32_0 : i32, i32
  }
  func.func @transform_8(%arg0: i32) -> (i32, i32) {
    %c0_i32 = arith.constant 0 : i32
    %c0_i32_0 = arith.constant 0 : i32
    %c0_i32_1 = arith.constant 0 : i32
    return %c0_i32, %c0_i32_0 : i32, i32
  }
  func.func @transform_9(%arg0: i32) -> (i32, i32) {
    %c0_i32 = arith.constant 0 : i32
    %c0_i32_0 = arith.constant 0 : i32
    return %c0_i32, %arg0 : i32, i32
  }
}

</mosaic_0001>

<bundles_post_ra>
// kernel: tpu_custom_call.1
= control target key start
LH: loop header
LB: loop body
LE: loop exit
PB: predicated region body
PF: predicated region fallthrough
CT: control target
= control target key end

     0   :  { %14 = vsyncpa [#allocation3], 0  ;;  %s11677_s0 = inlined_call_operand.vmem [shape: f32[2,6400], index: 0, kind: input, shape index: {}]   ;;  %s11678_s1 = inlined_call_operand.vmem [shape: f32[50,2], index: 1, kind: input, shape index: {}]   ;;  %s11679_s2 = inlined_call_operand.vmem [shape: f32[50,1], index: 2, kind: input, shape index: {}]   ;;  %s11680_s3 = inlined_call_operand.vmem [shape: f32[50,50], index: 3, kind: input, shape index: {}]   ;;  %s11681_s4 = inlined_call_operand.vmem [shape: f32[50,1], index: 4, kind: input, shape index: {}]   ;;  %s11682_s5 = inlined_call_operand.vmem [shape: f32[20,50], index: 5, kind: input, shape index: {}]   ;;  %s11683_s6 = inlined_call_operand.vmem [shape: f32[20,1], index: 6, kind: input, shape index: {}]   ;;  %s11684_s7 = inlined_call_operand.vmem [shape: f32[2,20], index: 7, kind: input, shape index: {}]   ;;  %s11685_s8 = inlined_call_operand.vmem [shape: f32[2,1], index: 8, kind: input, shape index: {}]   ;;  %s11686_s9 = inlined_call_operand.hbm [shape: f32[2,6400], index: 9, kind: output, shape index: {}]  }
   0x1   :  { %16 = vsyncpa [#allocation3 + $0x1], 0  ;;  %s8861_s30 = smov 0   ;;  %s8863_s10 = smov 0  }
   0x2   :  { %s8865_s11 = smov 0   ;;  %s8867_s12 = smov 0  }
   0x3 LB: > { %s8882_s13 = sadd.s32 4294967295, %s8799_s12   ;;  %s6984_s14 = sadd.s32 4294967294, %s8799_s12   ;;  %s8799_s12 = sphi %s8867_s12, %s11833_s12   ;;  %s8795_s11 = sphi %s8865_s11, %s11832_s11   ;;  %s8791_s10 = sphi %s8863_s10, %s11831_s10   ;;  %s8787_s30 = sphi %s8861_s30, %s11830_s30  }
   0x4   : > { %s8886_s15 = sadd.s32 1, %s8799_s12   ;;  %s223_s16 = sadd.s32 1, %s8795_s11 }
   0x5   : > { %s220_s17 = ssub.s32 %s8799_s12, %s8886_s15  ;;  %p233_p0 = scmp.ne.s32.totalorder %s8795_s11, %s8791_s10 }
   0x6   : > { %p221_p1 = scmp.eq.s32.totalorder %s220_s17, 0  ;;  %p234_p2 = scmp.eq.s32.totalorder %s8882_s13, 1 }
   0x7   : > { %p239_p3 = scmp.ne.s32.totalorder %s8791_s10, %s8787_s30  ;;  %p240_p4 = scmp.eq.s32.totalorder %s6984_s14, 1 }
   0x8   : > { %s8897_s18 = scalar_select %p221_p1, %s8795_s11, %s223_s16  }
   0x9   : > { %p8899_p5 = por %p234_p2, %p233_p0  ;;  %p8903_p6 = por %p240_p4, %p239_p3 }
   0xa   : > { %p6987_p7 = scmp.ge.s32.totalorder %s8799_s12, 1  ;;  %p291_p8 = scmp.lt.s32.totalorder %s8799_s12, 3 }
   0xc   : > { %p292_p9 = pnand %p6987_p7, %p291_p8 }
   0xe   : > { %295 = sbr.rel (%p292_p9) target bundleno = 1185 (0x4a1), region = 56 }
  0x15   : > { %v1095_v0 = vld [vmem:[%s11679_s2 + $0x10] sm:$0xff]  ;;  %s327_s23 = smul.u32 25, %s8882_s13  ;;  %v352_v1 = vlaneseq  ;;  %v8801_v2 = vmov 0   ;;  %v8802_v3 = vmov 1983009808   ;;  %v11688_v6 = vmov 0.0  }
  0x16   : > { %7861 = vset.pattern.permute.xlu1 %v8801_v2  ;;  %7860 = vset.pattern.permute.xlu0 %v8801_v2  ;;  %v350_v4 = vunpack.c.l.s4 %v8802_v3  ;;  %v1096_v7 = vld [vmem:[%s11679_s2 + $0x18] sm:$0xff]  ;;  %v1093_v9 = vld [vmem:[%s11679_s2] sm:$0xff]  ;;  %v1098_v11 = vld [vmem:[%s11679_s2 + $0x28] sm:$0xff]  ;;  %vm1157_vm0 = vcmask 1041408   ;;  %vm1135_vm1 = vcmask 15360   ;;  %s8804_s14 = smov 10  }
  0x17   : > { %1112 = vperm.xlu1 %7861, %v1095_v0   ;;  %p328_p10 = scmp.lt.s32.totalorder %s327_s23, 49  ;;  %v353_v5 = vshrl.u32 %v352_v1, 7  ;;  %1272 = vmatprep.mubr.f32.mxu0 %v11688_v6  ;;  %v1094_v14 = vld [vmem:[%s11679_s2 + $0x8] sm:$0xff]  ;;  %v2774_v20 = vld [vmem:[%s11681_s4] sm:$0xff]  ;;  %v2776_v28 = vld [vmem:[%s11681_s4 + $0x10] sm:$0xff]  ;;  %s8805_s16 = smov 118  }
  0x18   : > { %1379 = vmatprep.mubr.f32.mxu1 %v11688_v6  ;;  %v351_v8 = vunpack.c.0.s8 %v350_v4  ;;  %1102 = vperm.xlu0 %7860, %v1093_v9   ;;  %v8959_v23 = vld [vmem:[%s11678_s1] sm:$0xff]  ;;  %v8994_v31 = vld [vmem:[%s11678_s1 + $0x8] sm:$0xff]  ;;  %v9019_v35 = vld [vmem:[%s11678_s1 + $0x10] sm:$0xff]  ;;  %vm8807_vm2 = vmmov 0   ;;  %s8808_s17 = smov 127   ;;  %vm2816_vm3 = vcmask 408576  }
  0x19   : > { %s11835_s23 = smov (!%p328_p10, %s327_s23), 49  ;;  %v2778_v34 = vld [vmem:[%s11681_s4 + $0x20] sm:$0xff]  ;;  %v2780_v38 = vld [vmem:[%s11681_s4 + $0x30] sm:$0x3]  ;;  %v9046_v39 = vld [vmem:[%s11678_s1 + $0x18] sm:$0xff]  ;;  %vm5739_vm6 = vcmask 1043456  }
  0x1a   : > { %s6988_s28 = sshll.u32 %s11835_s23, 1  ;;  %v8922_v10 = vsub.s32 %v351_v8, %v353_v5  ;;  %v1097_v37 = vld [vmem:[%s11679_s2 + $0x20] sm:$0xff]  ;;  %v1099_v40 = vld [vmem:[%s11679_s2 + $0x30] sm:$0x3]  ;;  %v4476_v41 = vld [vmem:[%s11683_s6 + $0x8] sm:$0xff]  ;;  %vm5735_vm7 = vcmask 162816  }
  0x1b   : > { %1117 = vperm.xlu1 %7861, %v1096_v7   ;;  %s8930_s21 = scalar_lea.vmem %s11677_s0, %s6988_s28  ;;  %v9065_v42 = vld [vmem:[%s11678_s1 + $0x20] sm:$0xff]  ;;  %v2775_v43 = vld [vmem:[%s11681_s4 + $0x8] sm:$0xff]  ;;  %v2777_v45 = vld [vmem:[%s11681_s4 + $0x18] sm:$0xff]  ;;  %s7327_s29 = smul.u32 800, %s8882_s13 }
  0x1c   : > { %v334_v12 = vld [vmem:[%s8930_s21] sm:$0xff]  ;;  %v335_v13 = vld [vmem:[%s8930_s21 + $0x8] sm:$0xff]  ;;  %1107 = vperm.xlu0 %7860, %v1094_v14   ;;  %v336_v24 = vld [vmem:[%s8930_s21 + $0x10] sm:$0xff]  ;;  %s8810_s23 = smov [#allocation2]  }
  0x1d   : > { %v8938_v15 = vrot.slane %v334_v12, %v8922_v10  ;;  %v348_v16 = vcombine.high %v334_v12, %v334_v12  ;;  %v8941_v17 = vrot.slane %v335_v13, %v8922_v10  ;;  %v365_v18 = vcombine.high %v335_v13, %v335_v13  ;;  %v9079_v44 = vld [vmem:[%s11678_s1 + $0x28] sm:$0xff]  ;;  %v9095_v46 = vld [vmem:[%s11678_s1 + $0x30] sm:$0x3]  ;;  %v337_v47 = vld [vmem:[%s8930_s21 + $0x18] sm:$0xff]  ;;  %s11632_s22 = scalar_lea.hbm %s11686_s9, %s7327_s29  ;;  %s8741_s25 = sshll.u32 %s8810_s23, 4  ;;  %s8742_s25 = int_to_ptr.vmem [resolvable:$false] %s8741_s25 }
  0x1e   : > { %v382_v27 = vcombine.high %v336_v24, %v336_v24  ;;  %v8986_v30 = vrot.slane %v336_v24, %v8922_v10  ;;  %v399_v48 = vcombine.high %v337_v47, %v337_v47  ;;  %v2779_v49 = vld [vmem:[%s11681_s4 + $0x28] sm:$0xff]  ;;  %v9109_v50 = vrot.slane %v337_v47, %v8922_v10  ;;  %v4475_v54 = vld [vmem:[%s11683_s6] sm:$0xff]  ;;  %v4477_v55 = vld [vmem:[%s11683_s6 + $0x10] sm:$0xf]  ;;  %s8743_s26 = scalar_lea.vmem %s8742_s25, 1600 }
  0x1f   : > { %1127 = vperm.xlu1 %7861, %v1098_v11   ;;  %v8945_v19 = vcombine.high %v8938_v15, %v8938_v15  ;;  %v8951_v21 = vrot.slane %v348_v16, %v8922_v10  ;;  %v8954_v22 = vrot.slane %v365_v18, %v8922_v10  ;;  %v8970_v26 = vcombine.high %v8941_v17, %v8941_v17  ;;  %v338_v56 = vld [vmem:[%s8930_s21 + $0x20] sm:$0xff]  ;;  %v339_v60 = vld [vmem:[%s8930_s21 + $0x28] sm:$0xff]  ;;  %v9243_v3 = vld.sshfl [vmem:[%s8930_s21 + $0x30] sm:$0x3 pattern:$0x76325410] }
  0x20   : > { %v9002_v32 = vcombine.high %v8986_v30, %v8986_v30  ;;  %v9006_v33 = vrot.slane %v382_v27, %v8922_v10  ;;  %1122 = vperm.xlu0 %7860, %v1097_v37   ;;  %v9116_v51 = vcombine.high %v9109_v50, %v9109_v50  ;;  %v9122_v52 = vrot.slane %v399_v48, %v8922_v10 }
  0x21   : > { %6989 = vmatprep.subr.msk.mxu0 %vm1157_vm0, %v8945_v19  ;;  %v8966_v25 = vcombine.high %v8951_v21, %v8951_v21  ;;  %v8983_v29 = vcombine.high %v8954_v22, %v8954_v22  ;;  %v9188_v57 = vrot.slane %v338_v56, %v8922_v10  ;;  %v416_v58 = vcombine.high %v338_v56, %v338_v56 }
  0x22   : > { %6990 = vmatpush1.msk.msra.mxu0 %vm1157_vm0, %v8938_v15  ;;  %v9025_v36 = vcombine.high %v9006_v33, %v9006_v33  ;;  %v9131_v53 = vcombine.high %v9122_v52, %v9122_v52  ;;  %v9215_v61 = vrot.slane %v339_v60, %v8922_v10  ;;  %v433_v62 = vcombine.high %v339_v60, %v339_v60 }
  0x23   : > { %2783 = vperm.xlu1 %7861, %v2774_v20   ;;  %6991 = vmatmul.mubr.msk.f32.vlgmr.msra.gmra.mrb[0].mxu0 %vm1135_vm1, %v8959_v23  ;;  %v9201_v59 = vrot.slane %v416_v58, %v8922_v10  ;;  %v9221_v63 = vcombine.high %v9188_v57, %v9188_v57 }
  0x24   : > { %6998 = vmatprep.subr.msk.mxu1 %vm1157_vm0, %v8966_v25  ;;  %1278 = vmatprep.mubr.f32.mxu0 %v11688_v6  ;;  %v9234_v0 = vrot.slane %v433_v62, %v8922_v10  ;;  %v9311_v4 = vcombine.high %v9215_v61, %v9215_v61 }
  0x25   : > { %6999 = vmatpush1.msk.msra.mxu1 %vm1157_vm0, %v8951_v21  ;;  %7007 = vmatprep.subr.msk.mxu0 %vm1157_vm0, %v8970_v26  ;;  %v9238_v2 = vcombine.high %v9201_v59, %v9201_v59 }
  0x26   : > { %7000 = vmatmul.mubr.msk.f32.vlgmr.msra.gmra.mrb[0].mxu1 %vm1135_vm1, %v8959_v23  ;;  %7016 = vmatprep.subr.msk.mxu1 %vm1157_vm0, %v8983_v29  ;;  %v9325_v5 = vcombine.high %v9234_v0, %v9234_v0 }
  0x27   : > { %2793 = vperm.xlu1 %7861, %v2776_v28   ;;  %1385 = vmatprep.mubr.f32.mxu1 %v11688_v6 }
  0x28   : > { %6992 = vmatmul.mubr.msk.f32.gmra.mrb[2].mxu0 %vm1135_vm1, %v8994_v31  ;;  %7017 = vmatpush1.msk.msra.mxu1 %vm1157_vm0, %v8954_v22 }
  0x29   : > { %1284 = vmatprep.mubr.f32.mxu0 %v11688_v6  ;;  %7008 = vmatpush1.msk.msra.mxu0 %vm1157_vm0, %v8941_v17 }
  0x2a   : > { %7001 = vmatmul.mubr.msk.f32.gmra.mrb[2].mxu1 %vm1135_vm1, %v8994_v31  ;;  %7025 = vmatprep.subr.msk.mxu0 %vm1157_vm0, %v9002_v32 }
  0x2b   : > { %2803 = vperm.xlu1 %7861, %v2778_v34   ;;  %1391 = vmatprep.mubr.f32.mxu1 %v11688_v6 }
  0x2c   : > { %6993 = vmatmul.mubr.msk.f32.gmra.mrb[4].mxu0 %vm1135_vm1, %v9019_v35  ;;  %7034 = vmatprep.subr.msk.mxu1 %vm1157_vm0, %v9025_v36 }
  0x2d   : > { %1290 = vmatprep.mubr.f32.mxu0 %v11688_v6  ;;  %1132 = vperm.xlu0 %7860, %v1099_v40  }
  0x2e   : > { %7002 = vmatmul.mubr.msk.f32.gmra.mrb[4].mxu1 %vm1135_vm1, %v9019_v35 }
  0x2f   : > { %2813 = vperm.xlu1 %7861, %v2780_v38   ;;  %1397 = vmatprep.mubr.f32.mxu1 %v11688_v6 }
  0x30   : > { %6994 = vmatmul.mubr.msk.f32.gmra.mrb[6].mxu0 %vm1135_vm1, %v9046_v39 }
  0x31   : > { %1296 = vmatprep.mubr.f32.mxu0 %v11688_v6  ;;  %2788 = vperm.xlu0 %7860, %v2775_v43  }
  0x32   : > { %7003 = vmatmul.mubr.msk.f32.gmra.mrb[6].mxu1 %vm1135_vm1, %v9046_v39 }
  0x33   : > { %4485 = vperm.xlu1 %7861, %v4476_v41   ;;  %1403 = vmatprep.mubr.f32.mxu1 %v11688_v6 }
  0x34   : > { %6995 = vmatmul.mubr.msk.f32.gmra.mrb[8].mxu0 %vm1135_vm1, %v9065_v42 }
  0x35   : > { %1302 = vmatprep.mubr.f32.mxu0 %v11688_v6  ;;  %2798 = vperm.xlu0 %7860, %v2777_v45  }
  0x36   : > { %7004 = vmatmul.mubr.msk.f32.gmra.mrb[8].mxu1 %vm1135_vm1, %v9065_v42 }
  0x37   : > { %482 = vrot.lane.b32.xlu1 %v8938_v15, %s8804_s14  ;;  %1409 = vmatprep.mubr.f32.mxu1 %v11688_v6 }
  0x38   : > { %6996 = vmatmul.mubr.msk.f32.gmra.mrb[10].mxu0 %vm1135_vm1, %v9079_v44 }
  0x39   : > { %1308 = vmatprep.mubr.f32.mxu0 %v11688_v6  ;;  %2808 = vperm.xlu0 %7860, %v2779_v49  }
  0x3a   : > { %7005 = vmatmul.mubr.msk.f32.gmra.mrb[10].mxu1 %vm1135_vm1, %v9079_v44 }
  0x3b   : > { %486 = vrot.lane.b32.xlu1 %v8951_v21, %s8804_s14  ;;  %1415 = vmatprep.mubr.f32.mxu1 %v11688_v6 }
  0x3c   : > { %6997 = vmatmul.mubr.msk.f32.gmra.mrb[12].mxu0 %vm1135_vm1, %v9095_v46 }
  0x3d   : > { %1486 = vmatprep.mubr.f32.mxu0 %v11688_v6  ;;  %4480 = vperm.xlu0 %7860, %v4475_v54  }
  0x3e   : > { %7006 = vmatmul.mubr.msk.f32.gmra.mrb[12].mxu1 %vm1135_vm1, %v9095_v46 }
  0x3f   : > { %490 = vrot.lane.b32.xlu1 %v8941_v17, %s8804_s14  ;;  %1593 = vmatprep.mubr.f32.mxu1 %v11688_v6 }
  0x40   : > { %7009 = vmatmul.mubr.msk.f32.vlgmr.msra.gmra.mrb[14].mxu0 %vm1135_vm1, %v8959_v23 }
  0x41   : > { %1492 = vmatprep.mubr.f32.mxu0 %v11688_v6  ;;  %7026 = vmatpush1.msk.msra.mxu0 %vm1157_vm0, %v8986_v30 }
  0x42   : > { %7018 = vmatmul.mubr.msk.f32.vlgmr.msra.gmra.mrb[14].mxu1 %vm1135_vm1, %v8959_v23  ;;  %7043 = vmatprep.subr.msk.mxu0 %vm1157_vm0, %v9116_v51 }
  0x43   : > { %494 = vrot.lane.b32.xlu1 %v8954_v22, %s8804_s14  ;;  %1599 = vmatprep.mubr.f32.mxu1 %v11688_v6 }
  0x44   : > { %7010 = vmatmul.mubr.msk.f32.gmra.mrb[16].mxu0 %vm1135_vm1, %v8994_v31  ;;  %7035 = vmatpush1.msk.msra.mxu1 %vm1157_vm0, %v9006_v33 }
  0x45   : > { %1498 = vmatprep.mubr.f32.mxu0 %v11688_v6  ;;  %7052 = vmatprep.subr.msk.mxu1 %vm1157_vm0, %v9131_v53 }
  0x46   : > { %7019 = vmatmul.mubr.msk.f32.gmra.mrb[16].mxu1 %vm1135_vm1, %v8994_v31  ;;  %4490 = vperm.xlu0 %7860, %v4477_v55  }
  0x47   : > { %498 = vrot.lane.b32.xlu1 %v8986_v30, %s8804_s14  ;;  %1605 = vmatprep.mubr.f32.mxu1 %v11688_v6 }
  0x48   : > { %7011 = vmatmul.mubr.msk.f32.gmra.mrb[18].mxu0 %vm1135_vm1, %v9019_v35 }
  0x49   : > { %1504 = vmatprep.mubr.f32.mxu0 %v11688_v6 }
  0x4a   : > { %7020 = vmatmul.mubr.msk.f32.gmra.mrb[18].mxu1 %vm1135_vm1, %v9019_v35  ;;  %484 = vrot.lane.b32.xlu0 %v8945_v19, %s8804_s14 }
  0x4b   : > { %502 = vrot.lane.b32.xlu1 %v9006_v33, %s8804_s14  ;;  %1611 = vmatprep.mubr.f32.mxu1 %v11688_v6 }
  0x4c   : > { %7012 = vmatmul.mubr.msk.f32.gmra.mrb[20].mxu0 %vm1135_vm1, %v9046_v39 }
  0x4d   : > { %1510 = vmatprep.mubr.f32.mxu0 %v11688_v6 }
  0x4e   : > { %7021 = vmatmul.mubr.msk.f32.gmra.mrb[20].mxu1 %vm1135_vm1, %v9046_v39  ;;  %488 = vrot.lane.b32.xlu0 %v8966_v25, %s8804_s14 }
  0x4f   : > { %506 = vrot.lane.b32.xlu1 %v9109_v50, %s8804_s14  ;;  %1617 = vmatprep.mubr.f32.mxu1 %v11688_v6 }
  0x50   : > { %7013 = vmatmul.mubr.msk.f32.gmra.mrb[22].mxu0 %vm1135_vm1, %v9065_v42 }
  0x51   : > { %1516 = vmatprep.mubr.f32.mxu0 %v11688_v6 }
  0x52   : > { %7022 = vmatmul.mubr.msk.f32.gmra.mrb[22].mxu1 %vm1135_vm1, %v9065_v42  ;;  %492 = vrot.lane.b32.xlu0 %v8970_v26, %s8804_s14 }
  0x53   : > { %510 = vrot.lane.b32.xlu1 %v9122_v52, %s8804_s14  ;;  %1623 = vmatprep.mubr.f32.mxu1 %v11688_v6 }
  0x54   : > { %7014 = vmatmul.mubr.msk.f32.gmra.mrb[24].mxu0 %vm1135_vm1, %v9079_v44 }
  0x55   : > { %1522 = vmatprep.mubr.f32.mxu0 %v11688_v6 }
  0x56   : > { %7023 = vmatmul.mubr.msk.f32.gmra.mrb[24].mxu1 %vm1135_vm1, %v9079_v44  ;;  %496 = vrot.lane.b32.xlu0 %v8983_v29, %s8804_s14 }
  0x57   : > { %514 = vrot.lane.b32.xlu1 %v9188_v57, %s8804_s14  ;;  %1629 = vmatprep.mubr.f32.mxu1 %v11688_v6 }
  0x58   : > { %7015 = vmatmul.mubr.msk.f32.gmra.mrb[26].mxu0 %vm1135_vm1, %v9095_v46 }
  0x59   : > { %1700 = vmatprep.mubr.f32.mxu0 %v11688_v6 }
  0x5a   : > { %7024 = vmatmul.mubr.msk.f32.gmra.mrb[26].mxu1 %vm1135_vm1, %v9095_v46  ;;  %500 = vrot.lane.b32.xlu0 %v9002_v32, %s8804_s14 }
  0x5b   : > { %518 = vrot.lane.b32.xlu1 %v9201_v59, %s8804_s14  ;;  %1807 = vmatprep.mubr.f32.mxu1 %v11688_v6 }
  0x5c   : > { %7027 = vmatmul.mubr.msk.f32.vlgmr.msra.gmra.mrb[28].mxu0 %vm1135_vm1, %v8959_v23 }
  0x5d   : > { %1706 = vmatprep.mubr.f32.mxu0 %v11688_v6  ;;  %7044 = vmatpush1.msk.msra.mxu0 %vm1157_vm0, %v9109_v50 }
  0x5e   : > { %7036 = vmatmul.mubr.msk.f32.vlgmr.msra.gmra.mrb[28].mxu1 %vm1135_vm1, %v8959_v23  ;;  %7061 = vmatprep.subr.msk.mxu0 %vm1157_vm0, %v9221_v63 }
  0x5f   : > { %522 = vrot.lane.b32.xlu1 %v9215_v61, %s8804_s14  ;;  %1813 = vmatprep.mubr.f32.mxu1 %v11688_v6 }
  0x60   : > { %7028 = vmatmul.mubr.msk.f32.gmra.mrb[30].mxu0 %vm1135_vm1, %v8994_v31  ;;  %7053 = vmatpush1.msk.msra.mxu1 %vm1157_vm0, %v9122_v52 }
  0x61   : > { %1712 = vmatprep.mubr.f32.mxu0 %v11688_v6  ;;  %7070 = vmatprep.subr.msk.mxu1 %vm1157_vm0, %v9238_v2 }
  0x62   : > { %7037 = vmatmul.mubr.msk.f32.gmra.mrb[30].mxu1 %vm1135_vm1, %v8994_v31  ;;  %504 = vrot.lane.b32.xlu0 %v9025_v36, %s8804_s14 }
  0x63   : > { %526 = vrot.lane.b32.xlu1 %v9234_v0, %s8804_s14  ;;  %1819 = vmatprep.mubr.f32.mxu1 %v11688_v6 }
  0x64   : > { %7029 = vmatmul.mubr.msk.f32.gmra.mrb[32].mxu0 %vm1135_vm1, %v9019_v35 }
  0x65   : > { %1718 = vmatprep.mubr.f32.mxu0 %v11688_v6 }
  0x66   : > { %7038 = vmatmul.mubr.msk.f32.gmra.mrb[32].mxu1 %vm1135_vm1, %v9019_v35  ;;  %508 = vrot.lane.b32.xlu0 %v9116_v51, %s8804_s14 }
  0x67   : > { %530 = vrot.lane.b32.xlu1 %v9243_v3, %s8804_s14  ;;  %1825 = vmatprep.mubr.f32.mxu1 %v11688_v6 }
  0x68   : > { %7030 = vmatmul.mubr.msk.f32.gmra.mrb[34].mxu0 %vm1135_vm1, %v9046_v39 }
  0x69   : > { %1724 = vmatprep.mubr.f32.mxu0 %v11688_v6 }
  0x6a   : > { %7039 = vmatmul.mubr.msk.f32.gmra.mrb[34].mxu1 %vm1135_vm1, %v9046_v39  ;;  %512 = vrot.lane.b32.xlu0 %v9131_v53, %s8804_s14 }
  0x6b   : > { %562 = vrot.lane.b32.xlu1 %v8945_v19, %s8805_s16  ;;  %1831 = vmatprep.mubr.f32.mxu1 %v11688_v6 }
  0x6c   : > { %7031 = vmatmul.mubr.msk.f32.gmra.mrb[36].mxu0 %vm1135_vm1, %v9065_v42 }
  0x6d   : > { %1730 = vmatprep.mubr.f32.mxu0 %v11688_v6 }
  0x6e   : > { %7040 = vmatmul.mubr.msk.f32.gmra.mrb[36].mxu1 %vm1135_vm1, %v9065_v42  ;;  %516 = vrot.lane.b32.xlu0 %v9221_v63, %s8804_s14 }
  0x6f   : > { %566 = vrot.lane.b32.xlu1 %v8966_v25, %s8805_s16  ;;  %1837 = vmatprep.mubr.f32.mxu1 %v11688_v6 }
  0x70   : > { %7032 = vmatmul.mubr.msk.f32.gmra.mrb[38].mxu0 %vm1135_vm1, %v9079_v44 }
  0x71   : > { %1736 = vmatprep.mubr.f32.mxu0 %v11688_v6 }
  0x72   : > { %7041 = vmatmul.mubr.msk.f32.gmra.mrb[38].mxu1 %vm1135_vm1, %v9079_v44  ;;  %520 = vrot.lane.b32.xlu0 %v9238_v2, %s8804_s14 }
  0x73   : > { %570 = vrot.lane.b32.xlu1 %v8970_v26, %s8805_s16  ;;  %1843 = vmatprep.mubr.f32.mxu1 %v11688_v6 }
  0x74   : > { %7033 = vmatmul.mubr.msk.f32.gmra.mrb[40].mxu0 %vm1135_vm1, %v9095_v46 }
  0x75   : > { %1914 = vmatprep.mubr.f32.mxu0 %v11688_v6 }
  0x76   : > { %7042 = vmatmul.mubr.msk.f32.gmra.mrb[40].mxu1 %vm1135_vm1, %v9095_v46  ;;  %524 = vrot.lane.b32.xlu0 %v9311_v4, %s8804_s14 }
  0x77   : > { %574 = vrot.lane.b32.xlu1 %v8983_v29, %s8805_s16  ;;  %2021 = vmatprep.mubr.f32.mxu1 %v11688_v6 }
  0x78   : > { %7045 = vmatmul.mubr.msk.f32.vlgmr.msra.gmra.mrb[42].mxu0 %vm1135_vm1, %v8959_v23 }
  0x79   : > { %1920 = vmatprep.mubr.f32.mxu0 %v11688_v6  ;;  %7062 = vmatpush1.msk.msra.mxu0 %vm1157_vm0, %v9188_v57 }
  0x7a   : > { %7054 = vmatmul.mubr.msk.f32.vlgmr.msra.gmra.mrb[42].mxu1 %vm1135_vm1, %v8959_v23  ;;  %7079 = vmatprep.subr.msk.mxu0 %vm1157_vm0, %v9311_v4 }
  0x7b   : > { %578 = vrot.lane.b32.xlu1 %v9002_v32, %s8805_s16  ;;  %2027 = vmatprep.mubr.f32.mxu1 %v11688_v6 }
  0x7c   : > { %7046 = vmatmul.mubr.msk.f32.gmra.mrb[44].mxu0 %vm1135_vm1, %v8994_v31  ;;  %7071 = vmatpush1.msk.msra.mxu1 %vm1157_vm0, %v9201_v59 }
  0x7d   : > { %1926 = vmatprep.mubr.f32.mxu0 %v11688_v6  ;;  %7088 = vmatprep.subr.msk.mxu1 %vm1157_vm0, %v9325_v5 }
  0x7e   : > { %7055 = vmatmul.mubr.msk.f32.gmra.mrb[44].mxu1 %vm1135_vm1, %v8994_v31  ;;  %528 = vrot.lane.b32.xlu0 %v9325_v5, %s8804_s14  ;;  %s8806_s14 = smov 1  }
  0x7f   : > { %582 = vrot.lane.b32.xlu1 %v9025_v36, %s8805_s16  ;;  %2033 = vmatprep.mubr.f32.mxu1 %v11688_v6 }
  0x80   : > { %7047 = vmatmul.mubr.msk.f32.gmra.mrb[46].mxu0 %vm1135_vm1, %v9019_v35 }
  0x81   : > { %1932 = vmatprep.mubr.f32.mxu0 %v11688_v6 }
  0x82   : > { %7056 = vmatmul.mubr.msk.f32.gmra.mrb[46].mxu1 %vm1135_vm1, %v9019_v35  ;;  %560 = vrot.lane.b32.xlu0 %v8938_v15, %s8805_s16 }
  0x83   : > { %586 = vrot.lane.b32.xlu1 %v9116_v51, %s8805_s16  ;;  %2039 = vmatprep.mubr.f32.mxu1 %v11688_v6 }
  0x84   : > { %7048 = vmatmul.mubr.msk.f32.gmra.mrb[48].mxu0 %vm1135_vm1, %v9046_v39 }
  0x85   : > { %1938 = vmatprep.mubr.f32.mxu0 %v11688_v6 }
  0x86   : > { %7057 = vmatmul.mubr.msk.f32.gmra.mrb[48].mxu1 %vm1135_vm1, %v9046_v39  ;;  %564 = vrot.lane.b32.xlu0 %v8951_v21, %s8805_s16 }
  0x87   : > { %590 = vrot.lane.b32.xlu1 %v9131_v53, %s8805_s16  ;;  %2045 = vmatprep.mubr.f32.mxu1 %v11688_v6 }
  0x88   : > { %7049 = vmatmul.mubr.msk.f32.gmra.mrb[50].mxu0 %vm1135_vm1, %v9065_v42 }
  0x89   : > { %1944 = vmatprep.mubr.f32.mxu0 %v11688_v6 }
  0x8a   : > { %7058 = vmatmul.mubr.msk.f32.gmra.mrb[50].mxu1 %vm1135_vm1, %v9065_v42  ;;  %568 = vrot.lane.b32.xlu0 %v8941_v17, %s8805_s16 }
  0x8b   : > { %594 = vrot.lane.b32.xlu1 %v9221_v63, %s8805_s16  ;;  %2051 = vmatprep.mubr.f32.mxu1 %v11688_v6 }
  0x8c   : > { %7050 = vmatmul.mubr.msk.f32.gmra.mrb[52].mxu0 %vm1135_vm1, %v9079_v44 }
  0x8d   : > { %1950 = vmatprep.mubr.f32.mxu0 %v11688_v6 }
  0x8e   : > { %7059 = vmatmul.mubr.msk.f32.gmra.mrb[52].mxu1 %vm1135_vm1, %v9079_v44  ;;  %572 = vrot.lane.b32.xlu0 %v8954_v22, %s8805_s16 }
  0x8f   : > { %598 = vrot.lane.b32.xlu1 %v9238_v2, %s8805_s16  ;;  %2057 = vmatprep.mubr.f32.mxu1 %v11688_v6 }
  0x90   : > { %7051 = vmatmul.mubr.msk.f32.gmra.mrb[54].mxu0 %vm1135_vm1, %v9095_v46 }
  0x91   : > { %2128 = vmatprep.mubr.f32.mxu0 %v11688_v6 }
  0x92   : > { %7060 = vmatmul.mubr.msk.f32.gmra.mrb[54].mxu1 %vm1135_vm1, %v9095_v46  ;;  %576 = vrot.lane.b32.xlu0 %v8986_v30, %s8805_s16 }
  0x93   : > { %602 = vrot.lane.b32.xlu1 %v9311_v4, %s8805_s16  ;;  %2235 = vmatprep.mubr.f32.mxu1 %v11688_v6 }
  0x94   : > { %7063 = vmatmul.mubr.msk.f32.vlgmr.msra.gmra.mrb[56].mxu0 %vm1135_vm1, %v8959_v23 }
  0x95   : > { %2134 = vmatprep.mubr.f32.mxu0 %v11688_v6  ;;  %7080 = vmatpush1.msk.msra.mxu0 %vm1157_vm0, %v9215_v61 }
  0x96   : > { %7072 = vmatmul.mubr.msk.f32.vlgmr.msra.gmra.mrb[56].mxu1 %vm1135_vm1, %v8959_v23  ;;  %7364 = vmatprep.subr.mxu0 %v11688_v6  ;;  %v9528_v7 = vpop.permute.xlu1 %1112 }
  0x97   : > { %606 = vrot.lane.b32.xlu1 %v9325_v5, %s8805_s16  ;;  %2241 = vmatprep.mubr.f32.mxu1 %v11688_v6  ;;  %v9604_v14 = vpop.permute.xlu0 %1102 }
  0x98   : > { %7064 = vmatmul.mubr.msk.f32.gmra.mrb[58].mxu0 %vm1135_vm1, %v8994_v31  ;;  %7089 = vmatpush1.msk.msra.mxu1 %vm1157_vm0, %v9234_v0 }
  0x99   : > { %2140 = vmatprep.mubr.f32.mxu0 %v11688_v6  ;;  %580 = vrot.lane.b32.xlu0 %v9006_v33, %s8805_s16 }
  0x9a   : > { %7073 = vmatmul.mubr.msk.f32.gmra.mrb[58].mxu1 %vm1135_vm1, %v8994_v31  ;;  %v9545_v8 = vpop.permute.xlu1 %1117 }
  0x9b   : > { %834 = vrot.lane.b32.xlu1 %v8938_v15, %s8806_s14  ;;  %2247 = vmatprep.mubr.f32.mxu1 %v11688_v6  ;;  %v9616_v18 = vpop.permute.xlu0 %1107 }
  0x9c   : > { %7065 = vmatmul.mubr.msk.f32.gmra.mrb[60].mxu0 %vm1135_vm1, %v9019_v35 }
  0x9d   : > { %2146 = vmatprep.mubr.f32.mxu0 %v11688_v6  ;;  %584 = vrot.lane.b32.xlu0 %v9109_v50, %s8805_s16 }
  0x9e   : > { %7074 = vmatmul.mubr.msk.f32.gmra.mrb[60].mxu1 %vm1135_vm1, %v9019_v35  ;;  %v9559_v9 = vpop.permute.xlu1 %1127 }
  0x9f   : > { %838 = vrot.lane.b32.xlu1 %v8951_v21, %s8806_s14  ;;  %2253 = vmatprep.mubr.f32.mxu1 %v11688_v6  ;;  %v9624_v20 = vpop.permute.xlu0 %1122 }
  0xa0   : > { %7066 = vmatmul.mubr.msk.f32.gmra.mrb[62].mxu0 %vm1135_vm1, %v9046_v39 }
  0xa1   : > { %2152 = vmatprep.mubr.f32.mxu0 %v11688_v6  ;;  %588 = vrot.lane.b32.xlu0 %v9122_v52, %s8805_s16 }
  0xa2   : > { %7075 = vmatmul.mubr.msk.f32.gmra.mrb[62].mxu1 %vm1135_vm1, %v9046_v39  ;;  %v9573_v11 = vpop.permute.xlu1 %2783 }
  0xa3   : > { %842 = vrot.lane.b32.xlu1 %v8941_v17, %s8806_s14  ;;  %2259 = vmatprep.mubr.f32.mxu1 %v11688_v6 }
  0xa4   : > { %7067 = vmatmul.mubr.msk.f32.gmra.mrb[64].mxu0 %vm1135_vm1, %v9065_v42 }
  0xa5   : > { %2158 = vmatprep.mubr.f32.mxu0 %v11688_v6  ;;  %592 = vrot.lane.b32.xlu0 %v9188_v57, %s8805_s16 }
  0xa6   : > { %7076 = vmatmul.mubr.msk.f32.gmra.mrb[64].mxu1 %vm1135_vm1, %v9065_v42  ;;  %v9587_v12 = vpop.permute.xlu1 %2793 }
  0xa7   : > { %846 = vrot.lane.b32.xlu1 %v8954_v22, %s8806_s14  ;;  %2265 = vmatprep.mubr.f32.mxu1 %v11688_v6 }
  0xa8   : > { %7068 = vmatmul.mubr.msk.f32.gmra.mrb[66].mxu0 %vm1135_vm1, %v9079_v44 }
  0xa9   : > { %2164 = vmatprep.mubr.f32.mxu0 %v11688_v6  ;;  %596 = vrot.lane.b32.xlu0 %v9201_v59, %s8805_s16 }
  0xaa   : > { %7077 = vmatmul.mubr.msk.f32.gmra.mrb[66].mxu1 %vm1135_vm1, %v9079_v44  ;;  %v9600_v13 = vpop.permute.xlu1 %2803 }
  0xab   : > { %850 = vrot.lane.b32.xlu1 %v8986_v30, %s8806_s14  ;;  %2271 = vmatprep.mubr.f32.mxu1 %v11688_v6 }
  0xac   : > { %7069 = vmatmul.mubr.msk.f32.gmra.mrb[68].mxu0 %vm1135_vm1, %v9095_v46 }
  0xad   : > { %2342 = vmatprep.mubr.f32.mxu0 %v11688_v6  ;;  %600 = vrot.lane.b32.xlu0 %v9215_v61, %s8805_s16 }
  0xae   : > { %7078 = vmatmul.mubr.msk.f32.gmra.mrb[68].mxu1 %vm1135_vm1, %v9095_v46  ;;  %v9610_v16 = vpop.permute.xlu1 %2813 }
  0xaf   : > { %854 = vrot.lane.b32.xlu1 %v9006_v33, %s8806_s14  ;;  %2449 = vmatprep.mubr.f32.mxu1 %v11688_v6 }
  0xb0   : > { %7081 = vmatmul.mubr.msk.f32.vlgmr.msra.gmra.mrb[70].mxu0 %vm1135_vm1, %v8959_v23 }
  0xb1   : > { %2348 = vmatprep.mubr.f32.mxu0 %v11688_v6  ;;  %7365 = vmatpush3.msk.msra.mxu0 %vm1157_vm0, %v9243_v3 }
  0xb2   : > { %7090 = vmatmul.mubr.msk.f32.vlgmr.msra.gmra.mrb[70].mxu1 %vm1135_vm1, %v8959_v23  ;;  %604 = vrot.lane.b32.xlu0 %v9234_v0, %s8805_s16 }
  0xb3   : > { %858 = vrot.lane.b32.xlu1 %v9109_v50, %s8806_s14  ;;  %2455 = vmatprep.mubr.f32.mxu1 %v11688_v6 }
  0xb4   : > { %7082 = vmatmul.mubr.msk.f32.gmra.mrb[72].mxu0 %vm1135_vm1, %v8994_v31 }
  0xb5   : > { %2354 = vmatprep.mubr.f32.mxu0 %v11688_v6 }
  0xb6   : > { %7091 = vmatmul.mubr.msk.f32.gmra.mrb[72].mxu1 %vm1135_vm1, %v8994_v31  ;;  %608 = vrot.lane.b32.xlu0 %v9243_v3, %s8805_s16 }
  0xb7   : > { %862 = vrot.lane.b32.xlu1 %v9122_v52, %s8806_s14  ;;  %2461 = vmatprep.mubr.f32.mxu1 %v11688_v6 }
  0xb8   : > { %7083 = vmatmul.mubr.msk.f32.gmra.mrb[74].mxu0 %vm1135_vm1, %v9019_v35 }
  0xb9   : > { %2360 = vmatprep.mubr.f32.mxu0 %v11688_v6 }
  0xba   : > { %7092 = vmatmul.mubr.msk.f32.gmra.mrb[74].mxu1 %vm1135_vm1, %v9019_v35  ;;  %836 = vrot.lane.b32.xlu0 %v8945_v19, %s8806_s14 }
  0xbb   : > { %866 = vrot.lane.b32.xlu1 %v9188_v57, %s8806_s14  ;;  %2467 = vmatprep.mubr.f32.mxu1 %v11688_v6 }
  0xbc   : > { %7084 = vmatmul.mubr.msk.f32.gmra.mrb[76].mxu0 %vm1135_vm1, %v9046_v39 }
  0xbd   : > { %2366 = vmatprep.mubr.f32.mxu0 %v11688_v6 }
  0xbe   : > { %7093 = vmatmul.mubr.msk.f32.gmra.mrb[76].mxu1 %vm1135_vm1, %v9046_v39  ;;  %840 = vrot.lane.b32.xlu0 %v8966_v25, %s8806_s14 }
  0xbf   : > { %870 = vrot.lane.b32.xlu1 %v9201_v59, %s8806_s14  ;;  %2473 = vmatprep.mubr.f32.mxu1 %v11688_v6 }
  0xc0   : > { %7085 = vmatmul.mubr.msk.f32.gmra.mrb[78].mxu0 %vm1135_vm1, %v9065_v42 }
  0xc1   : > { %2372 = vmatprep.mubr.f32.mxu0 %v11688_v6 }
  0xc2   : > { %7094 = vmatmul.mubr.msk.f32.gmra.mrb[78].mxu1 %vm1135_vm1, %v9065_v42  ;;  %844 = vrot.lane.b32.xlu0 %v8970_v26, %s8806_s14 }
  0xc3   : > { %874 = vrot.lane.b32.xlu1 %v9215_v61, %s8806_s14  ;;  %2479 = vmatprep.mubr.f32.mxu1 %v11688_v6 }
  0xc4   : > { %7086 = vmatmul.mubr.msk.f32.gmra.mrb[80].mxu0 %vm1135_vm1, %v9079_v44 }
  0xc5   : > { %2378 = vmatprep.mubr.f32.mxu0 %v11688_v6 }
  0xc6   : > { %7095 = vmatmul.mubr.msk.f32.gmra.mrb[80].mxu1 %vm1135_vm1, %v9079_v44  ;;  %848 = vrot.lane.b32.xlu0 %v8983_v29, %s8806_s14 }
  0xc7   : > { %878 = vrot.lane.b32.xlu1 %v9234_v0, %s8806_s14  ;;  %2485 = vmatprep.mubr.f32.mxu1 %v11688_v6 }
  0xc8   : > { %7087 = vmatmul.mubr.msk.f32.gmra.mrb[82].mxu0 %vm1135_vm1, %v9095_v46 }
  0xc9   : > { %7366 = vmatprep.mubr.msk.f32.mxu0 %vm8807_vm2, %v11688_v6 }
  0xca   : > { %7096 = vmatmul.mubr.msk.f32.gmra.mrb[82].mxu1 %vm1135_vm1, %v9095_v46  ;;  %852 = vrot.lane.b32.xlu0 %v9002_v32, %s8806_s14 }
  0xcb   : > { %882 = vrot.lane.b32.xlu1 %v9243_v3, %s8806_s14  ;;  %2977 = vmatprep.mubr.f32.mxu1 %v11688_v6 }
  0xcc   : > { %7367 = vmatmul.mubr.msk.f32.vlgmr.msra.gmra.mrb[84].mxu0 %vm1135_vm1, %v8959_v23 }
  0xcd   : > { %7369 = vmatprep.mubr.msk.f32.mxu0 %vm8807_vm2, %v11688_v6 }
  0xce   : > { %856 = vrot.lane.b32.xlu0 %v9025_v36, %s8806_s14 }
  0xcf   : > { %912 = vrot.lane.b32.xlu1 %v8945_v19, %s8808_s17  ;;  %v9620_v19 = vpop.permute.xlu1 %4485 }
  0xd0   : > { %7370 = vmatmul.mubr.msk.f32.gmra.mrb[86].mxu0 %vm1135_vm1, %v8994_v31  ;;  %11732 = vst [vmem:[#allocation5_spill] sm:$0xff] %v9620_v19  ;;  %v9640_v31 = vpop.permute.xlu0 %1132 }
  0xd1   : > { %7372 = vmatprep.mubr.msk.f32.mxu0 %vm8807_vm2, %v11688_v6 }
  0xd2   : > { %860 = vrot.lane.b32.xlu0 %v9116_v51, %s8806_s14 }
  0xd3   : > { %916 = vrot.lane.b32.xlu1 %v8966_v25, %s8808_s17  ;;  %v9631_v25 = vpop.permute.xlu1 %482 }
  0xd4   : > { %7373 = vmatmul.mubr.msk.f32.gmra.mrb[88].mxu0 %vm1135_vm1, %v9019_v35  ;;  %11733 = vst [vmem:[#allocation6_spill] sm:$0xff] %v9631_v25  ;;  %v5729_v35 = vld [vmem:[%s11685_s8] sm:$0x3] }
  0xd5   : > { %7375 = vmatprep.mubr.msk.f32.mxu0 %vm8807_vm2, %v11688_v6 }
  0xd6   : > { %864 = vrot.lane.b32.xlu0 %v9131_v53, %s8806_s14 }
  0xd7   : > { %920 = vrot.lane.b32.xlu1 %v8970_v26, %s8808_s17 }
  0xd8   : > { %7376 = vmatmul.mubr.msk.f32.gmra.mrb[90].mxu0 %vm1135_vm1, %v9046_v39  ;;  %v9650_v39 = vpop.permute.xlu1 %486 }
  0xd9   : > { %7378 = vmatprep.mubr.msk.f32.mxu0 %vm8807_vm2, %v11688_v6 }
  0xda   : > { %868 = vrot.lane.b32.xlu0 %v9221_v63, %s8806_s14 }
  0xdb   : > { %924 = vrot.lane.b32.xlu1 %v8983_v29, %s8808_s17 }
  0xdc   : > { %7379 = vmatmul.mubr.msk.f32.gmra.mrb[92].mxu0 %vm1135_vm1, %v9065_v42 }
  0xdd   : > { %7381 = vmatprep.mubr.msk.f32.mxu0 %vm8807_vm2, %v11688_v6 }
  0xde   : > { %872 = vrot.lane.b32.xlu0 %v9238_v2, %s8806_s14 }
  0xdf   : > { %928 = vrot.lane.b32.xlu1 %v9002_v32, %s8808_s17 }
  0xe0   : > { %7382 = vmatmul.mubr.msk.f32.gmra.mrb[94].mxu0 %vm1135_vm1, %v9079_v44 }
  0xe1   : > { %7384 = vmatprep.mubr.msk.f32.mxu0 %vm8807_vm2, %v11688_v6 }
  0xe2   : > { %876 = vrot.lane.b32.xlu0 %v9311_v4, %s8806_s14 }
  0xe3   : > { %932 = vrot.lane.b32.xlu1 %v9025_v36, %s8808_s17 }
  0xe4   : > { %7385 = vmatmul.mubr.msk.f32.gmra.mrb[96].mxu0 %vm1135_vm1, %v9095_v46  ;;  %v9655_v46 = vpop.permute.xlu0 %2788 }
  0xe5   : > { %3084 = vmatprep.mubr.f32.mxu0 %v11688_v6 }
  0xe6   : > { %880 = vrot.lane.b32.xlu0 %v9325_v5, %s8806_s14 }
  0xe7   : > { %936 = vrot.lane.b32.xlu1 %v9116_v51, %s8808_s17 }
  0xea   : > { %910 = vrot.lane.b32.xlu0 %v8938_v15, %s8808_s17 }
  0xeb   : > { %940 = vrot.lane.b32.xlu1 %v9131_v53, %s8808_s17 }
  0xee   : > { %914 = vrot.lane.b32.xlu0 %v8951_v21, %s8808_s17 }
  0xef   : > { %944 = vrot.lane.b32.xlu1 %v9221_v63, %s8808_s17 }
  0xf2   : > { %918 = vrot.lane.b32.xlu0 %v8941_v17, %s8808_s17 }
  0xf3   : > { %948 = vrot.lane.b32.xlu1 %v9238_v2, %s8808_s17 }
  0xf6   : > { %v1274_v23 = vpop.f32.mrb[0].mxu0  ;;  %922 = vrot.lane.b32.xlu0 %v8954_v22, %s8808_s17 }
  0xf7   : > { %952 = vrot.lane.b32.xlu1 %v9311_v4, %s8808_s17  ;;  %v1275_v15 = vadd.f32 %v1274_v23, %v9604_v14  ;;  %v1276_v24 = vpop.f32.mrb[1].mxu0  ;;  %v9667_v23 = vpop.permute.xlu0 %2798 }
  0xf8   : > { %v1277_v21 = vadd.f32 %v1276_v24, %v9604_v14 }
  0xf9   : > { %v1381_v26 = vpop.f32.mrb[0].mxu1  ;;  %7868 = vtanh.f32 %v1275_v15 }
  0xfa   : > { %v1382_v27 = vadd.f32 %v1381_v26, %v9604_v14  ;;  %v1383_v28 = vpop.f32.mrb[1].mxu1  ;;  %7870 = vtanh.f32 %v1277_v21  ;;  %926 = vrot.lane.b32.xlu0 %v8986_v30, %s8808_s17 }
  0xfb   : > { %v1384_v17 = vadd.f32 %v1383_v28, %v9604_v14  ;;  %v1280_v29 = vpop.f32.mrb[2].mxu0  ;;  %956 = vrot.lane.b32.xlu1 %v9325_v5, %s8808_s17 }
  0xfc   : > { %7872 = vtanh.f32 %v1382_v27  ;;  %v1281_v32 = vadd.f32 %v1280_v29, %v9616_v18  ;;  %v1282_v34 = vpop.f32.mrb[3].mxu0 }
  0xfd   : > { %7874 = vtanh.f32 %v1384_v17  ;;  %v1283_v22 = vadd.f32 %v1282_v34, %v9616_v18  ;;  %v1387_v36 = vpop.f32.mrb[2].mxu1 }
  0xfe   : > { %7876 = vtanh.f32 %v1281_v32  ;;  %v1388_v37 = vadd.f32 %v1387_v36, %v9616_v18  ;;  %v1389_v38 = vpop.f32.mrb[3].mxu1  ;;  %930 = vrot.lane.b32.xlu0 %v9006_v33, %s8808_s17 }
  0xff   : > { %7878 = vtanh.f32 %v1283_v22  ;;  %v1390_v40 = vadd.f32 %v1389_v38, %v9616_v18  ;;  %v1286_v41 = vpop.f32.mrb[4].mxu0  ;;  %5732 = vperm.xlu1 %7861, %v5729_v35  }
 0x100   : > { %7880 = vtanh.f32 %v1388_v37  ;;  %v1287_v42 = vadd.f32 %v1286_v41, %v9528_v7  ;;  %v1288_v43 = vpop.f32.mrb[5].mxu0 }
 0x101   : > { %7882 = vtanh.f32 %v1390_v40  ;;  %v1289_v44 = vadd.f32 %v1288_v43, %v9528_v7  ;;  %v1393_v45 = vpop.f32.mrb[4].mxu1 }
 0x102   : > { %7884 = vtanh.f32 %v1287_v42  ;;  %v1394_v30 = vadd.f32 %v1393_v45, %v9528_v7  ;;  %v1395_v47 = vpop.f32.mrb[5].mxu1  ;;  %934 = vrot.lane.b32.xlu0 %v9109_v50, %s8808_s17  ;;  %v9677_v45 = vpop.permute.xlu0 %2808 }
 0x103   : > { %7886 = vtanh.f32 %v1289_v44  ;;  %v1396_v48 = vadd.f32 %v1395_v47, %v9528_v7  ;;  %v1292_v49 = vpop.f32.mrb[6].mxu0  ;;  %v7869_v51 = vpop.eup %7868 }
 0x104   : > { %7888 = vtanh.f32 %v1394_v30  ;;  %v1293_v53 = vadd.f32 %v1292_v49, %v9545_v8  ;;  %v1294_v54 = vpop.f32.mrb[7].mxu0  ;;  %v7871_v55 = vpop.eup %7870 }
 0x105   : > { %7890 = vtanh.f32 %v1396_v48  ;;  %v1295_v56 = vadd.f32 %v1294_v54, %v9545_v8  ;;  %v1399_v58 = vpop.f32.mrb[6].mxu1 }
 0x106   : > { %v7873_v60 = vpop.eup %7872  ;;  %7892 = vtanh.f32 %v1293_v53  ;;  %v1400_v62 = vadd.f32 %v1399_v58, %v9545_v8  ;;  %v1401_v63 = vpop.f32.mrb[7].mxu1  ;;  %938 = vrot.lane.b32.xlu0 %v9122_v52, %s8808_s17 }
 0x107   : > { %v7875_v33 = vpop.eup %7874  ;;  %7894 = vtanh.f32 %v1295_v56  ;;  %v1402_v2 = vadd.f32 %v1401_v63, %v9545_v8  ;;  %v1298_v4 = vpop.f32.mrb[8].mxu0 }
 0x108   : > { %v7877_v5 = vpop.eup %7876  ;;  %7896 = vtanh.f32 %v1400_v62  ;;  %v1299_v15 = vadd.f32 %v1298_v4, %v9624_v20  ;;  %v1300_v24 = vpop.f32.mrb[9].mxu0 }
 0x109   : > { %v7879_v21 = vpop.eup %7878  ;;  %7898 = vtanh.f32 %v1402_v2  ;;  %v1301_v26 = vadd.f32 %v1300_v24, %v9624_v20  ;;  %v1405_v27 = vpop.f32.mrb[8].mxu1  ;;  %v7456_v28 = vpack.c.bf16 %v7877_v5, %v7869_v51 }
 0x10a   : > { %v7881_v17 = vpop.eup %7880  ;;  %7900 = vtanh.f32 %v1299_v15  ;;  %v1406_v50 = vadd.f32 %v1405_v27, %v9624_v20  ;;  %v1407_v29 = vpop.f32.mrb[9].mxu1  ;;  %v7454_v32 = vpack.c.bf16 %v7879_v21, %v7871_v55  ;;  %942 = vrot.lane.b32.xlu0 %v9188_v57, %s8808_s17 }
 0x10b   : > { %v7883_v34 = vpop.eup %7882  ;;  %7902 = vtanh.f32 %v1301_v26  ;;  %v1408_v35 = vadd.f32 %v1407_v29, %v9624_v20  ;;  %v1304_v22 = vpop.f32.mrb[10].mxu0  ;;  %v7468_v36 = vpack.c.bf16 %v7881_v17, %v7873_v60 }
 0x10c   : > { %v7885_v37 = vpop.eup %7884  ;;  %7904 = vtanh.f32 %v1406_v50  ;;  %v1305_v38 = vadd.f32 %v1304_v22, %v9559_v9  ;;  %v1306_v40 = vpop.f32.mrb[11].mxu0  ;;  %7455 = vmatprep.subr.bf16.mxu1 %v7454_v32  ;;  %v7466_v41 = vpack.c.bf16 %v7883_v34, %v7875_v33 }
 0x10d   : > { %v7887_v42 = vpop.eup %7886  ;;  %7906 = vtanh.f32 %v1408_v35  ;;  %v1307_v43 = vadd.f32 %v1306_v40, %v9559_v9  ;;  %v1411_v44 = vpop.f32.mrb[10].mxu1  ;;  %7457 = vmatpush1.bf16.msra.mxu1 %v7456_v28 }
 0x10e   : > { %v7889_v52 = vpop.eup %7888  ;;  %7908 = vtanh.f32 %v1305_v38  ;;  %v1412_v30 = vadd.f32 %v1411_v44, %v9559_v9  ;;  %v1413_v47 = vpop.f32.mrb[11].mxu1  ;;  %7467 = vmatprep.subr.bf16.mxu0 %v7466_v41  ;;  %946 = vrot.lane.b32.xlu0 %v9201_v59, %s8808_s17 }
 0x10f   : > { %v7891_v48 = vpop.eup %7890  ;;  %7910 = vtanh.f32 %v1307_v43  ;;  %v1414_v49 = vadd.f32 %v1413_v47, %v9559_v9  ;;  %v1310_v51 = vpop.f32.mrb[12].mxu0  ;;  %7469 = vmatpush1.bf16.msra.mxu0 %v7468_v36 }
 0x110   : > { %v7893_v53 = vpop.eup %7892  ;;  %7912 = vtanh.f32 %v1412_v30  ;;  %v1311_v54 = vadd.f32 %v1310_v51, %v9640_v31  ;;  %v1312_v55 = vpop.f32.mrb[13].mxu0 }
 0x111   : > { %v7895_v56 = vpop.eup %7894  ;;  %7914 = vtanh.f32 %v1414_v49  ;;  %v1313_v58 = vadd.f32 %v1312_v55, %v9640_v31  ;;  %v1417_v60 = vpop.f32.mrb[12].mxu1  ;;  %v7460_v62 = vpack.c.bf16 %v7893_v53, %v7885_v37 }
 0x112   : > { %v7897_v63 = vpop.eup %7896  ;;  %7916 = vtanh.f32 %v1311_v54  ;;  %v1418_v57 = vadd.f32 %v1417_v60, %v9640_v31  ;;  %v1419_v33 = vpop.f32.mrb[13].mxu1  ;;  %v7458_v2 = vpack.c.bf16 %v7895_v56, %v7887_v42 }
 0x113   : > { %v7899_v4 = vpop.eup %7898  ;;  %7918 = vtanh.f32 %v1313_v58  ;;  %v1420_v5 = vadd.f32 %v1419_v33, %v9640_v31  ;;  %v1488_v15 = vpop.f32.mrb[14].mxu0  ;;  %v7472_v24 = vpack.c.bf16 %v7897_v63, %v7889_v52 }
 0x114   : > { %v7901_v21 = vpop.eup %7900  ;;  %v9689_v26 = vpop.permute.xlu0 %4480  ;;  %7920 = vtanh.f32 %v1418_v57  ;;  %v1489_v27 = vadd.f32 %v1488_v15, %v9604_v14  ;;  %7459 = vmatprep.subr.bf16.mxu1 %v7458_v2  ;;  %v7470_v17 = vpack.c.bf16 %v7899_v4, %v7891_v48  ;;  %950 = vrot.lane.b32.xlu0 %v9215_v61, %s8808_s17 }
 0x115   : > { %v1490_v28 = vpop.f32.mrb[15].mxu0  ;;  %v7903_v50 = vpop.eup %7902  ;;  %7922 = vtanh.f32 %v1420_v5  ;;  %7461 = vmatpush1.bf16.msra.mxu1 %v7460_v62 }
 0x116   : > { %v1491_v29 = vadd.f32 %v1490_v28, %v9604_v14  ;;  %v1595_v59 = vpop.f32.mrb[14].mxu1  ;;  %v7905_v32 = vpop.eup %7904  ;;  %7924 = vtanh.f32 %v1489_v27  ;;  %7471 = vmatprep.subr.bf16.mxu0 %v7470_v17 }
 0x117   : > { %v1596_v34 = vadd.f32 %v1595_v59, %v9604_v14  ;;  %v1597_v35 = vpop.f32.mrb[15].mxu1  ;;  %v7907_v22 = vpop.eup %7906  ;;  %7473 = vmatpush1.bf16.msra.mxu0 %v7472_v24 }
 0x118   : > { %7926 = vtanh.f32 %v1491_v29  ;;  %v1598_v36 = vadd.f32 %v1597_v35, %v9604_v14  ;;  %v1494_v37 = vpop.f32.mrb[16].mxu0  ;;  %v7909_v38 = vpop.eup %7908 }
 0x119   : > { %7928 = vtanh.f32 %v1596_v34  ;;  %v1495_v40 = vadd.f32 %v1494_v37, %v9616_v18  ;;  %v1496_v41 = vpop.f32.mrb[17].mxu0  ;;  %v7911_v42 = vpop.eup %7910  ;;  %v7464_v52 = vpack.c.bf16 %v7909_v38, %v7901_v21  ;;  %v9713_v21 = vld [vmem:[%s11680_s3] sm:$0xff]  ;;  %v9728_v38 = vld [vmem:[%s11680_s3 + $0x8] sm:$0xff] }
 0x11a   : > { %7930 = vtanh.f32 %v1598_v36  ;;  %v1497_v43 = vadd.f32 %v1496_v41, %v9616_v18  ;;  %v1601_v44 = vpop.f32.mrb[16].mxu1  ;;  %v7913_v30 = vpop.eup %7912  ;;  %v7462_v49 = vpack.c.bf16 %v7911_v42, %v7903_v50 }
 0x11b   : > { %v9699_v47 = vpop.permute.xlu0 %4490  ;;  %7932 = vtanh.f32 %v1495_v40  ;;  %v1602_v61 = vadd.f32 %v1601_v44, %v9616_v18  ;;  %v1603_v48 = vpop.f32.mrb[17].mxu1  ;;  %954 = vrot.lane.b32.xlu0 %v9234_v0, %s8808_s17  ;;  %v7476_v55 = vpack.c.bf16 %v7913_v30, %v7905_v32 }
 0x11c   : > { %11734 = vst [vmem:[#allocation7_spill] sm:$0xff] %v9699_v47  ;;  %v7915_v51 = vpop.eup %7914  ;;  %7934 = vtanh.f32 %v1497_v43  ;;  %v1604_v53 = vadd.f32 %v1603_v48, %v9616_v18  ;;  %v1500_v54 = vpop.f32.mrb[18].mxu0  ;;  %7463 = vmatprep.subr.bf16.mxu1 %v7462_v49 }
 0x11d   : > { %v7917_v56 = vpop.eup %7916  ;;  %7936 = vtanh.f32 %v1602_v61  ;;  %v1501_v58 = vadd.f32 %v1500_v54, %v9528_v7  ;;  %v1502_v60 = vpop.f32.mrb[19].mxu0  ;;  %v7474_v62 = vpack.c.bf16 %v7915_v51, %v7907_v22  ;;  %7465 = vmatpush1.bf16.msra.mxu1 %v7464_v52 }
 0x11e   : > { %v7919_v63 = vpop.eup %7918  ;;  %7938 = vtanh.f32 %v1604_v53  ;;  %v1503_v57 = vadd.f32 %v1502_v60, %v9528_v7  ;;  %v1607_v33 = vpop.f32.mrb[18].mxu1 }
 0x11f   : > { %v7921_v0 = vpop.eup %7920  ;;  %7940 = vtanh.f32 %v1501_v58  ;;  %v1608_v2 = vadd.f32 %v1607_v33, %v9528_v7  ;;  %v1609_v4 = vpop.f32.mrb[19].mxu1  ;;  %7105 = vmatprep.subr.msk.mxu1 %vm1157_vm0, %v7919_v63  ;;  %7475 = vmatprep.subr.bf16.mxu0 %v7474_v62 }
 0x120   : > { %v7923_v5 = vpop.eup %7922  ;;  %7942 = vtanh.f32 %v1503_v57  ;;  %v1610_v15 = vadd.f32 %v1609_v4, %v9528_v7  ;;  %v1506_v24 = vpop.f32.mrb[20].mxu0  ;;  %7477 = vmatpush1.bf16.msra.mxu0 %v7476_v55 }
 0x121   : > { %v7925_v27 = vpop.eup %7924  ;;  %7944 = vtanh.f32 %v1608_v2  ;;  %v1507_v28 = vadd.f32 %v1506_v24, %v9545_v8  ;;  %v1508_v17 = vpop.f32.mrb[21].mxu0  ;;  %7114 = vmatprep.subr.msk.mxu0 %vm1157_vm0, %v7923_v5  ;;  %7106 = vmatpush1.msk.msra.mxu1 %vm1157_vm0, %v7917_v56  ;;  %v9743_v56 = vld [vmem:[%s11680_s3 + $0x10] sm:$0xff] }
 0x122   : > { %v7927_v50 = vpop.eup %7926  ;;  %7946 = vtanh.f32 %v1610_v15  ;;  %v1509_v29 = vadd.f32 %v1508_v17, %v9545_v8  ;;  %v1613_v59 = vpop.f32.mrb[20].mxu1  ;;  %7107 = vmatmul.mubr.msk.f32.vlgmr.msra.gmra.mrb[84].mxu1 %vm2816_vm3, %v9713_v21  ;;  %v9758_v17 = vld [vmem:[%s11680_s3 + $0x18] sm:$0xff] }
 0x123   : > { %v7929_v32 = vpop.eup %7928  ;;  %7948 = vtanh.f32 %v1507_v28  ;;  %v1614_v34 = vadd.f32 %v1613_v59, %v9545_v8  ;;  %v1615_v35 = vpop.f32.mrb[21].mxu1  ;;  %2983 = vmatprep.mubr.f32.mxu1 %v11688_v6 }
 0x124   : > { %v7931_v22 = vpop.eup %7930  ;;  %7950 = vtanh.f32 %v1509_v29  ;;  %v1616_v36 = vadd.f32 %v1615_v35, %v9545_v8  ;;  %v1512_v37 = vpop.f32.mrb[22].mxu0  ;;  %7115 = vmatpush1.msk.msra.mxu0 %vm1157_vm0, %v7921_v0 }
 0x125   : > { %v7933_v40 = vpop.eup %7932  ;;  %7952 = vtanh.f32 %v1614_v34  ;;  %v1513_v41 = vadd.f32 %v1512_v37, %v9624_v20  ;;  %v1514_v42 = vpop.f32.mrb[23].mxu0  ;;  %7116 = vmatmul.mubr.msk.f32.vlgmr.msra.gmra.mrb[98].mxu0 %vm2816_vm3, %v9713_v21 }
 0x126   : > { %v7935_v43 = vpop.eup %7934  ;;  %7954 = vtanh.f32 %v1616_v36  ;;  %v1515_v44 = vadd.f32 %v1514_v42, %v9624_v20  ;;  %v1619_v52 = vpop.f32.mrb[22].mxu1  ;;  %3090 = vmatprep.mubr.f32.mxu0 %v11688_v6  ;;  %v7480_v30 = vpack.c.bf16 %v7933_v40, %v7925_v27  ;;  %7108 = vmatmul.mubr.msk.f32.gmra.mrb[86].mxu1 %vm2816_vm3, %v9728_v38 }
 0x127   : > { %v7937_v61 = vpop.eup %7936  ;;  %7956 = vtanh.f32 %v1513_v41  ;;  %v1620_v48 = vadd.f32 %v1619_v52, %v9624_v20  ;;  %v1621_v49 = vpop.f32.mrb[23].mxu1  ;;  %v7478_v51 = vpack.c.bf16 %v7935_v43, %v7927_v50  ;;  %2989 = vmatprep.mubr.f32.mxu1 %v11688_v6  ;;  %v9773_v52 = vld [vmem:[%s11680_s3 + $0x20] sm:$0xff] }
 0x128   : > { %v7939_v53 = vpop.eup %7938  ;;  %7958 = vtanh.f32 %v1515_v44  ;;  %v1622_v54 = vadd.f32 %v1621_v49, %v9624_v20  ;;  %v1518_v55 = vpop.f32.mrb[24].mxu0  ;;  %v7492_v58 = vpack.c.bf16 %v7937_v61, %v7929_v32 }
 0x129   : > { %v7941_v60 = vpop.eup %7940  ;;  %7960 = vtanh.f32 %v1620_v48  ;;  %v1519_v62 = vadd.f32 %v1518_v55, %v9559_v9  ;;  %v1520_v63 = vpop.f32.mrb[25].mxu0  ;;  %7117 = vmatmul.mubr.msk.f32.gmra.mrb[100].mxu0 %vm2816_vm3, %v9728_v38  ;;  %7479 = vmatprep.subr.bf16.mxu1 %v7478_v51  ;;  %v7490_v57 = vpack.c.bf16 %v7939_v53, %v7931_v22 }
 0x12a   : > { %v7943_v33 = vpop.eup %7942  ;;  %7962 = vtanh.f32 %v1622_v54  ;;  %v1521_v0 = vadd.f32 %v1520_v63, %v9559_v9  ;;  %v1625_v2 = vpop.f32.mrb[24].mxu1  ;;  %7481 = vmatpush1.bf16.msra.mxu1 %v7480_v30  ;;  %3096 = vmatprep.mubr.f32.mxu0 %v11688_v6 }
 0x12b   : > { %v7945_v4 = vpop.eup %7944  ;;  %7964 = vtanh.f32 %v1519_v62  ;;  %v1626_v5 = vadd.f32 %v1625_v2, %v9559_v9  ;;  %v1627_v15 = vpop.f32.mrb[25].mxu1  ;;  %7109 = vmatmul.mubr.msk.f32.gmra.mrb[88].mxu1 %vm2816_vm3, %v9743_v56  ;;  %7491 = vmatprep.subr.bf16.mxu0 %v7490_v57 }
 0x12c   : > { %v7947_v24 = vpop.eup %7946  ;;  %7966 = vtanh.f32 %v1521_v0  ;;  %v1628_v27 = vadd.f32 %v1627_v15, %v9559_v9  ;;  %v1524_v28 = vpop.f32.mrb[26].mxu0  ;;  %7493 = vmatpush1.bf16.msra.mxu0 %v7492_v58  ;;  %2995 = vmatprep.mubr.f32.mxu1 %v11688_v6  ;;  %v9790_v0 = vld [vmem:[%s11680_s3 + $0x28] sm:$0xff] }
 0x12d   : > { %v7949_v50 = vpop.eup %7948  ;;  %7968 = vtanh.f32 %v1626_v5  ;;  %v1525_v29 = vadd.f32 %v1524_v28, %v9640_v31  ;;  %v1526_v59 = vpop.f32.mrb[27].mxu0  ;;  %7118 = vmatmul.mubr.msk.f32.gmra.mrb[102].mxu0 %vm2816_vm3, %v9743_v56 }
 0x12e   : > { %v7951_v32 = vpop.eup %7950  ;;  %7970 = vtanh.f32 %v1628_v27  ;;  %v1527_v34 = vadd.f32 %v1526_v59, %v9640_v31  ;;  %v1631_v35 = vpop.f32.mrb[26].mxu1  ;;  %3102 = vmatprep.mubr.f32.mxu0 %v11688_v6  ;;  %v7484_v22 = vpack.c.bf16 %v7949_v50, %v7941_v60 }
 0x12f   : > { %v7953_v36 = vpop.eup %7952  ;;  %7972 = vtanh.f32 %v1525_v29  ;;  %v1632_v37 = vadd.f32 %v1631_v35, %v9640_v31  ;;  %v1633_v40 = vpop.f32.mrb[27].mxu1  ;;  %7110 = vmatmul.mubr.msk.f32.gmra.mrb[90].mxu1 %vm2816_vm3, %v9758_v17  ;;  %v7482_v41 = vpack.c.bf16 %v7951_v32, %v7943_v33 }
 0x130   : > { %v7955_v42 = vpop.eup %7954  ;;  %7974 = vtanh.f32 %v1527_v34  ;;  %v1634_v43 = vadd.f32 %v1633_v40, %v9640_v31  ;;  %v1702_v44 = vpop.f32.mrb[28].mxu0  ;;  %3001 = vmatprep.mubr.f32.mxu1 %v11688_v6  ;;  %v7496_v30 = vpack.c.bf16 %v7953_v36, %v7945_v4  ;;  %v9805_v36 = vld [vmem:[%s11680_s3 + $0x30] sm:$0x3] }
 0x131   : > { %v7957_v61 = vpop.eup %7956  ;;  %7976 = vtanh.f32 %v1632_v37  ;;  %v1703_v48 = vadd.f32 %v1702_v44, %v9604_v14  ;;  %v1704_v49 = vpop.f32.mrb[29].mxu0  ;;  %7119 = vmatmul.mubr.msk.f32.gmra.mrb[104].mxu0 %vm2816_vm3, %v9758_v17  ;;  %7483 = vmatprep.subr.bf16.mxu1 %v7482_v41  ;;  %v7494_v51 = vpack.c.bf16 %v7955_v42, %v7947_v24 }
 0x132   : > { %v7959_v53 = vpop.eup %7958  ;;  %7978 = vtanh.f32 %v1634_v43  ;;  %v1705_v54 = vadd.f32 %v1704_v49, %v9604_v14  ;;  %v1809_v55 = vpop.f32.mrb[28].mxu1  ;;  %7485 = vmatpush1.bf16.msra.mxu1 %v7484_v22  ;;  %3108 = vmatprep.mubr.f32.mxu0 %v11688_v6 }
 0x133   : > { %v9780_v58 = vpop.eup %7960  ;;  %7980 = vtanh.f32 %v1703_v48  ;;  %v1810_v60 = vadd.f32 %v1809_v55, %v9604_v14  ;;  %v1811_v62 = vpop.f32.mrb[29].mxu1  ;;  %7111 = vmatmul.mubr.msk.f32.gmra.mrb[92].mxu1 %vm2816_vm3, %v9773_v52  ;;  %7495 = vmatprep.subr.bf16.mxu0 %v7494_v51 }
 0x134   : > { %v7963_v63 = vpop.eup %7962  ;;  %7982 = vtanh.f32 %v1705_v54  ;;  %v1812_v57 = vadd.f32 %v1811_v62, %v9604_v14  ;;  %v1708_v33 = vpop.f32.mrb[30].mxu0  ;;  %7497 = vmatpush1.bf16.msra.mxu0 %v7496_v30  ;;  %3007 = vmatprep.mubr.f32.mxu1 %v11688_v6 }
 0x135   : > { %v7965_v2 = vpop.eup %7964  ;;  %7984 = vtanh.f32 %v1810_v60  ;;  %v1709_v4 = vadd.f32 %v1708_v33, %v9616_v18  ;;  %v1710_v5 = vpop.f32.mrb[31].mxu0  ;;  %7120 = vmatmul.mubr.msk.f32.gmra.mrb[106].mxu0 %vm2816_vm3, %v9773_v52 }
 0x136   : > { %v7967_v15 = vpop.eup %7966  ;;  %7986 = vtanh.f32 %v1812_v57  ;;  %v1711_v24 = vadd.f32 %v1710_v5, %v9616_v18  ;;  %v1815_v27 = vpop.f32.mrb[30].mxu1  ;;  %3114 = vmatprep.mubr.f32.mxu0 %v11688_v6  ;;  %v7488_v28 = vpack.c.bf16 %v7965_v2, %v7957_v61 }
 0x137   : > { %v7969_v50 = vpop.eup %7968  ;;  %7988 = vtanh.f32 %v1709_v4  ;;  %v1816_v29 = vadd.f32 %v1815_v27, %v9616_v18  ;;  %v1817_v59 = vpop.f32.mrb[31].mxu1  ;;  %7112 = vmatmul.mubr.msk.f32.gmra.mrb[94].mxu1 %vm2816_vm3, %v9790_v0  ;;  %v7486_v32 = vpack.c.bf16 %v7967_v15, %v7959_v53 }
 0x138   : > { %v7971_v34 = vpop.eup %7970  ;;  %7990 = vtanh.f32 %v1711_v24  ;;  %v1818_v35 = vadd.f32 %v1817_v59, %v9616_v18  ;;  %v1714_v22 = vpop.f32.mrb[32].mxu0  ;;  %3013 = vmatprep.mubr.f32.mxu1 %v11688_v6  ;;  %v7500_v37 = vpack.c.bf16 %v7969_v50, %v9780_v58 }
 0x139   : > { %v7973_v40 = vpop.eup %7972  ;;  %7992 = vtanh.f32 %v1816_v29  ;;  %v1715_v41 = vadd.f32 %v1714_v22, %v9528_v7  ;;  %v1716_v42 = vpop.f32.mrb[33].mxu0  ;;  %7121 = vmatmul.mubr.msk.f32.gmra.mrb[108].mxu0 %vm2816_vm3, %v9790_v0  ;;  %7487 = vmatprep.subr.bf16.mxu1 %v7486_v32  ;;  %v7498_v43 = vpack.c.bf16 %v7971_v34, %v7963_v63 }
 0x13a   : > { %v7975_v44 = vpop.eup %7974  ;;  %7994 = vtanh.f32 %v1818_v35  ;;  %v1717_v30 = vadd.f32 %v1716_v42, %v9528_v7  ;;  %v1821_v61 = vpop.f32.mrb[32].mxu1  ;;  %7489 = vmatpush1.bf16.msra.mxu1 %v7488_v28  ;;  %3120 = vmatprep.mubr.f32.mxu0 %v11688_v6 }
 0x13b   : > { %v7977_v48 = vpop.eup %7976  ;;  %7996 = vtanh.f32 %v1715_v41  ;;  %v1822_v49 = vadd.f32 %v1821_v61, %v9528_v7  ;;  %v1823_v51 = vpop.f32.mrb[33].mxu1  ;;  %7113 = vmatmul.mubr.msk.f32.gmra.mrb[96].mxu1 %vm2816_vm3, %v9805_v36  ;;  %7123 = vmatprep.subr.msk.mxu1 %vm1157_vm0, %v7975_v44 }
 0x13c   : > { %v7979_v53 = vpop.eup %7978  ;;  %7998 = vtanh.f32 %v1717_v30  ;;  %v1824_v54 = vadd.f32 %v1823_v51, %v9528_v7  ;;  %7499 = vmatprep.subr.bf16.mxu0 %v7498_v43  ;;  %v1720_v55 = vpop.f32.mrb[34].mxu0  ;;  %3191 = vmatprep.mubr.f32.mxu1 %v11688_v6 }
 0x13d   : > { %v7981_v58 = vpop.eup %7980  ;;  %8000 = vtanh.f32 %v1822_v49  ;;  %v1721_v60 = vadd.f32 %v1720_v55, %v9545_v8  ;;  %7501 = vmatpush1.bf16.msra.mxu0 %v7500_v37  ;;  %v1722_v62 = vpop.f32.mrb[35].mxu0 }
 0x13e   : > { %v7983_v63 = vpop.eup %7982  ;;  %8002 = vtanh.f32 %v1824_v54  ;;  %v1723_v57 = vadd.f32 %v1722_v62, %v9545_v8  ;;  %7122 = vmatmul.mubr.msk.f32.gmra.mrb[110].mxu0 %vm2816_vm3, %v9805_v36  ;;  %7132 = vmatprep.subr.msk.mxu0 %vm1157_vm0, %v7979_v53  ;;  %v1827_v33 = vpop.f32.mrb[34].mxu1 }
 0x13f   : > { %v7985_v2 = vpop.eup %7984  ;;  %8004 = vtanh.f32 %v1721_v60  ;;  %v1828_v4 = vadd.f32 %v1827_v33, %v9545_v8  ;;  %7124 = vmatpush1.msk.msra.mxu1 %vm1157_vm0, %v7973_v40  ;;  %v1829_v5 = vpop.f32.mrb[35].mxu1  ;;  %3298 = vmatprep.mubr.f32.mxu0 %v11688_v6 }
 0x140   : > { %v7987_v15 = vpop.eup %7986  ;;  %8006 = vtanh.f32 %v1723_v57  ;;  %v1830_v24 = vadd.f32 %v1829_v5, %v9545_v8  ;;  %7125 = vmatmul.mubr.msk.f32.vlgmr.msra.gmra.mrb[98].mxu1 %vm2816_vm3, %v9713_v21  ;;  %v1726_v27 = vpop.f32.mrb[36].mxu0 }
 0x141   : > { %v7989_v28 = vpop.eup %7988  ;;  %8008 = vtanh.f32 %v1828_v4  ;;  %v1727_v50 = vadd.f32 %v1726_v27, %v9624_v20  ;;  %7133 = vmatpush1.msk.msra.mxu0 %vm1157_vm0, %v7977_v48  ;;  %v1728_v29 = vpop.f32.mrb[37].mxu0  ;;  %3197 = vmatprep.mubr.f32.mxu1 %v11688_v6 }
 0x142   : > { %v7991_v59 = vpop.eup %7990  ;;  %8010 = vtanh.f32 %v1830_v24  ;;  %v1729_v32 = vadd.f32 %v1728_v29, %v9624_v20  ;;  %7134 = vmatmul.mubr.msk.f32.vlgmr.msra.gmra.mrb[112].mxu0 %vm2816_vm3, %v9713_v21  ;;  %v1833_v34 = vpop.f32.mrb[36].mxu1  ;;  %v7504_v35 = vpack.c.bf16 %v7989_v28, %v7981_v58 }
 0x143   : > { %v7993_v22 = vpop.eup %7992  ;;  %8012 = vtanh.f32 %v1727_v50  ;;  %v1834_v37 = vadd.f32 %v1833_v34, %v9624_v20  ;;  %v1835_v40 = vpop.f32.mrb[37].mxu1  ;;  %3304 = vmatprep.mubr.f32.mxu0 %v11688_v6  ;;  %v7502_v41 = vpack.c.bf16 %v7991_v59, %v7983_v63 }
 0x144   : > { %v7995_v42 = vpop.eup %7994  ;;  %8014 = vtanh.f32 %v1729_v32  ;;  %v1836_v43 = vadd.f32 %v1835_v40, %v9624_v20  ;;  %7126 = vmatmul.mubr.msk.f32.gmra.mrb[100].mxu1 %vm2816_vm3, %v9728_v38  ;;  %v1732_v44 = vpop.f32.mrb[38].mxu0  ;;  %v7516_v30 = vpack.c.bf16 %v7993_v22, %v7985_v2 }
 0x145   : > { %v7997_v61 = vpop.eup %7996  ;;  %8016 = vtanh.f32 %v1834_v37  ;;  %v1733_v48 = vadd.f32 %v1732_v44, %v9559_v9  ;;  %v1734_v49 = vpop.f32.mrb[39].mxu0  ;;  %7503 = vmatprep.subr.bf16.mxu1 %v7502_v41  ;;  %3203 = vmatprep.mubr.f32.mxu1 %v11688_v6  ;;  %v7514_v51 = vpack.c.bf16 %v7995_v42, %v7987_v15 }
 0x146   : > { %v7999_v53 = vpop.eup %7998  ;;  %8018 = vtanh.f32 %v1836_v43  ;;  %v1735_v54 = vadd.f32 %v1734_v49, %v9559_v9  ;;  %7135 = vmatmul.mubr.msk.f32.gmra.mrb[114].mxu0 %vm2816_vm3, %v9728_v38  ;;  %v1839_v55 = vpop.f32.mrb[38].mxu1  ;;  %7505 = vmatpush1.bf16.msra.mxu1 %v7504_v35 }
 0x147   : > { %v8001_v58 = vpop.eup %8000  ;;  %8020 = vtanh.f32 %v1733_v48  ;;  %v1840_v60 = vadd.f32 %v1839_v55, %v9559_v9  ;;  %v1841_v62 = vpop.f32.mrb[39].mxu1  ;;  %7515 = vmatprep.subr.bf16.mxu0 %v7514_v51  ;;  %3310 = vmatprep.mubr.f32.mxu0 %v11688_v6 }
 0x148   : > { %v8003_v63 = vpop.eup %8002  ;;  %8022 = vtanh.f32 %v1735_v54  ;;  %v1842_v57 = vadd.f32 %v1841_v62, %v9559_v9  ;;  %7127 = vmatmul.mubr.msk.f32.gmra.mrb[102].mxu1 %vm2816_vm3, %v9743_v56  ;;  %v1738_v33 = vpop.f32.mrb[40].mxu0  ;;  %7517 = vmatpush1.bf16.msra.mxu0 %v7516_v30 }
 0x149   : > { %v8005_v2 = vpop.eup %8004  ;;  %8024 = vtanh.f32 %v1840_v60  ;;  %v1739_v4 = vadd.f32 %v1738_v33, %v9640_v31  ;;  %v1740_v5 = vpop.f32.mrb[41].mxu0  ;;  %3209 = vmatprep.mubr.f32.mxu1 %v11688_v6 }
 0x14a   : > { %v8007_v15 = vpop.eup %8006  ;;  %8026 = vtanh.f32 %v1842_v57  ;;  %v1741_v24 = vadd.f32 %v1740_v5, %v9640_v31  ;;  %7136 = vmatmul.mubr.msk.f32.gmra.mrb[116].mxu0 %vm2816_vm3, %v9743_v56  ;;  %v1845_v27 = vpop.f32.mrb[40].mxu1  ;;  %v7508_v28 = vpack.c.bf16 %v8005_v2, %v7997_v61 }
 0x14b   : > { %v8009_v50 = vpop.eup %8008  ;;  %8028 = vtanh.f32 %v1739_v4  ;;  %v1846_v29 = vadd.f32 %v1845_v27, %v9640_v31  ;;  %v1847_v59 = vpop.f32.mrb[41].mxu1  ;;  %3316 = vmatprep.mubr.f32.mxu0 %v11688_v6  ;;  %v7506_v32 = vpack.c.bf16 %v8007_v15, %v7999_v53 }
 0x14c   : > { %v8011_v34 = vpop.eup %8010  ;;  %8030 = vtanh.f32 %v1741_v24  ;;  %v1848_v35 = vadd.f32 %v1847_v59, %v9640_v31  ;;  %7128 = vmatmul.mubr.msk.f32.gmra.mrb[104].mxu1 %vm2816_vm3, %v9758_v17  ;;  %v1916_v22 = vpop.f32.mrb[42].mxu0  ;;  %v7520_v37 = vpack.c.bf16 %v8009_v50, %v8001_v58 }
 0x14d   : > { %v8013_v40 = vpop.eup %8012  ;;  %8032 = vtanh.f32 %v1846_v29  ;;  %v1917_v41 = vadd.f32 %v1916_v22, %v9604_v14  ;;  %v1918_v42 = vpop.f32.mrb[43].mxu0  ;;  %7507 = vmatprep.subr.bf16.mxu1 %v7506_v32  ;;  %3215 = vmatprep.mubr.f32.mxu1 %v11688_v6  ;;  %v7518_v43 = vpack.c.bf16 %v8011_v34, %v8003_v63 }
 0x14e   : > { %v8015_v44 = vpop.eup %8014  ;;  %8034 = vtanh.f32 %v1848_v35  ;;  %v1919_v30 = vadd.f32 %v1918_v42, %v9604_v14  ;;  %7137 = vmatmul.mubr.msk.f32.gmra.mrb[118].mxu0 %vm2816_vm3, %v9758_v17  ;;  %v2023_v61 = vpop.f32.mrb[42].mxu1  ;;  %7509 = vmatpush1.bf16.msra.mxu1 %v7508_v28 }
 0x14f   : > { %v9866_v48 = vpop.eup %8016  ;;  %8036 = vtanh.f32 %v1917_v41  ;;  %v2024_v49 = vadd.f32 %v2023_v61, %v9604_v14  ;;  %v2025_v51 = vpop.f32.mrb[43].mxu1  ;;  %7519 = vmatprep.subr.bf16.mxu0 %v7518_v43  ;;  %3322 = vmatprep.mubr.f32.mxu0 %v11688_v6 }
 0x150   : > { %v8019_v53 = vpop.eup %8018  ;;  %8038 = vtanh.f32 %v1919_v30  ;;  %v2026_v54 = vadd.f32 %v2025_v51, %v9604_v14  ;;  %7129 = vmatmul.mubr.msk.f32.gmra.mrb[106].mxu1 %vm2816_vm3, %v9773_v52  ;;  %v1922_v55 = vpop.f32.mrb[44].mxu0  ;;  %7521 = vmatpush1.bf16.msra.mxu0 %v7520_v37 }
 0x151   : > { %v8021_v58 = vpop.eup %8020  ;;  %8040 = vtanh.f32 %v2024_v49  ;;  %v1923_v60 = vadd.f32 %v1922_v55, %v9616_v18  ;;  %v1924_v62 = vpop.f32.mrb[45].mxu0  ;;  %3221 = vmatprep.mubr.f32.mxu1 %v11688_v6 }
 0x152   : > { %v8023_v63 = vpop.eup %8022  ;;  %8042 = vtanh.f32 %v2026_v54  ;;  %v1925_v57 = vadd.f32 %v1924_v62, %v9616_v18  ;;  %7138 = vmatmul.mubr.msk.f32.gmra.mrb[120].mxu0 %vm2816_vm3, %v9773_v52  ;;  %v2029_v33 = vpop.f32.mrb[44].mxu1  ;;  %v7512_v2 = vpack.c.bf16 %v8021_v58, %v8013_v40 }
 0x153   : > { %v8025_v4 = vpop.eup %8024  ;;  %8044 = vtanh.f32 %v1923_v60  ;;  %v2030_v5 = vadd.f32 %v2029_v33, %v9616_v18  ;;  %v2031_v15 = vpop.f32.mrb[45].mxu1  ;;  %3328 = vmatprep.mubr.f32.mxu0 %v11688_v6  ;;  %v7510_v24 = vpack.c.bf16 %v8023_v63, %v8015_v44 }
 0x154   : > { %v8027_v27 = vpop.eup %8026  ;;  %8046 = vtanh.f32 %v1925_v57  ;;  %v2032_v28 = vadd.f32 %v2031_v15, %v9616_v18  ;;  %7130 = vmatmul.mubr.msk.f32.gmra.mrb[108].mxu1 %vm2816_vm3, %v9790_v0  ;;  %v1928_v50 = vpop.f32.mrb[46].mxu0  ;;  %v7524_v29 = vpack.c.bf16 %v8025_v4, %v9866_v48 }
 0x155   : > { %v8029_v59 = vpop.eup %8028  ;;  %8048 = vtanh.f32 %v2030_v5  ;;  %v1929_v32 = vadd.f32 %v1928_v50, %v9528_v7  ;;  %v1930_v34 = vpop.f32.mrb[47].mxu0  ;;  %7511 = vmatprep.subr.bf16.mxu1 %v7510_v24  ;;  %3227 = vmatprep.mubr.f32.mxu1 %v11688_v6  ;;  %v7522_v35 = vpack.c.bf16 %v8027_v27, %v8019_v53 }
 0x156   : > { %v8031_v22 = vpop.eup %8030  ;;  %8050 = vtanh.f32 %v2032_v28  ;;  %v1931_v37 = vadd.f32 %v1930_v34, %v9528_v7  ;;  %7139 = vmatmul.mubr.msk.f32.gmra.mrb[122].mxu0 %vm2816_vm3, %v9790_v0  ;;  %v2035_v40 = vpop.f32.mrb[46].mxu1  ;;  %7513 = vmatpush1.bf16.msra.mxu1 %v7512_v2 }
 0x157   : > { %v8033_v41 = vpop.eup %8032  ;;  %8052 = vtanh.f32 %v1929_v32  ;;  %v2036_v42 = vadd.f32 %v2035_v40, %v9528_v7  ;;  %v2037_v43 = vpop.f32.mrb[47].mxu1  ;;  %7141 = vmatprep.subr.msk.mxu1 %vm1157_vm0, %v8031_v22  ;;  %7523 = vmatprep.subr.bf16.mxu0 %v7522_v35 }
 0x158   : > { %v8035_v44 = vpop.eup %8034  ;;  %8054 = vtanh.f32 %v1931_v37  ;;  %v2038_v30 = vadd.f32 %v2037_v43, %v9528_v7  ;;  %7131 = vmatmul.mubr.msk.f32.gmra.mrb[110].mxu1 %vm2816_vm3, %v9805_v36  ;;  %v1934_v61 = vpop.f32.mrb[48].mxu0  ;;  %3334 = vmatprep.mubr.f32.mxu0 %v11688_v6 }
 0x159   : > { %v8037_v48 = vpop.eup %8036  ;;  %8056 = vtanh.f32 %v2036_v42  ;;  %v1935_v49 = vadd.f32 %v1934_v61, %v9545_v8  ;;  %7525 = vmatpush1.bf16.msra.mxu0 %v7524_v29  ;;  %v1936_v51 = vpop.f32.mrb[49].mxu0  ;;  %3405 = vmatprep.mubr.f32.mxu1 %v11688_v6 }
 0x15a   : > { %v8039_v53 = vpop.eup %8038  ;;  %8058 = vtanh.f32 %v2038_v30  ;;  %v1937_v54 = vadd.f32 %v1936_v51, %v9545_v8  ;;  %7140 = vmatmul.mubr.msk.f32.gmra.mrb[124].mxu0 %vm2816_vm3, %v9805_v36  ;;  %7150 = vmatprep.subr.msk.mxu0 %vm1157_vm0, %v8035_v44  ;;  %v2041_v55 = vpop.f32.mrb[48].mxu1 }
 0x15b   : > { %v8041_v58 = vpop.eup %8040  ;;  %8060 = vtanh.f32 %v1935_v49  ;;  %v2042_v60 = vadd.f32 %v2041_v55, %v9545_v8  ;;  %7142 = vmatpush1.msk.msra.mxu1 %vm1157_vm0, %v8029_v59  ;;  %v2043_v62 = vpop.f32.mrb[49].mxu1  ;;  %3512 = vmatprep.mubr.f32.mxu0 %v11688_v6 }
 0x15c   : > { %v8043_v63 = vpop.eup %8042  ;;  %8062 = vtanh.f32 %v1937_v54  ;;  %v2044_v57 = vadd.f32 %v2043_v62, %v9545_v8  ;;  %7143 = vmatmul.mubr.msk.f32.vlgmr.msra.gmra.mrb[112].mxu1 %vm2816_vm3, %v9713_v21  ;;  %v1940_v33 = vpop.f32.mrb[50].mxu0 }
 0x15d   : > { %v8045_v2 = vpop.eup %8044  ;;  %8064 = vtanh.f32 %v2042_v60  ;;  %v1941_v4 = vadd.f32 %v1940_v33, %v9624_v20  ;;  %7151 = vmatpush1.msk.msra.mxu0 %vm1157_vm0, %v8033_v41  ;;  %v1942_v5 = vpop.f32.mrb[51].mxu0  ;;  %3411 = vmatprep.mubr.f32.mxu1 %v11688_v6 }
 0x15e   : > { %v8047_v15 = vpop.eup %8046  ;;  %8066 = vtanh.f32 %v2044_v57  ;;  %v1943_v24 = vadd.f32 %v1942_v5, %v9624_v20  ;;  %7152 = vmatmul.mubr.msk.f32.vlgmr.msra.gmra.mrb[126].mxu0 %vm2816_vm3, %v9713_v21  ;;  %v2047_v27 = vpop.f32.mrb[50].mxu1  ;;  %v7528_v28 = vpack.c.bf16 %v8045_v2, %v8037_v48 }
 0x15f   : > { %v8049_v50 = vpop.eup %8048  ;;  %8068 = vtanh.f32 %v1941_v4  ;;  %v2048_v29 = vadd.f32 %v2047_v27, %v9624_v20  ;;  %v2049_v59 = vpop.f32.mrb[51].mxu1  ;;  %3518 = vmatprep.mubr.f32.mxu0 %v11688_v6  ;;  %v7526_v32 = vpack.c.bf16 %v8047_v15, %v8039_v53 }
 0x160   : > { %v8051_v34 = vpop.eup %8050  ;;  %8070 = vtanh.f32 %v1943_v24  ;;  %v2050_v35 = vadd.f32 %v2049_v59, %v9624_v20  ;;  %7144 = vmatmul.mubr.msk.f32.gmra.mrb[114].mxu1 %vm2816_vm3, %v9728_v38  ;;  %v1946_v22 = vpop.f32.mrb[52].mxu0  ;;  %v7540_v37 = vpack.c.bf16 %v8049_v50, %v8041_v58 }
 0x161   : > { %v8053_v21 = vpop.eup %8052  ;;  %8072 = vtanh.f32 %v2048_v29  ;;  %v1947_v40 = vadd.f32 %v1946_v22, %v9559_v9  ;;  %v1948_v41 = vpop.f32.mrb[53].mxu0  ;;  %7527 = vmatprep.subr.bf16.mxu1 %v7526_v32  ;;  %3417 = vmatprep.mubr.f32.mxu1 %v11688_v6  ;;  %v7538_v42 = vpack.c.bf16 %v8051_v34, %v8043_v63 }
 0x162   : > { %v8055_v43 = vpop.eup %8054  ;;  %8074 = vtanh.f32 %v2050_v35  ;;  %v1949_v44 = vadd.f32 %v1948_v41, %v9559_v9  ;;  %7153 = vmatmul.mubr.msk.f32.gmra.mrb[128].mxu0 %vm2816_vm3, %v9728_v38  ;;  %v2053_v30 = vpop.f32.mrb[52].mxu1  ;;  %7529 = vmatpush1.bf16.msra.mxu1 %v7528_v28 }
 0x163   : > { %v8057_v61 = vpop.eup %8056  ;;  %8076 = vtanh.f32 %v1947_v40  ;;  %v2054_v48 = vadd.f32 %v2053_v30, %v9559_v9  ;;  %v2055_v49 = vpop.f32.mrb[53].mxu1  ;;  %7539 = vmatprep.subr.bf16.mxu0 %v7538_v42  ;;  %3524 = vmatprep.mubr.f32.mxu0 %v11688_v6 }
 0x164   : > { %v8059_v51 = vpop.eup %8058  ;;  %8078 = vtanh.f32 %v1949_v44  ;;  %v2056_v53 = vadd.f32 %v2055_v49, %v9559_v9  ;;  %7145 = vmatmul.mubr.msk.f32.gmra.mrb[116].mxu1 %vm2816_vm3, %v9743_v56  ;;  %v1952_v54 = vpop.f32.mrb[54].mxu0  ;;  %7541 = vmatpush1.bf16.msra.mxu0 %v7540_v37 }
 0x165   : > { %v8061_v38 = vpop.eup %8060  ;;  %8080 = vtanh.f32 %v2054_v48  ;;  %v1953_v55 = vadd.f32 %v1952_v54, %v9640_v31  ;;  %v1954_v58 = vpop.f32.mrb[55].mxu0  ;;  %3423 = vmatprep.mubr.f32.mxu1 %v11688_v6 }
 0x166   : > { %v8063_v60 = vpop.eup %8062  ;;  %8082 = vtanh.f32 %v2056_v53  ;;  %v1955_v62 = vadd.f32 %v1954_v58, %v9640_v31  ;;  %7154 = vmatmul.mubr.msk.f32.gmra.mrb[130].mxu0 %vm2816_vm3, %v9743_v56  ;;  %v2059_v63 = vpop.f32.mrb[54].mxu1  ;;  %v7532_v57 = vpack.c.bf16 %v8061_v38, %v8053_v21 }
 0x167   : > { %v8065_v33 = vpop.eup %8064  ;;  %8084 = vtanh.f32 %v1953_v55  ;;  %v2060_v2 = vadd.f32 %v2059_v63, %v9640_v31  ;;  %v2061_v4 = vpop.f32.mrb[55].mxu1  ;;  %3530 = vmatprep.mubr.f32.mxu0 %v11688_v6  ;;  %v7530_v5 = vpack.c.bf16 %v8063_v60, %v8055_v43 }
 0x168   : > { %v8067_v15 = vpop.eup %8066  ;;  %8086 = vtanh.f32 %v1955_v62  ;;  %v2062_v24 = vadd.f32 %v2061_v4, %v9640_v31  ;;  %7146 = vmatmul.mubr.msk.f32.gmra.mrb[118].mxu1 %vm2816_vm3, %v9758_v17  ;;  %v2130_v27 = vpop.f32.mrb[56].mxu0  ;;  %v7544_v28 = vpack.c.bf16 %v8065_v33, %v8057_v61 }
 0x169   : > { %v8069_v56 = vpop.eup %8068  ;;  %8088 = vtanh.f32 %v2060_v2  ;;  %v2131_v50 = vadd.f32 %v2130_v27, %v9604_v14  ;;  %v2132_v29 = vpop.f32.mrb[57].mxu0  ;;  %7531 = vmatprep.subr.bf16.mxu1 %v7530_v5  ;;  %3429 = vmatprep.mubr.f32.mxu1 %v11688_v6  ;;  %v7542_v59 = vpack.c.bf16 %v8067_v15, %v8059_v51 }
 0x16a   : > { %v8071_v32 = vpop.eup %8070  ;;  %8090 = vtanh.f32 %v2062_v24  ;;  %v2133_v34 = vadd.f32 %v2132_v29, %v9604_v14  ;;  %7155 = vmatmul.mubr.msk.f32.gmra.mrb[132].mxu0 %vm2816_vm3, %v9758_v17  ;;  %v2237_v35 = vpop.f32.mrb[56].mxu1  ;;  %7533 = vmatpush1.bf16.msra.mxu1 %v7532_v57 }
 0x16b   : > { %v9943_v22 = vpop.eup %8072  ;;  %8092 = vtanh.f32 %v2131_v50  ;;  %v2238_v37 = vadd.f32 %v2237_v35, %v9604_v14  ;;  %v2239_v21 = vpop.f32.mrb[57].mxu1  ;;  %7543 = vmatprep.subr.bf16.mxu0 %v7542_v59  ;;  %3536 = vmatprep.mubr.f32.mxu0 %v11688_v6 }
 0x16c   : > { %v8075_v40 = vpop.eup %8074  ;;  %8094 = vtanh.f32 %v2133_v34  ;;  %v2240_v41 = vadd.f32 %v2239_v21, %v9604_v14  ;;  %7147 = vmatmul.mubr.msk.f32.gmra.mrb[120].mxu1 %vm2816_vm3, %v9773_v52  ;;  %v2136_v42 = vpop.f32.mrb[58].mxu0  ;;  %7545 = vmatpush1.bf16.msra.mxu0 %v7544_v28 }
 0x16d   : > { %v8077_v17 = vpop.eup %8076  ;;  %8096 = vtanh.f32 %v2238_v37  ;;  %v2137_v43 = vadd.f32 %v2136_v42, %v9616_v18  ;;  %v2138_v44 = vpop.f32.mrb[59].mxu0  ;;  %3435 = vmatprep.mubr.f32.mxu1 %v11688_v6 }
 0x16e   : > { %v8079_v30 = vpop.eup %8078  ;;  %8098 = vtanh.f32 %v2240_v41  ;;  %v2139_v61 = vadd.f32 %v2138_v44, %v9616_v18  ;;  %7156 = vmatmul.mubr.msk.f32.gmra.mrb[134].mxu0 %vm2816_vm3, %v9773_v52  ;;  %v2243_v48 = vpop.f32.mrb[58].mxu1  ;;  %v7536_v49 = vpack.c.bf16 %v8077_v17, %v8069_v56 }
 0x16f   : > { %v8081_v51 = vpop.eup %8080  ;;  %8100 = vtanh.f32 %v2137_v43  ;;  %v2244_v53 = vadd.f32 %v2243_v48, %v9616_v18  ;;  %v2245_v54 = vpop.f32.mrb[59].mxu1  ;;  %3542 = vmatprep.mubr.f32.mxu0 %v11688_v6  ;;  %v7534_v38 = vpack.c.bf16 %v8079_v30, %v8071_v32 }
 0x170   : > { %v8083_v55 = vpop.eup %8082  ;;  %8102 = vtanh.f32 %v2139_v61  ;;  %v2246_v58 = vadd.f32 %v2245_v54, %v9616_v18  ;;  %7148 = vmatmul.mubr.msk.f32.gmra.mrb[122].mxu1 %vm2816_vm3, %v9790_v0  ;;  %v2142_v60 = vpop.f32.mrb[60].mxu0  ;;  %v7548_v52 = vpack.c.bf16 %v8081_v51, %v9943_v22 }
 0x171   : > { %v8085_v62 = vpop.eup %8084  ;;  %8104 = vtanh.f32 %v2244_v53  ;;  %v2143_v63 = vadd.f32 %v2142_v60, %v9528_v7  ;;  %v2144_v57 = vpop.f32.mrb[61].mxu0  ;;  %7535 = vmatprep.subr.bf16.mxu1 %v7534_v38  ;;  %3441 = vmatprep.mubr.f32.mxu1 %v11688_v6  ;;  %v7546_v33 = vpack.c.bf16 %v8083_v55, %v8075_v40  ;;  %v10001_v60 = vld [vmem:[%s11680_s3 + $0x8] sm:$0xff] }
 0x172   : > { %v8087_v2 = vpop.eup %8086  ;;  %8106 = vtanh.f32 %v2246_v58  ;;  %v2145_v4 = vadd.f32 %v2144_v57, %v9528_v7  ;;  %7157 = vmatmul.mubr.msk.f32.gmra.mrb[136].mxu0 %vm2816_vm3, %v9790_v0  ;;  %v2249_v5 = vpop.f32.mrb[60].mxu1  ;;  %7537 = vmatpush1.bf16.msra.mxu1 %v7536_v49 }
 0x173   : > { %v8089_v15 = vpop.eup %8088  ;;  %8108 = vtanh.f32 %v2143_v63  ;;  %v2250_v24 = vadd.f32 %v2249_v5, %v9528_v7  ;;  %v2251_v27 = vpop.f32.mrb[61].mxu1  ;;  %7159 = vmatprep.subr.msk.mxu1 %vm1157_vm0, %v8087_v2  ;;  %7547 = vmatprep.subr.bf16.mxu0 %v7546_v33 }
 0x174   : > { %v8091_v28 = vpop.eup %8090  ;;  %8110 = vtanh.f32 %v2145_v4  ;;  %v2252_v56 = vadd.f32 %v2251_v27, %v9528_v7  ;;  %7149 = vmatmul.mubr.msk.f32.gmra.mrb[124].mxu1 %vm2816_vm3, %v9805_v36  ;;  %v2148_v50 = vpop.f32.mrb[62].mxu0  ;;  %3548 = vmatprep.mubr.f32.mxu0 %v11688_v6 }
 0x175   : > { %v8093_v0 = vpop.eup %8092  ;;  %8112 = vtanh.f32 %v2250_v24  ;;  %v2149_v29 = vadd.f32 %v2148_v50, %v9545_v8  ;;  %7549 = vmatpush1.bf16.msra.mxu0 %v7548_v52  ;;  %v2150_v59 = vpop.f32.mrb[63].mxu0  ;;  %3619 = vmatprep.mubr.f32.mxu1 %v11688_v6 }
 0x176   : > { %v8095_v32 = vpop.eup %8094  ;;  %8114 = vtanh.f32 %v2252_v56  ;;  %v2151_v34 = vadd.f32 %v2150_v59, %v9545_v8  ;;  %7158 = vmatmul.mubr.msk.f32.gmra.mrb[138].mxu0 %vm2816_vm3, %v9805_v36  ;;  %7168 = vmatprep.subr.msk.mxu0 %vm1157_vm0, %v8091_v28  ;;  %v2255_v35 = vpop.f32.mrb[62].mxu1  ;;  %v9985_v36 = vld [vmem:[%s11680_s3] sm:$0xff] }
 0x177   : > { %v8097_v22 = vpop.eup %8096  ;;  %8116 = vtanh.f32 %v2149_v29  ;;  %v2256_v37 = vadd.f32 %v2255_v35, %v9545_v8  ;;  %7160 = vmatpush1.msk.msra.mxu1 %vm1157_vm0, %v8085_v62  ;;  %v2257_v21 = vpop.f32.mrb[63].mxu1  ;;  %3726 = vmatprep.mubr.f32.mxu0 %v11688_v6 }
 0x178   : > { %v8099_v40 = vpop.eup %8098  ;;  %8118 = vtanh.f32 %v2151_v34  ;;  %v2258_v41 = vadd.f32 %v2257_v21, %v9545_v8  ;;  %7161 = vmatmul.mubr.msk.f32.vlgmr.msra.gmra.mrb[126].mxu1 %vm2816_vm3, %v9985_v36  ;;  %v2154_v42 = vpop.f32.mrb[64].mxu0 }
 0x179   : > { %v8101_v17 = vpop.eup %8100  ;;  %8120 = vtanh.f32 %v2256_v37  ;;  %v2155_v43 = vadd.f32 %v2154_v42, %v9624_v20  ;;  %7169 = vmatpush1.msk.msra.mxu0 %vm1157_vm0, %v8089_v15  ;;  %v2156_v44 = vpop.f32.mrb[65].mxu0  ;;  %3625 = vmatprep.mubr.f32.mxu1 %v11688_v6 }
 0x17a   : > { %v8103_v30 = vpop.eup %8102  ;;  %8122 = vtanh.f32 %v2258_v41  ;;  %v2157_v61 = vadd.f32 %v2156_v44, %v9624_v20  ;;  %7170 = vmatmul.mubr.msk.f32.vlgmr.msra.gmra.mrb[140].mxu0 %vm2816_vm3, %v9985_v36  ;;  %v2261_v48 = vpop.f32.mrb[64].mxu1  ;;  %v7552_v49 = vpack.c.bf16 %v8101_v17, %v8093_v0  ;;  %v10016_v0 = vld [vmem:[%s11680_s3 + $0x10] sm:$0xff] }
 0x17b   : > { %v8105_v51 = vpop.eup %8104  ;;  %8124 = vtanh.f32 %v2155_v43  ;;  %v2262_v53 = vadd.f32 %v2261_v48, %v9624_v20  ;;  %v2263_v54 = vpop.f32.mrb[65].mxu1  ;;  %3732 = vmatprep.mubr.f32.mxu0 %v11688_v6  ;;  %v7550_v38 = vpack.c.bf16 %v8103_v30, %v8095_v32  ;;  %v10031_v30 = vld [vmem:[%s11680_s3 + $0x18] sm:$0xff] }
 0x17c   : > { %v8107_v55 = vpop.eup %8106  ;;  %8126 = vtanh.f32 %v2157_v61  ;;  %v2264_v58 = vadd.f32 %v2263_v54, %v9624_v20  ;;  %7162 = vmatmul.mubr.msk.f32.gmra.mrb[128].mxu1 %vm2816_vm3, %v10001_v60  ;;  %v2160_v52 = vpop.f32.mrb[66].mxu0  ;;  %v7564_v62 = vpack.c.bf16 %v8105_v51, %v8097_v22 }
 0x17d   : > { %v8109_v63 = vpop.eup %8108  ;;  %8128 = vtanh.f32 %v2262_v53  ;;  %v2161_v57 = vadd.f32 %v2160_v52, %v9559_v9  ;;  %v2162_v33 = vpop.f32.mrb[67].mxu0  ;;  %7551 = vmatprep.subr.bf16.mxu1 %v7550_v38  ;;  %3631 = vmatprep.mubr.f32.mxu1 %v11688_v6  ;;  %v7562_v2 = vpack.c.bf16 %v8107_v55, %v8099_v40 }
 0x17e   : > { %v8111_v4 = vpop.eup %8110  ;;  %8130 = vtanh.f32 %v2264_v58  ;;  %v2163_v5 = vadd.f32 %v2162_v33, %v9559_v9  ;;  %7171 = vmatmul.mubr.msk.f32.gmra.mrb[142].mxu0 %vm2816_vm3, %v10001_v60  ;;  %v2267_v15 = vpop.f32.mrb[66].mxu1  ;;  %7553 = vmatpush1.bf16.msra.mxu1 %v7552_v49 }
 0x17f   : > { %v8113_v24 = vpop.eup %8112  ;;  %8132 = vtanh.f32 %v2161_v57  ;;  %v2268_v27 = vadd.f32 %v2267_v15, %v9559_v9  ;;  %v2269_v28 = vpop.f32.mrb[67].mxu1  ;;  %7563 = vmatprep.subr.bf16.mxu0 %v7562_v2  ;;  %3738 = vmatprep.mubr.f32.mxu0 %v11688_v6  ;;  %v10048_v2 = vld [vmem:[%s11680_s3 + $0x20] sm:$0xff] }
 0x180   : > { %v8115_v56 = vpop.eup %8114  ;;  %8134 = vtanh.f32 %v2163_v5  ;;  %v2270_v50 = vadd.f32 %v2269_v28, %v9559_v9  ;;  %7163 = vmatmul.mubr.msk.f32.gmra.mrb[130].mxu1 %vm2816_vm3, %v10016_v0  ;;  %v2166_v29 = vpop.f32.mrb[68].mxu0  ;;  %7565 = vmatpush1.bf16.msra.mxu0 %v7564_v62 }
 0x181   : > { %v8117_v59 = vpop.eup %8116  ;;  %8136 = vtanh.f32 %v2268_v27  ;;  %v2167_v32 = vadd.f32 %v2166_v29, %v9640_v31  ;;  %v2168_v34 = vpop.f32.mrb[69].mxu0  ;;  %3637 = vmatprep.mubr.f32.mxu1 %v11688_v6 }
 0x182   : > { %v8119_v35 = vpop.eup %8118  ;;  %8138 = vtanh.f32 %v2270_v50  ;;  %v2169_v22 = vadd.f32 %v2168_v34, %v9640_v31  ;;  %7172 = vmatmul.mubr.msk.f32.gmra.mrb[144].mxu0 %vm2816_vm3, %v10016_v0  ;;  %v2273_v37 = vpop.f32.mrb[68].mxu1  ;;  %v7556_v21 = vpack.c.bf16 %v8117_v59, %v8109_v63 }
 0x183   : > { %v8121_v40 = vpop.eup %8120  ;;  %8140 = vtanh.f32 %v2167_v32  ;;  %v2274_v41 = vadd.f32 %v2273_v37, %v9640_v31  ;;  %v2275_v42 = vpop.f32.mrb[69].mxu1  ;;  %3744 = vmatprep.mubr.f32.mxu0 %v11688_v6  ;;  %v7554_v17 = vpack.c.bf16 %v8119_v35, %v8111_v4  ;;  %v10063_v37 = vld [vmem:[%s11680_s3 + $0x28] sm:$0xff] }
 0x184   : > { %v8123_v43 = vpop.eup %8122  ;;  %8142 = vtanh.f32 %v2169_v22  ;;  %v2276_v44 = vadd.f32 %v2275_v42, %v9640_v31  ;;  %7164 = vmatmul.mubr.msk.f32.gmra.mrb[132].mxu1 %vm2816_vm3, %v10031_v30  ;;  %v2344_v61 = vpop.f32.mrb[70].mxu0  ;;  %v7568_v48 = vpack.c.bf16 %v8121_v40, %v8113_v24 }
 0x185   : > { %v8125_v49 = vpop.eup %8124  ;;  %8144 = vtanh.f32 %v2274_v41  ;;  %v2345_v51 = vadd.f32 %v2344_v61, %v9604_v14  ;;  %v2346_v53 = vpop.f32.mrb[71].mxu0  ;;  %7555 = vmatprep.subr.bf16.mxu1 %v7554_v17  ;;  %3643 = vmatprep.mubr.f32.mxu1 %v11688_v6  ;;  %v7566_v54 = vpack.c.bf16 %v8123_v43, %v8115_v56 }
 0x186   : > { %v8127_v38 = vpop.eup %8126  ;;  %8146 = vtanh.f32 %v2276_v44  ;;  %v2347_v55 = vadd.f32 %v2346_v53, %v9604_v14  ;;  %7173 = vmatmul.mubr.msk.f32.gmra.mrb[146].mxu0 %vm2816_vm3, %v10031_v30  ;;  %v2451_v58 = vpop.f32.mrb[70].mxu1  ;;  %7557 = vmatpush1.bf16.msra.mxu1 %v7556_v21 }
 0x187   : > { %v10040_v52 = vpop.eup %8128  ;;  %8148 = vtanh.f32 %v2345_v51  ;;  %v2452_v62 = vadd.f32 %v2451_v58, %v9604_v14  ;;  %v2453_v63 = vpop.f32.mrb[71].mxu1  ;;  %7567 = vmatprep.subr.bf16.mxu0 %v7566_v54  ;;  %3750 = vmatprep.mubr.f32.mxu0 %v11688_v6 }
 0x188   : > { %v8131_v57 = vpop.eup %8130  ;;  %8150 = vtanh.f32 %v2347_v55  ;;  %v2454_v33 = vadd.f32 %v2453_v63, %v9604_v14  ;;  %7165 = vmatmul.mubr.msk.f32.gmra.mrb[134].mxu1 %vm2816_vm3, %v10048_v2  ;;  %v2350_v4 = vpop.f32.mrb[72].mxu0  ;;  %7569 = vmatpush1.bf16.msra.mxu0 %v7568_v48  ;;  %v10079_v55 = vld [vmem:[%s11680_s3 + $0x30] sm:$0x3] }
 0x189   : > { %v8133_v5 = vpop.eup %8132  ;;  %8152 = vtanh.f32 %v2452_v62  ;;  %v2351_v15 = vadd.f32 %v2350_v4, %v9616_v18  ;;  %v2352_v24 = vpop.f32.mrb[73].mxu0  ;;  %3649 = vmatprep.mubr.f32.mxu1 %v11688_v6 }
 0x18a   : > { %v8135_v27 = vpop.eup %8134  ;;  %8154 = vtanh.f32 %v2454_v33  ;;  %v2353_v28 = vadd.f32 %v2352_v24, %v9616_v18  ;;  %7174 = vmatmul.mubr.msk.f32.gmra.mrb[148].mxu0 %vm2816_vm3, %v10048_v2  ;;  %v2457_v56 = vpop.f32.mrb[72].mxu1  ;;  %v7560_v50 = vpack.c.bf16 %v8133_v5, %v8125_v49 }
 0x18b   : > { %v8137_v29 = vpop.eup %8136  ;;  %8156 = vtanh.f32 %v2351_v15  ;;  %v2458_v59 = vadd.f32 %v2457_v56, %v9616_v18  ;;  %v2459_v32 = vpop.f32.mrb[73].mxu1  ;;  %3756 = vmatprep.mubr.f32.mxu0 %v11688_v6  ;;  %v7558_v34 = vpack.c.bf16 %v8135_v27, %v8127_v38 }
 0x18c   : > { %v8139_v35 = vpop.eup %8138  ;;  %8158 = vtanh.f32 %v2353_v28  ;;  %v2460_v22 = vadd.f32 %v2459_v32, %v9616_v18  ;;  %7166 = vmatmul.mubr.msk.f32.gmra.mrb[136].mxu1 %vm2816_vm3, %v10063_v37  ;;  %v2356_v21 = vpop.f32.mrb[74].mxu0  ;;  %v7572_v40 = vpack.c.bf16 %v8137_v29, %v10040_v52 }
 0x18d   : > { %v8141_v41 = vpop.eup %8140  ;;  %8160 = vtanh.f32 %v2458_v59  ;;  %v2357_v42 = vadd.f32 %v2356_v21, %v9528_v7  ;;  %v2358_v17 = vpop.f32.mrb[75].mxu0  ;;  %7559 = vmatprep.subr.bf16.mxu1 %v7558_v34  ;;  %3655 = vmatprep.mubr.f32.mxu1 %v11688_v6  ;;  %v7570_v43 = vpack.c.bf16 %v8139_v35, %v8131_v57 }
 0x18e   : > { %v8143_v44 = vpop.eup %8142  ;;  %8162 = vtanh.f32 %v2460_v22  ;;  %v2359_v61 = vadd.f32 %v2358_v17, %v9528_v7  ;;  %7175 = vmatmul.mubr.msk.f32.gmra.mrb[150].mxu0 %vm2816_vm3, %v10063_v37  ;;  %v2463_v48 = vpop.f32.mrb[74].mxu1  ;;  %7561 = vmatpush1.bf16.msra.mxu1 %v7560_v50 }
 0x18f   : > { %v8145_v49 = vpop.eup %8144  ;;  %8164 = vtanh.f32 %v2357_v42  ;;  %v2464_v51 = vadd.f32 %v2463_v48, %v9528_v7  ;;  %v2465_v53 = vpop.f32.mrb[75].mxu1  ;;  %7177 = vmatprep.subr.msk.mxu1 %vm1157_vm0, %v8143_v44  ;;  %7571 = vmatprep.subr.bf16.mxu0 %v7570_v43 }
 0x190   : > { %v8147_v54 = vpop.eup %8146  ;;  %8166 = vtanh.f32 %v2359_v61  ;;  %v2466_v38 = vadd.f32 %v2465_v53, %v9528_v7  ;;  %7167 = vmatmul.mubr.msk.f32.gmra.mrb[138].mxu1 %vm2816_vm3, %v10079_v55  ;;  %v2362_v58 = vpop.f32.mrb[76].mxu0  ;;  %3762 = vmatprep.mubr.f32.mxu0 %v11688_v6 }
 0x191   : > { %v8149_v52 = vpop.eup %8148  ;;  %8168 = vtanh.f32 %v2464_v51  ;;  %v2363_v62 = vadd.f32 %v2362_v58, %v9545_v8  ;;  %7573 = vmatpush1.bf16.msra.mxu0 %v7572_v40  ;;  %v2364_v63 = vpop.f32.mrb[77].mxu0  ;;  %3833 = vmatprep.mubr.f32.mxu1 %v11688_v6 }
 0x192   : > { %v8151_v57 = vpop.eup %8150  ;;  %8170 = vtanh.f32 %v2466_v38  ;;  %v2365_v33 = vadd.f32 %v2364_v63, %v9545_v8  ;;  %7176 = vmatmul.mubr.msk.f32.gmra.mrb[152].mxu0 %vm2816_vm3, %v10079_v55  ;;  %7186 = vmatprep.subr.msk.mxu0 %vm1157_vm0, %v8147_v54  ;;  %v2469_v4 = vpop.f32.mrb[76].mxu1 }
 0x193   : > { %v8153_v5 = vpop.eup %8152  ;;  %8172 = vtanh.f32 %v2363_v62  ;;  %v2470_v15 = vadd.f32 %v2469_v4, %v9545_v8  ;;  %7178 = vmatpush1.msk.msra.mxu1 %vm1157_vm0, %v8141_v41  ;;  %v2471_v24 = vpop.f32.mrb[77].mxu1  ;;  %3940 = vmatprep.mubr.f32.mxu0 %v11688_v6 }
 0x194   : > { %v8155_v27 = vpop.eup %8154  ;;  %8174 = vtanh.f32 %v2365_v33  ;;  %v2472_v28 = vadd.f32 %v2471_v24, %v9545_v8  ;;  %7179 = vmatmul.mubr.msk.f32.vlgmr.msra.gmra.mrb[140].mxu1 %vm2816_vm3, %v9985_v36  ;;  %v2368_v56 = vpop.f32.mrb[78].mxu0 }
 0x195   : > { %v8157_v50 = vpop.eup %8156  ;;  %8176 = vtanh.f32 %v2470_v15  ;;  %v2369_v29 = vadd.f32 %v2368_v56, %v9624_v20  ;;  %7187 = vmatpush1.msk.msra.mxu0 %vm1157_vm0, %v8145_v49  ;;  %v2370_v59 = vpop.f32.mrb[79].mxu0  ;;  %3839 = vmatprep.mubr.f32.mxu1 %v11688_v6 }
 0x196   : > { %v8159_v32 = vpop.eup %8158  ;;  %8178 = vtanh.f32 %v2472_v28  ;;  %v2371_v34 = vadd.f32 %v2370_v59, %v9624_v20  ;;  %7188 = vmatmul.mubr.msk.f32.vlgmr.msra.gmra.mrb[154].mxu0 %vm2816_vm3, %v9985_v36  ;;  %v2475_v35 = vpop.f32.mrb[78].mxu1  ;;  %v7576_v22 = vpack.c.bf16 %v8157_v50, %v8149_v52 }
 0x197   : > { %v8161_v21 = vpop.eup %8160  ;;  %8180 = vtanh.f32 %v2369_v29  ;;  %v2476_v40 = vadd.f32 %v2475_v35, %v9624_v20  ;;  %v2477_v41 = vpop.f32.mrb[79].mxu1  ;;  %3946 = vmatprep.mubr.f32.mxu0 %v11688_v6  ;;  %v7574_v42 = vpack.c.bf16 %v8159_v32, %v8151_v57 }
 0x198   : > { %v8163_v17 = vpop.eup %8162  ;;  %8182 = vtanh.f32 %v2371_v34  ;;  %v2478_v43 = vadd.f32 %v2477_v41, %v9624_v20  ;;  %7180 = vmatmul.mubr.msk.f32.gmra.mrb[142].mxu1 %vm2816_vm3, %v10001_v60  ;;  %v2374_v44 = vpop.f32.mrb[80].mxu0  ;;  %v7588_v61 = vpack.c.bf16 %v8161_v21, %v8153_v5 }
 0x199   : > { %v8165_v48 = vpop.eup %8164  ;;  %8184 = vtanh.f32 %v2476_v40  ;;  %v2375_v49 = vadd.f32 %v2374_v44, %v9559_v9  ;;  %v2376_v51 = vpop.f32.mrb[81].mxu0  ;;  %7575 = vmatprep.subr.bf16.mxu1 %v7574_v42  ;;  %3845 = vmatprep.mubr.f32.mxu1 %v11688_v6  ;;  %v7586_v53 = vpack.c.bf16 %v8163_v17, %v8155_v27 }
 0x19a   : > { %v8167_v54 = vpop.eup %8166  ;;  %8186 = vtanh.f32 %v2478_v43  ;;  %v2377_v38 = vadd.f32 %v2376_v51, %v9559_v9  ;;  %7189 = vmatmul.mubr.msk.f32.gmra.mrb[156].mxu0 %vm2816_vm3, %v10001_v60  ;;  %v2481_v58 = vpop.f32.mrb[80].mxu1  ;;  %7577 = vmatpush1.bf16.msra.mxu1 %v7576_v22 }
 0x19b   : > { %v8169_v52 = vpop.eup %8168  ;;  %8188 = vtanh.f32 %v2375_v49  ;;  %v2482_v62 = vadd.f32 %v2481_v58, %v9559_v9  ;;  %v2483_v63 = vpop.f32.mrb[81].mxu1  ;;  %7587 = vmatprep.subr.bf16.mxu0 %v7586_v53  ;;  %3952 = vmatprep.mubr.f32.mxu0 %v11688_v6 }
 0x19c   : > { %v8171_v57 = vpop.eup %8170  ;;  %8190 = vtanh.f32 %v2377_v38  ;;  %v2484_v33 = vadd.f32 %v2483_v63, %v9559_v9  ;;  %7181 = vmatmul.mubr.msk.f32.gmra.mrb[144].mxu1 %vm2816_vm3, %v10016_v0  ;;  %v2380_v4 = vpop.f32.mrb[82].mxu0  ;;  %7589 = vmatpush1.bf16.msra.mxu0 %v7588_v61 }
 0x19d   : > { %v8173_v5 = vpop.eup %8172  ;;  %8192 = vtanh.f32 %v2482_v62  ;;  %v2382_v15 = vpop.f32.mrb[83].mxu0  ;;  %3851 = vmatprep.mubr.f32.mxu1 %v11688_v6  ;;  %v2381_v34 = vadd.f32 %v2380_v4, %v9640_v31 }
 0x19e   : > { %v8175_v24 = vpop.eup %8174  ;;  %8194 = vtanh.f32 %v2484_v33  ;;  %v2383_v27 = vadd.f32 %v2382_v15, %v9640_v31  ;;  %7190 = vmatmul.mubr.msk.f32.gmra.mrb[158].mxu0 %vm2816_vm3, %v10016_v0  ;;  %v2487_v28 = vpop.f32.mrb[82].mxu1  ;;  %v7580_v56 = vpack.c.bf16 %v8173_v5, %v8165_v48 }
 0x19f   : > { %v8177_v50 = vpop.eup %8176  ;;  %v2489_v29 = vpop.f32.mrb[83].mxu1  ;;  %3958 = vmatprep.mubr.f32.mxu0 %v11688_v6  ;;  %v7578_v59 = vpack.c.bf16 %v8175_v24, %v8167_v54  ;;  %v2488_v41 = vadd.f32 %v2487_v28, %v9640_v31 }
 0x1a0   : > { %v8179_v32 = vpop.eup %8178  ;;  %8196 = vtanh.f32 %v2383_v27  ;;  %v2490_v35 = vadd.f32 %v2489_v29, %v9640_v31  ;;  %7182 = vmatmul.mubr.msk.f32.gmra.mrb[146].mxu1 %vm2816_vm3, %v10031_v30  ;;  %v2558_v22 = vpop.f32.mrb[84].mxu0  ;;  %v7592_v21 = vpack.c.bf16 %v8177_v50, %v8169_v52  ;;  %v11687_v29 = vmov 0.0|0.0  }
 0x1a1   : > { %v8181_v40 = vpop.eup %8180  ;;  %7579 = vmatprep.subr.bf16.mxu1 %v7578_v59  ;;  %v7368_v42 = vpop.f32.mrb[85].mxu0  ;;  %3857 = vmatprep.mubr.f32.mxu1 %v11688_v6  ;;  %v7590_v17 = vpack.c.bf16 %v8179_v32, %v8171_v57  ;;  %v2559_v44 = vadd.f32 %v2558_v22, %v9604_v14 }
 0x1a2   : > { %v8183_v43 = vpop.eup %8182  ;;  %8198 = vtanh.f32 %v2490_v35  ;;  %7191 = vmatmul.mubr.msk.f32.gmra.mrb[160].mxu0 %vm2816_vm3, %v10031_v30  ;;  %7581 = vmatpush1.bf16.msra.mxu1 %v7580_v56 }
 0x1a3   : > { %v8185_v61 = vpop.eup %8184  ;;  %7591 = vmatprep.subr.bf16.mxu0 %v7590_v17  ;;  %3964 = vmatprep.mubr.f32.mxu0 %v11688_v6  ;;  %8200 = vtanh.f32 %v2381_v34  ;;  %v2563_v49 = vpop.f32.mrb[86].mxu0 }
 0x1a4   : > { %v8187_v48 = vpop.eup %8186  ;;  %7183 = vmatmul.mubr.msk.f32.gmra.mrb[148].mxu1 %vm2816_vm3, %v10048_v2  ;;  %7593 = vmatpush1.bf16.msra.mxu0 %v7592_v21  ;;  %8202 = vtanh.f32 %v2488_v41  ;;  %v2564_v53 = vadd.f32 %v2563_v49, %v9616_v18  ;;  %v7371_v14 = vpop.f32.mrb[87].mxu0 }
 0x1a5   : > { %v8189_v51 = vpop.eup %8188  ;;  %3863 = vmatprep.mubr.f32.mxu1 %v11688_v6  ;;  %8204 = vtanh.f32 %v2559_v44 }
 0x1a6   : > { %v8191_v54 = vpop.eup %8190  ;;  %7192 = vmatmul.mubr.msk.f32.gmra.mrb[162].mxu0 %vm2816_vm3, %v10048_v2  ;;  %v7584_v38 = vpack.c.bf16 %v8189_v51, %v8181_v40  ;;  %8206 = vtanh.f32 %v2564_v53 }
 0x1a7   : > { %v8193_v58 = vpop.eup %8192  ;;  %3970 = vmatprep.mubr.f32.mxu0 %v11688_v6  ;;  %v7582_v52 = vpack.c.bf16 %v8191_v54, %v8183_v43  ;;  %v2568_v63 = vpop.f32.mrb[88].mxu0 }
 0x1a8   : > { %v8195_v62 = vpop.eup %8194  ;;  %7184 = vmatmul.mubr.msk.f32.gmra.mrb[150].mxu1 %vm2816_vm3, %v10063_v37  ;;  %v7596_v18 = vpack.c.bf16 %v8193_v58, %v8185_v61  ;;  %v7374_v57 = vpop.f32.mrb[89].mxu0  ;;  %v2569_v5 = vadd.f32 %v2568_v63, %v9528_v7 }
 0x1a9   : > { %7583 = vmatprep.subr.bf16.mxu1 %v7582_v52  ;;  %3869 = vmatprep.mubr.f32.mxu1 %v11688_v6  ;;  %v7594_v33 = vpack.c.bf16 %v8195_v62, %v8187_v48 }
 0x1aa   : > { %v8197_v4 = vpop.eup %8196  ;;  %7193 = vmatmul.mubr.msk.f32.gmra.mrb[164].mxu0 %vm2816_vm3, %v10063_v37  ;;  %7585 = vmatpush1.bf16.msra.mxu1 %v7584_v38  ;;  %8208 = vtanh.f32 %v2569_v5 }
 0x1ab   : > { %7195 = vmatprep.subr.msk.mxu1 %vm1157_vm0, %v8197_v4  ;;  %7595 = vmatprep.subr.bf16.mxu0 %v7594_v33  ;;  %v2573_v24 = vpop.f32.mrb[90].mxu0 }
 0x1ac   : > { %v8199_v15 = vpop.eup %8198  ;;  %7185 = vmatmul.mubr.msk.f32.gmra.mrb[152].mxu1 %vm2816_vm3, %v10079_v55  ;;  %3976 = vmatprep.mubr.f32.mxu0 %v11688_v6  ;;  %v2574_v27 = vadd.f32 %v2573_v24, %v9545_v8  ;;  %v7377_v28 = vpop.f32.mrb[91].mxu0 }
 0x1ad   : > { %7597 = vmatpush1.bf16.msra.mxu0 %v7596_v18  ;;  %4047 = vmatprep.mubr.f32.mxu1 %v11688_v6  ;;  %v8201_v7 = vpop.eup %8200 }
 0x1ae   : > { %7194 = vmatmul.mubr.msk.f32.gmra.mrb[166].mxu0 %vm2816_vm3, %v10079_v55  ;;  %7204 = vmatprep.subr.msk.mxu0 %vm1157_vm0, %v8199_v15  ;;  %v8203_v56 = vpop.eup %8202  ;;  %8210 = vtanh.f32 %v2574_v27 }
 0x1af   : > { %7196 = vmatpush1.msk.msra.mxu1 %vm1157_vm0, %v8201_v7  ;;  %4154 = vmatprep.mubr.f32.mxu0 %v11688_v6  ;;  %v8205_v50 = vpop.eup %8204  ;;  %v2578_v8 = vpop.f32.mrb[92].mxu0 }
 0x1b0   : > { %7197 = vmatmul.mubr.msk.f32.vlgmr.msra.gmra.mrb[154].mxu1 %vm2816_vm3, %v9985_v36  ;;  %7598 = vmatprep.subr.bf16.mxu1 %v11687_v29  ;;  %v8207_v59 = vpop.eup %8206  ;;  %v7380_v32 = vpop.f32.mrb[93].mxu0  ;;  %v2579_v34 = vadd.f32 %v2578_v8, %v9624_v20 }
 0x1b1   : > { %7205 = vmatpush1.msk.msra.mxu0 %vm1157_vm0, %v8203_v56  ;;  %4053 = vmatprep.mubr.f32.mxu1 %v11688_v6  ;;  %v7599_v35 = vpack.c.bf16 %v8207_v59, %v8205_v50 }
 0x1b2   : > { %7206 = vmatmul.mubr.msk.f32.vlgmr.msra.gmra.mrb[168].mxu0 %vm2816_vm3, %v9985_v36  ;;  %8212 = vtanh.f32 %v2579_v34 }
 0x1b3   : > { %4160 = vmatprep.mubr.f32.mxu0 %v11688_v6  ;;  %v2583_v22 = vpop.f32.mrb[94].mxu0  ;;  %7600 = vmatpush3.bf16.msra.mxu1 %v7599_v35 }
 0x1b4   : > { %7198 = vmatmul.mubr.msk.f32.gmra.mrb[156].mxu1 %vm2816_vm3, %v10001_v60  ;;  %v2584_v21 = vadd.f32 %v2583_v22, %v9559_v9  ;;  %v7383_v40 = vpop.f32.mrb[95].mxu0  ;;  %7601 = vmatprep.subr.bf16.mxu1 %v11687_v29  ;;  %v8209_v20 = vpop.eup %8208 }
 0x1b5   : > { %4059 = vmatprep.mubr.f32.mxu1 %v11688_v6 }
 0x1b6   : > { %7207 = vmatmul.mubr.msk.f32.gmra.mrb[170].mxu0 %vm2816_vm3, %v10001_v60  ;;  %8214 = vtanh.f32 %v2584_v21 }
 0x1b7   : > { %4166 = vmatprep.mubr.f32.mxu0 %v11688_v6  ;;  %v2588_v41 = vpop.f32.mrb[96].mxu0 }
 0x1b8   : > { %7199 = vmatmul.mubr.msk.f32.gmra.mrb[158].mxu1 %vm2816_vm3, %v10016_v0  ;;  %v8211_v42 = vpop.eup %8210  ;;  %v7386_v9 = vpop.f32.mrb[97].mxu0  ;;  %v2589_v17 = vadd.f32 %v2588_v41, %v9640_v31 }
 0x1b9   : > { %4065 = vmatprep.mubr.f32.mxu1 %v11688_v6  ;;  %v7602_v43 = vpack.c.bf16 %v8211_v42, %v8209_v20 }
 0x1ba   : > { %7208 = vmatmul.mubr.msk.f32.gmra.mrb[172].mxu0 %vm2816_vm3, %v10016_v0  ;;  %8216 = vtanh.f32 %v2589_v17 }
 0x1bb   : > { %4172 = vmatprep.mubr.f32.mxu0 %v11688_v6  ;;  %7603 = vmatpush3.bf16.msra.mxu1 %v7602_v43 }
 0x1bc   : > { %7200 = vmatmul.mubr.msk.f32.gmra.mrb[160].mxu1 %vm2816_vm3, %v10031_v30  ;;  %7604 = vmatprep.subr.bf16.mxu1 %v11687_v29  ;;  %v8213_v31 = vpop.eup %8212 }
 0x1bd   : > { %4071 = vmatprep.mubr.f32.mxu1 %v11688_v6 }
 0x1be   : > { %7209 = vmatmul.mubr.msk.f32.gmra.mrb[174].mxu0 %vm2816_vm3, %v10031_v30 }
 0x1bf   : > { %4178 = vmatprep.mubr.f32.mxu0 %v11688_v6 }
 0x1c0   : > { %7201 = vmatmul.mubr.msk.f32.gmra.mrb[162].mxu1 %vm2816_vm3, %v10048_v2  ;;  %v8215_v44 = vpop.eup %8214 }
 0x1c1   : > { %4077 = vmatprep.mubr.f32.mxu1 %v11688_v6  ;;  %v7605_v61 = vpack.c.bf16 %v8215_v44, %v8213_v31 }
 0x1c2   : > { %7210 = vmatmul.mubr.msk.f32.gmra.mrb[176].mxu0 %vm2816_vm3, %v10048_v2 }
 0x1c3   : > { %4184 = vmatprep.mubr.f32.mxu0 %v11688_v6  ;;  %7606 = vmatpush3.bf16.msra.mxu1 %v7605_v61 }
 0x1c4   : > { %7202 = vmatmul.mubr.msk.f32.gmra.mrb[164].mxu1 %vm2816_vm3, %v10063_v37  ;;  %7399 = vmatprep.subr.mxu1 %v11688_v6  ;;  %v8217_v48 = vpop.eup %8216 }
 0x1c5   : > { %4083 = vmatprep.mubr.f32.mxu1 %v11688_v6 }
 0x1c6   : > { %7211 = vmatmul.mubr.msk.f32.gmra.mrb[178].mxu0 %vm2816_vm3, %v10063_v37 }
 0x1c7   : > { %4190 = vmatprep.mubr.f32.mxu0 %v11688_v6  ;;  %7400 = vmatpush3.msk.msra.mxu1 %vm1157_vm0, %v8217_v48 }
 0x1c8   : > { %7203 = vmatmul.mubr.msk.f32.gmra.mrb[166].mxu1 %vm2816_vm3, %v10079_v55 }
 0x1c9   : > { %7401 = vmatprep.mubr.msk.f32.mxu1 %vm8807_vm2, %v11688_v6 }
 0x1ca   : > { %7212 = vmatmul.mubr.msk.f32.gmra.mrb[180].mxu0 %vm2816_vm3, %v10079_v55 }
 0x1cb   : > { %4641 = vmatprep.mubr.f32.mxu0 %v11688_v6 }
 0x1cc   : > { %7402 = vmatmul.mubr.msk.f32.vlgmr.msra.gmra.mrb[168].mxu1 %vm2816_vm3, %v9985_v36 }
 0x1cd   : > { %7404 = vmatprep.mubr.msk.f32.mxu1 %vm8807_vm2, %v11688_v6 }
 0x1d0   : > { %7405 = vmatmul.mubr.msk.f32.gmra.mrb[170].mxu1 %vm2816_vm3, %v10001_v60 }
 0x1d1   : > { %7407 = vmatprep.mubr.msk.f32.mxu1 %vm8807_vm2, %v11688_v6 }
 0x1d4   : > { %7408 = vmatmul.mubr.msk.f32.gmra.mrb[172].mxu1 %vm2816_vm3, %v10016_v0 }
 0x1d5   : > { %7410 = vmatprep.mubr.msk.f32.mxu1 %vm8807_vm2, %v11688_v6 }
 0x1d8   : > { %7411 = vmatmul.mubr.msk.f32.gmra.mrb[174].mxu1 %vm2816_vm3, %v10031_v30 }
 0x1d9   : > { %7413 = vmatprep.mubr.msk.f32.mxu1 %vm8807_vm2, %v11688_v6 }
 0x1dc   : > { %7414 = vmatmul.mubr.msk.f32.gmra.mrb[176].mxu1 %vm2816_vm3, %v10048_v2 }
 0x1dd   : > { %7416 = vmatprep.mubr.msk.f32.mxu1 %vm8807_vm2, %v11688_v6 }
 0x1e0   : > { %7417 = vmatmul.mubr.msk.f32.gmra.mrb[178].mxu1 %vm2816_vm3, %v10063_v37 }
 0x1e1   : > { %7419 = vmatprep.mubr.msk.f32.mxu1 %vm8807_vm2, %v11688_v6 }
 0x1e4   : > { %7420 = vmatmul.mubr.msk.f32.gmra.mrb[180].mxu1 %vm2816_vm3, %v10079_v55 }
 0x1e5   : > { %4724 = vmatprep.mubr.f32.mxu1 %v11688_v6 }
 0x1f5   : > { %v2979_v36 = vpop.f32.mrb[84].mxu1 }
 0x1f6   : > { %v2980_v60 = vadd.f32 %v2979_v36, %v9573_v11  ;;  %v2981_v0 = vpop.f32.mrb[85].mxu1 }
 0x1f7   : > { %v2982_v30 = vadd.f32 %v2981_v0, %v9573_v11 }
 0x1f8   : > { %v3086_v2 = vpop.f32.mrb[98].mxu0  ;;  %8218 = vtanh.f32 %v2980_v60 }
 0x1f9   : > { %v3087_v49 = vadd.f32 %v3086_v2, %v9573_v11  ;;  %v3088_v51 = vpop.f32.mrb[99].mxu0  ;;  %8220 = vtanh.f32 %v2982_v30  ;;  %v2985_v53 = vpop.f32.mrb[86].mxu1 }
 0x1fa   : > { %v3089_v37 = vadd.f32 %v3088_v51, %v9573_v11  ;;  %v2986_v55 = vadd.f32 %v2985_v53, %v9655_v46  ;;  %v2987_v14 = vpop.f32.mrb[87].mxu1 }
 0x1fb   : > { %8222 = vtanh.f32 %v3087_v49  ;;  %v2988_v54 = vadd.f32 %v2987_v14, %v9655_v46 }
 0x1fc   : > { %8224 = vtanh.f32 %v3089_v37  ;;  %v3092_v38 = vpop.f32.mrb[100].mxu0 }
 0x1fd   : > { %8226 = vtanh.f32 %v2986_v55  ;;  %v3093_v58 = vadd.f32 %v3092_v38, %v9655_v46  ;;  %v3094_v52 = vpop.f32.mrb[101].mxu0 }
 0x1fe   : > { %8228 = vtanh.f32 %v2988_v54  ;;  %v3095_v62 = vadd.f32 %v3094_v52, %v9655_v46  ;;  %v2991_v63 = vpop.f32.mrb[88].mxu1 }
 0x1ff   : > { %8230 = vtanh.f32 %v3093_v58  ;;  %v2992_v18 = vadd.f32 %v2991_v63, %v9587_v12  ;;  %v2993_v57 = vpop.f32.mrb[89].mxu1 }
 0x200   : > { %8232 = vtanh.f32 %v3095_v62  ;;  %v2994_v33 = vadd.f32 %v2993_v57, %v9587_v12  ;;  %v3098_v4 = vpop.f32.mrb[102].mxu0 }
 0x201   : > { %8234 = vtanh.f32 %v2992_v18  ;;  %v3099_v5 = vadd.f32 %v3098_v4, %v9587_v12  ;;  %v3100_v15 = vpop.f32.mrb[103].mxu0 }
 0x202   : > { %8236 = vtanh.f32 %v2994_v33  ;;  %v3101_v24 = vadd.f32 %v3100_v15, %v9587_v12  ;;  %v2997_v27 = vpop.f32.mrb[90].mxu1  ;;  %v8219_v28 = vpop.eup %8218 }
 0x203   : > { %8238 = vtanh.f32 %v3099_v5  ;;  %v2998_v7 = vadd.f32 %v2997_v27, %v9667_v23  ;;  %v2999_v56 = vpop.f32.mrb[91].mxu1  ;;  %v8221_v50 = vpop.eup %8220 }
 0x204   : > { %8240 = vtanh.f32 %v3101_v24  ;;  %v3000_v8 = vadd.f32 %v2999_v56, %v9667_v23  ;;  %v3104_v59 = vpop.f32.mrb[104].mxu0 }
 0x205   : > { %v8223_v32 = vpop.eup %8222  ;;  %8242 = vtanh.f32 %v2998_v7  ;;  %v3105_v34 = vadd.f32 %v3104_v59, %v9667_v23  ;;  %v3106_v35 = vpop.f32.mrb[105].mxu0 }
 0x206   : > { %v8225_v22 = vpop.eup %8224  ;;  %8244 = vtanh.f32 %v3000_v8  ;;  %v3107_v21 = vadd.f32 %v3106_v35, %v9667_v23  ;;  %v3003_v40 = vpop.f32.mrb[92].mxu1 }
 0x207   : > { %v8227_v20 = vpop.eup %8226  ;;  %8246 = vtanh.f32 %v3105_v34  ;;  %v3004_v41 = vadd.f32 %v3003_v40, %v9600_v13  ;;  %v3005_v42 = vpop.f32.mrb[93].mxu1 }
 0x208   : > { %v8229_v9 = vpop.eup %8228  ;;  %8248 = vtanh.f32 %v3107_v21  ;;  %v3006_v17 = vadd.f32 %v3005_v42, %v9600_v13  ;;  %v3110_v43 = vpop.f32.mrb[106].mxu0  ;;  %v7609_v31 = vpack.c.bf16 %v8227_v20, %v8219_v28 }
 0x209   : > { %v8231_v44 = vpop.eup %8230  ;;  %8250 = vtanh.f32 %v3004_v41  ;;  %v3111_v61 = vadd.f32 %v3110_v43, %v9600_v13  ;;  %v3112_v48 = vpop.f32.mrb[107].mxu0  ;;  %v7607_v36 = vpack.c.bf16 %v8229_v9, %v8221_v50 }
 0x20a   : > { %v8233_v60 = vpop.eup %8232  ;;  %8252 = vtanh.f32 %v3006_v17  ;;  %v3113_v0 = vadd.f32 %v3112_v48, %v9600_v13  ;;  %v3009_v30 = vpop.f32.mrb[94].mxu1  ;;  %v7621_v2 = vpack.c.bf16 %v8231_v44, %v8223_v32 }
 0x20b   : > { %v8235_v49 = vpop.eup %8234  ;;  %8254 = vtanh.f32 %v3111_v61  ;;  %v3010_v51 = vadd.f32 %v3009_v30, %v9677_v45  ;;  %v3011_v37 = vpop.f32.mrb[95].mxu1  ;;  %7608 = vmatprep.subr.bf16.mxu0 %v7607_v36  ;;  %v7619_v53 = vpack.c.bf16 %v8233_v60, %v8225_v22 }
 0x20c   : > { %v8237_v55 = vpop.eup %8236  ;;  %8256 = vtanh.f32 %v3113_v0  ;;  %v3012_v14 = vadd.f32 %v3011_v37, %v9677_v45  ;;  %v3116_v54 = vpop.f32.mrb[108].mxu0  ;;  %7610 = vmatpush1.bf16.msra.mxu0 %v7609_v31 }
 0x20d   : > { %v8239_v38 = vpop.eup %8238  ;;  %8258 = vtanh.f32 %v3010_v51  ;;  %v3117_v58 = vadd.f32 %v3116_v54, %v9677_v45  ;;  %v3118_v52 = vpop.f32.mrb[109].mxu0  ;;  %7620 = vmatprep.subr.bf16.mxu1 %v7619_v53 }
 0x20e   : > { %v8241_v62 = vpop.eup %8240  ;;  %8260 = vtanh.f32 %v3012_v14  ;;  %v3119_v63 = vadd.f32 %v3118_v52, %v9677_v45  ;;  %v3015_v18 = vpop.f32.mrb[96].mxu1  ;;  %7622 = vmatpush1.bf16.msra.mxu1 %v7621_v2 }
 0x20f   : > { %v8243_v57 = vpop.eup %8242  ;;  %8262 = vtanh.f32 %v3117_v58  ;;  %v3016_v33 = vadd.f32 %v3015_v18, %v9610_v16  ;;  %v3017_v4 = vpop.f32.mrb[97].mxu1 }
 0x210   : > { %v8245_v5 = vpop.eup %8244  ;;  %8264 = vtanh.f32 %v3119_v63  ;;  %v3018_v15 = vadd.f32 %v3017_v4, %v9610_v16  ;;  %v7613_v24 = vpack.c.bf16 %v8243_v57, %v8235_v49 }
 0x211   : > { %v8247_v27 = vpop.eup %8246  ;;  %v3122_v28 = vpop.f32.mrb[110].mxu0  ;;  %v7611_v7 = vpack.c.bf16 %v8245_v5, %v8237_v55 }
 0x212   : > { %v8249_v56 = vpop.eup %8248  ;;  %8266 = vtanh.f32 %v3018_v15  ;;  %v3123_v50 = vadd.f32 %v3122_v28, %v9610_v16  ;;  %v3124_v8 = vpop.f32.mrb[111].mxu0  ;;  %v7625_v59 = vpack.c.bf16 %v8247_v27, %v8239_v38  ;;  %v10278_v27 = vld [vmem:[%s11682_s5] sm:$0xff] }
 0x213   : > { %v8251_v32 = vpop.eup %8250  ;;  %8268 = vtanh.f32 %v3016_v33  ;;  %v3125_v34 = vadd.f32 %v3124_v8, %v9610_v16  ;;  %v3193_v35 = vpop.f32.mrb[98].mxu1  ;;  %7612 = vmatprep.subr.bf16.mxu0 %v7611_v7  ;;  %v7623_v22 = vpack.c.bf16 %v8249_v56, %v8241_v62 }
 0x214   : > { %v8253_v21 = vpop.eup %8252  ;;  %8270 = vtanh.f32 %v3123_v50  ;;  %v3194_v40 = vadd.f32 %v3193_v35, %v9573_v11  ;;  %v3195_v20 = vpop.f32.mrb[99].mxu1  ;;  %7614 = vmatpush1.bf16.msra.mxu0 %v7613_v24 }
 0x215   : > { %v8255_v41 = vpop.eup %8254  ;;  %8272 = vtanh.f32 %v3125_v34  ;;  %v3196_v42 = vadd.f32 %v3195_v20, %v9573_v11  ;;  %v3300_v9 = vpop.f32.mrb[112].mxu0  ;;  %7624 = vmatprep.subr.bf16.mxu1 %v7623_v22  ;;  %v10293_v20 = vld [vmem:[%s11682_s5 + $0x8] sm:$0xff] }
 0x216   : > { %v8257_v17 = vpop.eup %8256  ;;  %8274 = vtanh.f32 %v3194_v40  ;;  %v3301_v43 = vadd.f32 %v3300_v9, %v9573_v11  ;;  %v3302_v31 = vpop.f32.mrb[113].mxu0  ;;  %7626 = vmatpush1.bf16.msra.mxu1 %v7625_v59 }
 0x217   : > { %v8259_v44 = vpop.eup %8258  ;;  %8276 = vtanh.f32 %v3196_v42  ;;  %v3303_v61 = vadd.f32 %v3302_v31, %v9573_v11  ;;  %v3199_v48 = vpop.f32.mrb[100].mxu1 }
 0x218   : > { %v8261_v36 = vpop.eup %8260  ;;  %8278 = vtanh.f32 %v3301_v43  ;;  %v3200_v60 = vadd.f32 %v3199_v48, %v9655_v46  ;;  %v3201_v0 = vpop.f32.mrb[101].mxu1  ;;  %v7617_v30 = vpack.c.bf16 %v8259_v44, %v8251_v32 }
 0x219   : > { %v8263_v2 = vpop.eup %8262  ;;  %8280 = vtanh.f32 %v3303_v61  ;;  %v3202_v49 = vadd.f32 %v3201_v0, %v9655_v46  ;;  %v3306_v51 = vpop.f32.mrb[114].mxu0  ;;  %v7615_v37 = vpack.c.bf16 %v8261_v36, %v8253_v21 }
 0x21a   : > { %v8265_v53 = vpop.eup %8264  ;;  %8282 = vtanh.f32 %v3200_v60  ;;  %v3307_v55 = vadd.f32 %v3306_v51, %v9655_v46  ;;  %v3308_v14 = vpop.f32.mrb[115].mxu0  ;;  %v7629_v54 = vpack.c.bf16 %v8263_v2, %v8255_v41 }
 0x21b   : > { %8284 = vtanh.f32 %v3202_v49  ;;  %v3309_v38 = vadd.f32 %v3308_v14, %v9655_v46  ;;  %v3205_v58 = vpop.f32.mrb[102].mxu1  ;;  %7616 = vmatprep.subr.bf16.mxu0 %v7615_v37  ;;  %v7627_v52 = vpack.c.bf16 %v8265_v53, %v8257_v17  ;;  %v10311_v53 = vld [vmem:[%s11682_s5 + $0x10] sm:$0xf] }
 0x21c   : > { %v8267_v62 = vpop.eup %8266  ;;  %8286 = vtanh.f32 %v3307_v55  ;;  %v3206_v63 = vadd.f32 %v3205_v58, %v9587_v12  ;;  %v3207_v18 = vpop.f32.mrb[103].mxu1  ;;  %7618 = vmatpush1.bf16.msra.mxu0 %v7617_v30 }
 0x21d   : > { %v8269_v57 = vpop.eup %8268  ;;  %8288 = vtanh.f32 %v3309_v38  ;;  %v3208_v33 = vadd.f32 %v3207_v18, %v9587_v12  ;;  %v3312_v4 = vpop.f32.mrb[116].mxu0  ;;  %7221 = vmatprep.subr.msk.mxu0 %vm1157_vm0, %v8267_v62  ;;  %7628 = vmatprep.subr.bf16.mxu1 %v7627_v52 }
 0x21e   : > { %v8271_v5 = vpop.eup %8270  ;;  %8290 = vtanh.f32 %v3206_v63  ;;  %v3313_v15 = vadd.f32 %v3312_v4, %v9587_v12  ;;  %v3314_v24 = vpop.f32.mrb[117].mxu0  ;;  %7630 = vmatpush1.bf16.msra.mxu1 %v7629_v54 }
 0x21f   : > { %v8273_v28 = vpop.eup %8272  ;;  %8292 = vtanh.f32 %v3208_v33  ;;  %v3315_v7 = vadd.f32 %v3314_v24, %v9587_v12  ;;  %v3211_v56 = vpop.f32.mrb[104].mxu1 }
 0x220   : > { %v8275_v50 = vpop.eup %8274  ;;  %8294 = vtanh.f32 %v3313_v15  ;;  %v3212_v8 = vadd.f32 %v3211_v56, %v9667_v23  ;;  %v3213_v59 = vpop.f32.mrb[105].mxu1  ;;  %7226 = vmatprep.subr.msk.mxu1 %vm1157_vm0, %v8273_v28  ;;  %7222 = vmatpush1.msk.msra.mxu0 %vm1157_vm0, %v8269_v57 }
 0x221   : > { %v8277_v32 = vpop.eup %8276  ;;  %8296 = vtanh.f32 %v3315_v7  ;;  %v3214_v34 = vadd.f32 %v3213_v59, %v9667_v23  ;;  %v3318_v35 = vpop.f32.mrb[118].mxu0  ;;  %7223 = vmatmul.mubr.msk.f32.vlgmr.msra.gmra.mrb[182].mxu0 %vm2816_vm3, %v10278_v27 }
 0x222   : > { %v8279_v22 = vpop.eup %8278  ;;  %8298 = vtanh.f32 %v3212_v8  ;;  %v3319_v21 = vadd.f32 %v3318_v35, %v9667_v23  ;;  %v3320_v40 = vpop.f32.mrb[119].mxu0  ;;  %7227 = vmatpush1.msk.msra.mxu1 %vm1157_vm0, %v8271_v5  ;;  %4647 = vmatprep.mubr.f32.mxu0 %v11688_v6 }
 0x223   : > { %v8281_v41 = vpop.eup %8280  ;;  %8300 = vtanh.f32 %v3214_v34  ;;  %v3321_v42 = vadd.f32 %v3320_v40, %v9667_v23  ;;  %v3217_v9 = vpop.f32.mrb[106].mxu1  ;;  %7228 = vmatmul.mubr.msk.f32.vlgmr.msra.gmra.mrb[182].mxu1 %vm2816_vm3, %v10278_v27 }
 0x224   : > { %v8283_v17 = vpop.eup %8282  ;;  %8302 = vtanh.f32 %v3319_v21  ;;  %v3218_v43 = vadd.f32 %v3217_v9, %v9600_v13  ;;  %v3219_v31 = vpop.f32.mrb[107].mxu1  ;;  %4730 = vmatprep.mubr.f32.mxu1 %v11688_v6 }
 0x225   : > { %v8285_v44 = vpop.eup %8284  ;;  %8304 = vtanh.f32 %v3321_v42  ;;  %v3220_v61 = vadd.f32 %v3219_v31, %v9600_v13  ;;  %v3324_v48 = vpop.f32.mrb[120].mxu0  ;;  %7224 = vmatmul.mubr.msk.f32.gmra.mrb[184].mxu0 %vm2816_vm3, %v10293_v20  ;;  %v7633_v36 = vpack.c.bf16 %v8283_v17, %v8275_v50 }
 0x226   : > { %v8287_v60 = vpop.eup %8286  ;;  %8306 = vtanh.f32 %v3218_v43  ;;  %v3325_v0 = vadd.f32 %v3324_v48, %v9600_v13  ;;  %v3326_v30 = vpop.f32.mrb[121].mxu0  ;;  %v7631_v2 = vpack.c.bf16 %v8285_v44, %v8277_v32  ;;  %4653 = vmatprep.mubr.f32.mxu0 %v11688_v6 }
 0x227   : > { %v8289_v49 = vpop.eup %8288  ;;  %8308 = vtanh.f32 %v3220_v61  ;;  %v3327_v51 = vadd.f32 %v3326_v30, %v9600_v13  ;;  %v3223_v37 = vpop.f32.mrb[108].mxu1  ;;  %7229 = vmatmul.mubr.msk.f32.gmra.mrb[184].mxu1 %vm2816_vm3, %v10293_v20  ;;  %v7645_v55 = vpack.c.bf16 %v8287_v60, %v8279_v22 }
 0x228   : > { %v8291_v14 = vpop.eup %8290  ;;  %8310 = vtanh.f32 %v3325_v0  ;;  %v3224_v54 = vadd.f32 %v3223_v37, %v9677_v45  ;;  %v3225_v38 = vpop.f32.mrb[109].mxu1  ;;  %7632 = vmatprep.subr.bf16.mxu0 %v7631_v2  ;;  %v7643_v58 = vpack.c.bf16 %v8289_v49, %v8281_v41  ;;  %4736 = vmatprep.mubr.f32.mxu1 %v11688_v6 }
 0x229   : > { %v8293_v52 = vpop.eup %8292  ;;  %8312 = vtanh.f32 %v3327_v51  ;;  %v3226_v62 = vadd.f32 %v3225_v38, %v9677_v45  ;;  %v3330_v63 = vpop.f32.mrb[122].mxu0  ;;  %7634 = vmatpush1.bf16.msra.mxu0 %v7633_v36 }
 0x22a   : > { %v8295_v18 = vpop.eup %8294  ;;  %8314 = vtanh.f32 %v3224_v54  ;;  %v3331_v57 = vadd.f32 %v3330_v63, %v9677_v45  ;;  %v3332_v33 = vpop.f32.mrb[123].mxu0  ;;  %7225 = vmatmul.mubr.msk.f32.gmra.mrb[186].mxu0 %vm2816_vm3, %v10311_v53  ;;  %7644 = vmatprep.subr.bf16.mxu1 %v7643_v58 }
 0x22b   : > { %v8297_v4 = vpop.eup %8296  ;;  %8316 = vtanh.f32 %v3226_v62  ;;  %v3333_v5 = vadd.f32 %v3332_v33, %v9677_v45  ;;  %v3229_v15 = vpop.f32.mrb[110].mxu1  ;;  %7646 = vmatpush1.bf16.msra.mxu1 %v7645_v55  ;;  %4807 = vmatprep.mubr.f32.mxu0 %v11688_v6 }
 0x22c   : > { %v8299_v24 = vpop.eup %8298  ;;  %8318 = vtanh.f32 %v3331_v57  ;;  %v3230_v28 = vadd.f32 %v3229_v15, %v9610_v16  ;;  %v3231_v7 = vpop.f32.mrb[111].mxu1  ;;  %7230 = vmatmul.mubr.msk.f32.gmra.mrb[186].mxu1 %vm2816_vm3, %v10311_v53 }
 0x22d   : > { %v8301_v56 = vpop.eup %8300  ;;  %8320 = vtanh.f32 %v3333_v5  ;;  %v3232_v50 = vadd.f32 %v3231_v7, %v9610_v16  ;;  %v3336_v8 = vpop.f32.mrb[124].mxu0  ;;  %v7637_v59 = vpack.c.bf16 %v8299_v24, %v8291_v14  ;;  %4890 = vmatprep.mubr.f32.mxu1 %v11688_v6 }
 0x22e   : > { %v8303_v32 = vpop.eup %8302  ;;  %8322 = vtanh.f32 %v3230_v28  ;;  %v3337_v34 = vadd.f32 %v3336_v8, %v9610_v16  ;;  %v3338_v35 = vpop.f32.mrb[125].mxu0  ;;  %v7635_v22 = vpack.c.bf16 %v8301_v56, %v8293_v52 }
 0x22f   : > { %v8305_v21 = vpop.eup %8304  ;;  %8324 = vtanh.f32 %v3232_v50  ;;  %v3339_v40 = vadd.f32 %v3338_v35, %v9610_v16  ;;  %v3407_v41 = vpop.f32.mrb[112].mxu1  ;;  %v7649_v42 = vpack.c.bf16 %v8303_v32, %v8295_v18 }
 0x230   : > { %v8307_v9 = vpop.eup %8306  ;;  %8326 = vtanh.f32 %v3337_v34  ;;  %v3408_v17 = vadd.f32 %v3407_v41, %v9573_v11  ;;  %v3409_v43 = vpop.f32.mrb[113].mxu1  ;;  %7636 = vmatprep.subr.bf16.mxu0 %v7635_v22  ;;  %v7647_v31 = vpack.c.bf16 %v8305_v21, %v8297_v4 }
 0x231   : > { %v8309_v44 = vpop.eup %8308  ;;  %8328 = vtanh.f32 %v3339_v40  ;;  %v3410_v61 = vadd.f32 %v3409_v43, %v9573_v11  ;;  %v3514_v48 = vpop.f32.mrb[126].mxu0  ;;  %7638 = vmatpush1.bf16.msra.mxu0 %v7637_v59 }
 0x232   : > { %v8311_v36 = vpop.eup %8310  ;;  %8330 = vtanh.f32 %v3408_v17  ;;  %v3515_v60 = vadd.f32 %v3514_v48, %v9573_v11  ;;  %v3516_v0 = vpop.f32.mrb[127].mxu0  ;;  %7648 = vmatprep.subr.bf16.mxu1 %v7647_v31 }
 0x233   : > { %v8313_v30 = vpop.eup %8312  ;;  %8332 = vtanh.f32 %v3410_v61  ;;  %v3517_v2 = vadd.f32 %v3516_v0, %v9573_v11  ;;  %v3413_v49 = vpop.f32.mrb[114].mxu1  ;;  %7650 = vmatpush1.bf16.msra.mxu1 %v7649_v42 }
 0x234   : > { %v8315_v51 = vpop.eup %8314  ;;  %8334 = vtanh.f32 %v3515_v60  ;;  %v3414_v37 = vadd.f32 %v3413_v49, %v9655_v46  ;;  %v3415_v55 = vpop.f32.mrb[115].mxu1 }
 0x235   : > { %v8317_v14 = vpop.eup %8316  ;;  %8336 = vtanh.f32 %v3517_v2  ;;  %v3416_v54 = vadd.f32 %v3415_v55, %v9655_v46  ;;  %v3520_v38 = vpop.f32.mrb[128].mxu0  ;;  %v7641_v58 = vpack.c.bf16 %v8315_v51, %v8307_v9 }
 0x236   : > { %v8319_v52 = vpop.eup %8318  ;;  %8338 = vtanh.f32 %v3414_v37  ;;  %v3521_v62 = vadd.f32 %v3520_v38, %v9655_v46  ;;  %v3522_v63 = vpop.f32.mrb[129].mxu0  ;;  %v7639_v18 = vpack.c.bf16 %v8317_v14, %v8309_v44 }
 0x237   : > { %v8321_v57 = vpop.eup %8320  ;;  %8340 = vtanh.f32 %v3416_v54  ;;  %v3523_v33 = vadd.f32 %v3522_v63, %v9655_v46  ;;  %v3419_v4 = vpop.f32.mrb[116].mxu1  ;;  %v7653_v5 = vpack.c.bf16 %v8319_v52, %v8311_v36 }
 0x238   : > { %v8323_v15 = vpop.eup %8322  ;;  %8342 = vtanh.f32 %v3521_v62  ;;  %v3420_v24 = vadd.f32 %v3419_v4, %v9587_v12  ;;  %v3421_v28 = vpop.f32.mrb[117].mxu1  ;;  %7640 = vmatprep.subr.bf16.mxu0 %v7639_v18  ;;  %v7651_v7 = vpack.c.bf16 %v8321_v57, %v8313_v30 }
 0x239   : > { %v8325_v56 = vpop.eup %8324  ;;  %v10337_v50 = vpop.permute.xlu1 %490  ;;  %8344 = vtanh.f32 %v3523_v33  ;;  %v3422_v8 = vadd.f32 %v3421_v28, %v9587_v12  ;;  %7642 = vmatpush1.bf16.msra.mxu0 %v7641_v58 }
 0x23a   : > { %v3526_v59 = vpop.f32.mrb[130].mxu0  ;;  %v8327_v32 = vpop.eup %8326  ;;  %8346 = vtanh.f32 %v3420_v24  ;;  %7231 = vmatprep.subr.msk.mxu0 %vm1157_vm0, %v8325_v56  ;;  %7652 = vmatprep.subr.bf16.mxu1 %v7651_v7 }
 0x23b   : > { %v3527_v34 = vadd.f32 %v3526_v59, %v9587_v12  ;;  %v3528_v35 = vpop.f32.mrb[131].mxu0  ;;  %v8329_v22 = vpop.eup %8328  ;;  %8348 = vtanh.f32 %v3422_v8  ;;  %7654 = vmatpush1.bf16.msra.mxu1 %v7653_v5 }
 0x23c   : > { %v3529_v21 = vadd.f32 %v3528_v35, %v9587_v12  ;;  %v3425_v40 = vpop.f32.mrb[118].mxu1  ;;  %v8331_v41 = vpop.eup %8330  ;;  %7236 = vmatprep.subr.msk.mxu1 %vm1157_vm0, %v8329_v22 }
 0x23d   : > { %8350 = vtanh.f32 %v3527_v34  ;;  %v3426_v42 = vadd.f32 %v3425_v40, %v9667_v23  ;;  %v3427_v9 = vpop.f32.mrb[119].mxu1  ;;  %v8333_v17 = vpop.eup %8332  ;;  %7232 = vmatpush1.msk.msra.mxu0 %vm1157_vm0, %v8323_v15 }
 0x23e   : > { %8352 = vtanh.f32 %v3529_v21  ;;  %v3428_v43 = vadd.f32 %v3427_v9, %v9667_v23  ;;  %v3532_v31 = vpop.f32.mrb[132].mxu0  ;;  %v8335_v44 = vpop.eup %8334  ;;  %7233 = vmatmul.mubr.msk.f32.vlgmr.msra.gmra.mrb[188].mxu0 %vm2816_vm3, %v10278_v27 }
 0x23f   : > { %8354 = vtanh.f32 %v3426_v42  ;;  %v3533_v61 = vadd.f32 %v3532_v31, %v9667_v23  ;;  %v3534_v48 = vpop.f32.mrb[133].mxu0  ;;  %v8337_v36 = vpop.eup %8336  ;;  %7237 = vmatpush1.msk.msra.mxu1 %vm1157_vm0, %v8327_v32  ;;  %4813 = vmatprep.mubr.f32.mxu0 %v11688_v6 }
 0x240   : > { %v10350_v60 = vpop.permute.xlu1 %494  ;;  %8356 = vtanh.f32 %v3428_v43  ;;  %v3535_v0 = vadd.f32 %v3534_v48, %v9667_v23  ;;  %v3431_v30 = vpop.f32.mrb[120].mxu1  ;;  %7238 = vmatmul.mubr.msk.f32.vlgmr.msra.gmra.mrb[188].mxu1 %vm2816_vm3, %v10278_v27 }
 0x241   : > { %v8339_v2 = vpop.eup %8338  ;;  %8358 = vtanh.f32 %v3533_v61  ;;  %v3432_v49 = vadd.f32 %v3431_v30, %v9600_v13  ;;  %v3433_v51 = vpop.f32.mrb[121].mxu1  ;;  %4896 = vmatprep.mubr.f32.mxu1 %v11688_v6 }
 0x242   : > { %v8341_v37 = vpop.eup %8340  ;;  %8360 = vtanh.f32 %v3535_v0  ;;  %v3434_v55 = vadd.f32 %v3433_v51, %v9600_v13  ;;  %v3538_v14 = vpop.f32.mrb[134].mxu0  ;;  %v7657_v54 = vpack.c.bf16 %v8339_v2, %v8331_v41  ;;  %7234 = vmatmul.mubr.msk.f32.gmra.mrb[190].mxu0 %vm2816_vm3, %v10293_v20 }
 0x243   : > { %v8343_v38 = vpop.eup %8342  ;;  %8362 = vtanh.f32 %v3432_v49  ;;  %v3539_v58 = vadd.f32 %v3538_v14, %v9600_v13  ;;  %v3540_v52 = vpop.f32.mrb[135].mxu0  ;;  %v7655_v62 = vpack.c.bf16 %v8341_v37, %v8333_v17  ;;  %4819 = vmatprep.mubr.f32.mxu0 %v11688_v6 }
 0x244   : > { %v8345_v63 = vpop.eup %8344  ;;  %8364 = vtanh.f32 %v3434_v55  ;;  %v3541_v18 = vadd.f32 %v3540_v52, %v9600_v13  ;;  %v3437_v57 = vpop.f32.mrb[122].mxu1  ;;  %v7669_v33 = vpack.c.bf16 %v8343_v38, %v8335_v44  ;;  %7239 = vmatmul.mubr.msk.f32.gmra.mrb[190].mxu1 %vm2816_vm3, %v10293_v20 }
 0x245   : > { %v8347_v4 = vpop.eup %8346  ;;  %8366 = vtanh.f32 %v3539_v58  ;;  %v3438_v5 = vadd.f32 %v3437_v57, %v9677_v45  ;;  %v3439_v15 = vpop.f32.mrb[123].mxu1  ;;  %7656 = vmatprep.subr.bf16.mxu0 %v7655_v62  ;;  %v7667_v24 = vpack.c.bf16 %v8345_v63, %v8337_v36  ;;  %4902 = vmatprep.mubr.f32.mxu1 %v11688_v6 }
 0x246   : > { %v8349_v28 = vpop.eup %8348  ;;  %v10368_v7 = vpop.permute.xlu1 %498  ;;  %8368 = vtanh.f32 %v3541_v18  ;;  %v3440_v56 = vadd.f32 %v3439_v15, %v9677_v45  ;;  %7658 = vmatpush1.bf16.msra.mxu0 %v7657_v54 }
 0x247   : > { %v3544_v8 = vpop.f32.mrb[136].mxu0  ;;  %v8351_v59 = vpop.eup %8350  ;;  %8370 = vtanh.f32 %v3438_v5  ;;  %7235 = vmatmul.mubr.msk.f32.gmra.mrb[192].mxu0 %vm2816_vm3, %v10311_v53  ;;  %7668 = vmatprep.subr.bf16.mxu1 %v7667_v24 }
 0x248   : > { %v3545_v32 = vadd.f32 %v3544_v8, %v9677_v45  ;;  %v3546_v34 = vpop.f32.mrb[137].mxu0  ;;  %v8353_v35 = vpop.eup %8352  ;;  %8372 = vtanh.f32 %v3440_v56  ;;  %7670 = vmatpush1.bf16.msra.mxu1 %v7669_v33  ;;  %4973 = vmatprep.mubr.f32.mxu0 %v11688_v6 }
 0x249   : > { %v3547_v22 = vadd.f32 %v3546_v34, %v9677_v45  ;;  %v3443_v21 = vpop.f32.mrb[124].mxu1  ;;  %v8355_v40 = vpop.eup %8354  ;;  %7240 = vmatmul.mubr.msk.f32.gmra.mrb[192].mxu1 %vm2816_vm3, %v10311_v53 }
 0x24a   : > { %8374 = vtanh.f32 %v3545_v32  ;;  %v3444_v41 = vadd.f32 %v3443_v21, %v9610_v16  ;;  %v3445_v42 = vpop.f32.mrb[125].mxu1  ;;  %v8357_v9 = vpop.eup %8356  ;;  %v7661_v31 = vpack.c.bf16 %v8355_v40, %v8347_v4  ;;  %5056 = vmatprep.mubr.f32.mxu1 %v11688_v6 }
 0x24b   : > { %8376 = vtanh.f32 %v3547_v22  ;;  %v3446_v17 = vadd.f32 %v3445_v42, %v9610_v16  ;;  %v3550_v43 = vpop.f32.mrb[138].mxu0  ;;  %v8359_v44 = vpop.eup %8358  ;;  %v7659_v36 = vpack.c.bf16 %v8357_v9, %v8349_v28 }
 0x24c   : > { %8378 = vtanh.f32 %v3444_v41  ;;  %v3551_v61 = vadd.f32 %v3550_v43, %v9610_v16  ;;  %v3552_v48 = vpop.f32.mrb[139].mxu0  ;;  %v8361_v0 = vpop.eup %8360  ;;  %v7673_v51 = vpack.c.bf16 %v8359_v44, %v8351_v59 }
 0x24d   : > { %v10383_v30 = vpop.permute.xlu1 %502  ;;  %8380 = vtanh.f32 %v3446_v17  ;;  %v3553_v2 = vadd.f32 %v3552_v48, %v9610_v16  ;;  %v3621_v49 = vpop.f32.mrb[126].mxu1  ;;  %7660 = vmatprep.subr.bf16.mxu0 %v7659_v36  ;;  %v7671_v54 = vpack.c.bf16 %v8361_v0, %v8353_v35 }
 0x24e   : > { %v8363_v37 = vpop.eup %8362  ;;  %8382 = vtanh.f32 %v3551_v61  ;;  %v3622_v55 = vadd.f32 %v3621_v49, %v9573_v11  ;;  %v3623_v14 = vpop.f32.mrb[127].mxu1  ;;  %7662 = vmatpush1.bf16.msra.mxu0 %v7661_v31 }
 0x24f   : > { %v8365_v38 = vpop.eup %8364  ;;  %8384 = vtanh.f32 %v3553_v2  ;;  %v3624_v58 = vadd.f32 %v3623_v14, %v9573_v11  ;;  %v3728_v52 = vpop.f32.mrb[140].mxu0  ;;  %7672 = vmatprep.subr.bf16.mxu1 %v7671_v54 }
 0x250   : > { %v8367_v62 = vpop.eup %8366  ;;  %8386 = vtanh.f32 %v3622_v55  ;;  %v3729_v63 = vadd.f32 %v3728_v52, %v9573_v11  ;;  %v3730_v18 = vpop.f32.mrb[141].mxu0  ;;  %7674 = vmatpush1.bf16.msra.mxu1 %v7673_v51 }
 0x251   : > { %v8369_v57 = vpop.eup %8368  ;;  %8388 = vtanh.f32 %v3624_v58  ;;  %v3731_v33 = vadd.f32 %v3730_v18, %v9573_v11  ;;  %v3627_v4 = vpop.f32.mrb[128].mxu1 }
 0x252   : > { %v8371_v5 = vpop.eup %8370  ;;  %8390 = vtanh.f32 %v3729_v63  ;;  %v3628_v15 = vadd.f32 %v3627_v4, %v9655_v46  ;;  %v3629_v24 = vpop.f32.mrb[129].mxu1 }
 0x253   : > { %v8373_v28 = vpop.eup %8372  ;;  %v10391_v56 = vpop.permute.xlu1 %506  ;;  %8392 = vtanh.f32 %v3731_v33  ;;  %v3630_v8 = vadd.f32 %v3629_v24, %v9655_v46  ;;  %v7665_v32 = vpack.c.bf16 %v8371_v5, %v8363_v37 }
 0x254   : > { %v3734_v59 = vpop.f32.mrb[142].mxu0  ;;  %v8375_v34 = vpop.eup %8374  ;;  %8394 = vtanh.f32 %v3628_v15  ;;  %v7663_v21 = vpack.c.bf16 %v8373_v28, %v8365_v38 }
 0x255   : > { %v3735_v35 = vadd.f32 %v3734_v59, %v9655_v46  ;;  %v3736_v22 = vpop.f32.mrb[143].mxu0  ;;  %v8377_v40 = vpop.eup %8376  ;;  %8396 = vtanh.f32 %v3630_v8  ;;  %v7677_v9 = vpack.c.bf16 %v8375_v34, %v8367_v62 }
 0x256   : > { %v3737_v41 = vadd.f32 %v3736_v22, %v9655_v46  ;;  %v3633_v42 = vpop.f32.mrb[130].mxu1  ;;  %v8379_v17 = vpop.eup %8378  ;;  %7664 = vmatprep.subr.bf16.mxu0 %v7663_v21  ;;  %v7675_v44 = vpack.c.bf16 %v8377_v40, %v8369_v57 }
 0x257   : > { %8398 = vtanh.f32 %v3735_v35  ;;  %v3634_v43 = vadd.f32 %v3633_v42, %v9587_v12  ;;  %v3635_v31 = vpop.f32.mrb[131].mxu1  ;;  %v8381_v61 = vpop.eup %8380  ;;  %7666 = vmatpush1.bf16.msra.mxu0 %v7665_v32 }
 0x258   : > { %8400 = vtanh.f32 %v3737_v41  ;;  %v3636_v48 = vadd.f32 %v3635_v31, %v9587_v12  ;;  %v3740_v36 = vpop.f32.mrb[144].mxu0  ;;  %v8383_v0 = vpop.eup %8382  ;;  %7241 = vmatprep.subr.msk.mxu0 %vm1157_vm0, %v8381_v61  ;;  %7676 = vmatprep.subr.bf16.mxu1 %v7675_v44 }
 0x259   : > { %8402 = vtanh.f32 %v3634_v43  ;;  %v3741_v2 = vadd.f32 %v3740_v36, %v9587_v12  ;;  %v3742_v49 = vpop.f32.mrb[145].mxu0  ;;  %v8385_v51 = vpop.eup %8384  ;;  %7678 = vmatpush1.bf16.msra.mxu1 %v7677_v9 }
 0x25a   : > { %v10400_v37 = vpop.permute.xlu1 %510  ;;  %8404 = vtanh.f32 %v3636_v48  ;;  %v3743_v55 = vadd.f32 %v3742_v49, %v9587_v12  ;;  %v3639_v14 = vpop.f32.mrb[132].mxu1  ;;  %7246 = vmatprep.subr.msk.mxu1 %vm1157_vm0, %v8385_v51 }
 0x25b   : > { %v8387_v54 = vpop.eup %8386  ;;  %8406 = vtanh.f32 %v3741_v2  ;;  %v3640_v38 = vadd.f32 %v3639_v14, %v9667_v23  ;;  %v3641_v58 = vpop.f32.mrb[133].mxu1  ;;  %7242 = vmatpush1.msk.msra.mxu0 %vm1157_vm0, %v8379_v17 }
 0x25c   : > { %v8389_v52 = vpop.eup %8388  ;;  %8408 = vtanh.f32 %v3743_v55  ;;  %v3642_v62 = vadd.f32 %v3641_v58, %v9667_v23  ;;  %v3746_v63 = vpop.f32.mrb[146].mxu0  ;;  %7243 = vmatmul.mubr.msk.f32.vlgmr.msra.gmra.mrb[194].mxu0 %vm2816_vm3, %v10278_v27 }
 0x25d   : > { %v8391_v18 = vpop.eup %8390  ;;  %8410 = vtanh.f32 %v3640_v38  ;;  %v3747_v57 = vadd.f32 %v3746_v63, %v9667_v23  ;;  %v3748_v33 = vpop.f32.mrb[147].mxu0  ;;  %7247 = vmatpush1.msk.msra.mxu1 %vm1157_vm0, %v8383_v0  ;;  %4979 = vmatprep.mubr.f32.mxu0 %v11688_v6 }
 0x25e   : > { %v8393_v4 = vpop.eup %8392  ;;  %8412 = vtanh.f32 %v3642_v62  ;;  %v3749_v5 = vadd.f32 %v3748_v33, %v9667_v23  ;;  %v3645_v15 = vpop.f32.mrb[134].mxu1  ;;  %7248 = vmatmul.mubr.msk.f32.vlgmr.msra.gmra.mrb[194].mxu1 %vm2816_vm3, %v10278_v27 }
 0x25f   : > { %v8395_v24 = vpop.eup %8394  ;;  %8414 = vtanh.f32 %v3747_v57  ;;  %v3646_v28 = vadd.f32 %v3645_v15, %v9600_v13  ;;  %v3647_v8 = vpop.f32.mrb[135].mxu1  ;;  %5062 = vmatprep.mubr.f32.mxu1 %v11688_v6 }
 0x260   : > { %v8397_v59 = vpop.eup %8396  ;;  %v10416_v32 = vpop.permute.xlu1 %514  ;;  %8416 = vtanh.f32 %v3749_v5  ;;  %v3648_v34 = vadd.f32 %v3647_v8, %v9600_v13  ;;  %v7681_v22 = vpack.c.bf16 %v8395_v24, %v8387_v54  ;;  %7244 = vmatmul.mubr.msk.f32.gmra.mrb[196].mxu0 %vm2816_vm3, %v10293_v20 }
 0x261   : > { %v3752_v35 = vpop.f32.mrb[148].mxu0  ;;  %v8399_v21 = vpop.eup %8398  ;;  %8418 = vtanh.f32 %v3646_v28  ;;  %v7679_v42 = vpack.c.bf16 %v8397_v59, %v8389_v52  ;;  %4985 = vmatprep.mubr.f32.mxu0 %v11688_v6 }
 0x262   : > { %v3753_v40 = vadd.f32 %v3752_v35, %v9600_v13  ;;  %v3754_v41 = vpop.f32.mrb[149].mxu0  ;;  %v8401_v9 = vpop.eup %8400  ;;  %8420 = vtanh.f32 %v3648_v34  ;;  %v7693_v31 = vpack.c.bf16 %v8399_v21, %v8391_v18  ;;  %7249 = vmatmul.mubr.msk.f32.gmra.mrb[196].mxu1 %vm2816_vm3, %v10293_v20 }
 0x263   : > { %v3755_v17 = vadd.f32 %v3754_v41, %v9600_v13  ;;  %v3651_v43 = vpop.f32.mrb[136].mxu1  ;;  %v8403_v44 = vpop.eup %8402  ;;  %7680 = vmatprep.subr.bf16.mxu0 %v7679_v42  ;;  %v7691_v36 = vpack.c.bf16 %v8401_v9, %v8393_v4  ;;  %5068 = vmatprep.mubr.f32.mxu1 %v11688_v6 }
 0x264   : > { %8422 = vtanh.f32 %v3753_v40  ;;  %v3652_v61 = vadd.f32 %v3651_v43, %v9677_v45  ;;  %v3653_v48 = vpop.f32.mrb[137].mxu1  ;;  %v8405_v0 = vpop.eup %8404  ;;  %7682 = vmatpush1.bf16.msra.mxu0 %v7681_v22 }
 0x265   : > { %8424 = vtanh.f32 %v3755_v17  ;;  %v3654_v2 = vadd.f32 %v3653_v48, %v9677_v45  ;;  %v3758_v49 = vpop.f32.mrb[150].mxu0  ;;  %v8407_v51 = vpop.eup %8406  ;;  %7245 = vmatmul.mubr.msk.f32.gmra.mrb[198].mxu0 %vm2816_vm3, %v10311_v53  ;;  %7692 = vmatprep.subr.bf16.mxu1 %v7691_v36 }
 0x266   : > { %8426 = vtanh.f32 %v3652_v61  ;;  %v3759_v55 = vadd.f32 %v3758_v49, %v9677_v45  ;;  %v3760_v14 = vpop.f32.mrb[151].mxu0  ;;  %v8409_v54 = vpop.eup %8408  ;;  %7694 = vmatpush1.bf16.msra.mxu1 %v7693_v31  ;;  %5139 = vmatprep.mubr.f32.mxu0 %v11688_v6 }
 0x267   : > { %v10433_v38 = vpop.permute.xlu1 %518  ;;  %8428 = vtanh.f32 %v3654_v2  ;;  %v3761_v58 = vadd.f32 %v3760_v14, %v9677_v45  ;;  %v3657_v52 = vpop.f32.mrb[138].mxu1  ;;  %7250 = vmatmul.mubr.msk.f32.gmra.mrb[198].mxu1 %vm2816_vm3, %v10311_v53 }
 0x268   : > { %v8411_v62 = vpop.eup %8410  ;;  %8430 = vtanh.f32 %v3759_v55  ;;  %v3658_v63 = vadd.f32 %v3657_v52, %v9610_v16  ;;  %v3659_v18 = vpop.f32.mrb[139].mxu1  ;;  %5222 = vmatprep.mubr.f32.mxu1 %v11688_v6 }
 0x269   : > { %v8413_v57 = vpop.eup %8412  ;;  %8432 = vtanh.f32 %v3761_v58  ;;  %v3660_v33 = vadd.f32 %v3659_v18, %v9610_v16  ;;  %v3764_v4 = vpop.f32.mrb[152].mxu0  ;;  %v7685_v5 = vpack.c.bf16 %v8411_v62, %v8403_v44 }
 0x26a   : > { %v8415_v15 = vpop.eup %8414  ;;  %8434 = vtanh.f32 %v3658_v63  ;;  %v3765_v24 = vadd.f32 %v3764_v4, %v9610_v16  ;;  %v3766_v28 = vpop.f32.mrb[153].mxu0  ;;  %v7683_v8 = vpack.c.bf16 %v8413_v57, %v8405_v0 }
 0x26b   : > { %v8417_v59 = vpop.eup %8416  ;;  %8436 = vtanh.f32 %v3660_v33  ;;  %v3767_v34 = vadd.f32 %v3766_v28, %v9610_v16  ;;  %v3835_v35 = vpop.f32.mrb[140].mxu1  ;;  %v7697_v22 = vpack.c.bf16 %v8415_v15, %v8407_v51 }
 0x26c   : > { %v8419_v21 = vpop.eup %8418  ;;  %8438 = vtanh.f32 %v3765_v24  ;;  %v3836_v40 = vadd.f32 %v3835_v35, %v9573_v11  ;;  %v3837_v41 = vpop.f32.mrb[141].mxu1  ;;  %7684 = vmatprep.subr.bf16.mxu0 %v7683_v8  ;;  %v7695_v42 = vpack.c.bf16 %v8417_v59, %v8409_v54 }
 0x26d   : > { %v8421_v9 = vpop.eup %8420  ;;  %v10445_v17 = vpop.permute.xlu1 %522  ;;  %8440 = vtanh.f32 %v3767_v34  ;;  %v3838_v43 = vadd.f32 %v3837_v41, %v9573_v11  ;;  %7686 = vmatpush1.bf16.msra.mxu0 %v7685_v5 }
 0x26e   : > { %v3942_v31 = vpop.f32.mrb[154].mxu0  ;;  %v8423_v44 = vpop.eup %8422  ;;  %8442 = vtanh.f32 %v3836_v40  ;;  %7696 = vmatprep.subr.bf16.mxu1 %v7695_v42 }
 0x26f   : > { %v3943_v61 = vadd.f32 %v3942_v31, %v9573_v11  ;;  %v3944_v48 = vpop.f32.mrb[155].mxu0  ;;  %v8425_v36 = vpop.eup %8424  ;;  %8444 = vtanh.f32 %v3838_v43  ;;  %7698 = vmatpush1.bf16.msra.mxu1 %v7697_v22 }
 0x270   : > { %v3945_v0 = vadd.f32 %v3944_v48, %v9573_v11  ;;  %v3841_v2 = vpop.f32.mrb[142].mxu1  ;;  %v8427_v49 = vpop.eup %8426 }
 0x271   : > { %8446 = vtanh.f32 %v3943_v61  ;;  %v3842_v51 = vadd.f32 %v3841_v2, %v9655_v46  ;;  %v3843_v55 = vpop.f32.mrb[143].mxu1  ;;  %v8429_v14 = vpop.eup %8428  ;;  %v7689_v52 = vpack.c.bf16 %v8427_v49, %v8419_v21 }
 0x272   : > { %8448 = vtanh.f32 %v3945_v0  ;;  %v3844_v54 = vadd.f32 %v3843_v55, %v9655_v46  ;;  %v3948_v58 = vpop.f32.mrb[156].mxu0  ;;  %v8431_v62 = vpop.eup %8430  ;;  %v7687_v57 = vpack.c.bf16 %v8429_v14, %v8421_v9 }
 0x273   : > { %8450 = vtanh.f32 %v3842_v51  ;;  %v3949_v63 = vadd.f32 %v3948_v58, %v9655_v46  ;;  %v3950_v18 = vpop.f32.mrb[157].mxu0  ;;  %v8433_v33 = vpop.eup %8432  ;;  %v7701_v24 = vpack.c.bf16 %v8431_v62, %v8423_v44 }
 0x274   : > { %v10453_v4 = vpop.permute.xlu1 %526  ;;  %8452 = vtanh.f32 %v3844_v54  ;;  %v3951_v5 = vadd.f32 %v3950_v18, %v9655_v46  ;;  %v3847_v15 = vpop.f32.mrb[144].mxu1  ;;  %7688 = vmatprep.subr.bf16.mxu0 %v7687_v57  ;;  %v7699_v34 = vpack.c.bf16 %v8433_v33, %v8425_v36 }
 0x275   : > { %v8435_v28 = vpop.eup %8434  ;;  %8454 = vtanh.f32 %v3949_v63  ;;  %v3848_v8 = vadd.f32 %v3847_v15, %v9587_v12  ;;  %v3849_v59 = vpop.f32.mrb[145].mxu1  ;;  %7690 = vmatpush1.bf16.msra.mxu0 %v7689_v52 }
 0x276   : > { %v8437_v35 = vpop.eup %8436  ;;  %8456 = vtanh.f32 %v3951_v5  ;;  %v3850_v22 = vadd.f32 %v3849_v59, %v9587_v12  ;;  %v3954_v21 = vpop.f32.mrb[158].mxu0  ;;  %7700 = vmatprep.subr.bf16.mxu1 %v7699_v34 }
 0x277   : > { %v8439_v40 = vpop.eup %8438  ;;  %8458 = vtanh.f32 %v3848_v8  ;;  %v3955_v41 = vadd.f32 %v3954_v21, %v9587_v12  ;;  %v3956_v42 = vpop.f32.mrb[159].mxu0  ;;  %7251 = vmatprep.subr.msk.mxu0 %vm1157_vm0, %v8437_v35  ;;  %7702 = vmatpush1.bf16.msra.mxu1 %v7701_v24 }
 0x278   : > { %v8441_v9 = vpop.eup %8440  ;;  %8460 = vtanh.f32 %v3850_v22  ;;  %v3957_v43 = vadd.f32 %v3956_v42, %v9587_v12  ;;  %v3853_v31 = vpop.f32.mrb[146].mxu1 }
 0x279   : > { %v8443_v44 = vpop.eup %8442  ;;  %8462 = vtanh.f32 %v3955_v41  ;;  %v3854_v61 = vadd.f32 %v3853_v31, %v9667_v23  ;;  %v3855_v48 = vpop.f32.mrb[147].mxu1  ;;  %7256 = vmatprep.subr.msk.mxu1 %vm1157_vm0, %v8441_v9  ;;  %7252 = vmatpush1.msk.msra.mxu0 %vm1157_vm0, %v8435_v28 }
 0x27a   : > { %v8445_v36 = vpop.eup %8444  ;;  %v10463_v0 = vpop.permute.xlu1 %530  ;;  %8464 = vtanh.f32 %v3957_v43  ;;  %v3856_v2 = vadd.f32 %v3855_v48, %v9667_v23  ;;  %7253 = vmatmul.mubr.msk.f32.vlgmr.msra.gmra.mrb[200].mxu0 %vm2816_vm3, %v10278_v27 }
 0x27b   : > { %11735 = vst [vmem:[#allocation8_spill] sm:$0xff] %v10463_v0  ;;  %v3960_v49 = vpop.f32.mrb[160].mxu0  ;;  %v8447_v51 = vpop.eup %8446  ;;  %8466 = vtanh.f32 %v3854_v61  ;;  %7257 = vmatpush1.msk.msra.mxu1 %vm1157_vm0, %v8439_v40  ;;  %5145 = vmatprep.mubr.f32.mxu0 %v11688_v6 }
 0x27c   : > { %v3961_v55 = vadd.f32 %v3960_v49, %v9667_v23  ;;  %v3962_v14 = vpop.f32.mrb[161].mxu0  ;;  %v8449_v54 = vpop.eup %8448  ;;  %8468 = vtanh.f32 %v3856_v2  ;;  %7258 = vmatmul.mubr.msk.f32.vlgmr.msra.gmra.mrb[200].mxu1 %vm2816_vm3, %v10278_v27 }
 0x27d   : > { %v3963_v58 = vadd.f32 %v3962_v14, %v9667_v23  ;;  %v3859_v52 = vpop.f32.mrb[148].mxu1  ;;  %v8451_v62 = vpop.eup %8450  ;;  %5228 = vmatprep.mubr.f32.mxu1 %v11688_v6 }
 0x27e   : > { %8470 = vtanh.f32 %v3961_v55  ;;  %v3860_v63 = vadd.f32 %v3859_v52, %v9600_v13  ;;  %v3861_v18 = vpop.f32.mrb[149].mxu1  ;;  %v8453_v57 = vpop.eup %8452  ;;  %v7705_v15 = vpack.c.bf16 %v8451_v62, %v8443_v44  ;;  %7254 = vmatmul.mubr.msk.f32.gmra.mrb[202].mxu0 %vm2816_vm3, %v10293_v20 }
 0x27f   : > { %8472 = vtanh.f32 %v3963_v58  ;;  %v3862_v33 = vadd.f32 %v3861_v18, %v9600_v13  ;;  %v3966_v5 = vpop.f32.mrb[162].mxu0  ;;  %v8455_v24 = vpop.eup %8454  ;;  %v7703_v59 = vpack.c.bf16 %v8453_v57, %v8445_v36  ;;  %5151 = vmatprep.mubr.f32.mxu0 %v11688_v6 }
 0x280   : > { %8474 = vtanh.f32 %v3860_v63  ;;  %v3967_v28 = vadd.f32 %v3966_v5, %v9600_v13  ;;  %v3968_v8 = vpop.f32.mrb[163].mxu0  ;;  %v8457_v34 = vpop.eup %8456  ;;  %v7717_v21 = vpack.c.bf16 %v8455_v24, %v8447_v51  ;;  %7259 = vmatmul.mubr.msk.f32.gmra.mrb[202].mxu1 %vm2816_vm3, %v10293_v20 }
 0x281   : > { %v10481_v35 = vpop.permute.xlu1 %562  ;;  %8476 = vtanh.f32 %v3862_v33  ;;  %v3969_v27 = vadd.f32 %v3968_v8, %v9600_v13  ;;  %v3865_v22 = vpop.f32.mrb[150].mxu1  ;;  %7704 = vmatprep.subr.bf16.mxu0 %v7703_v59  ;;  %v7715_v9 = vpack.c.bf16 %v8457_v34, %v8449_v54  ;;  %5234 = vmatprep.mubr.f32.mxu1 %v11688_v6 }
 0x282   : > { %11736 = vst [vmem:[#allocation9_spill] sm:$0xff] %v10481_v35  ;;  %v8459_v40 = vpop.eup %8458  ;;  %8478 = vtanh.f32 %v3967_v28  ;;  %v3866_v41 = vadd.f32 %v3865_v22, %v9677_v45  ;;  %v3867_v42 = vpop.f32.mrb[151].mxu1  ;;  %7706 = vmatpush1.bf16.msra.mxu0 %v7705_v15 }
 0x283   : > { %v8461_v43 = vpop.eup %8460  ;;  %8480 = vtanh.f32 %v3969_v27  ;;  %v3868_v31 = vadd.f32 %v3867_v42, %v9677_v45  ;;  %v3972_v44 = vpop.f32.mrb[164].mxu0  ;;  %7255 = vmatmul.mubr.msk.f32.gmra.mrb[204].mxu0 %vm2816_vm3, %v10311_v53  ;;  %7716 = vmatprep.subr.bf16.mxu1 %v7715_v9 }
 0x284   : > { %v8463_v61 = vpop.eup %8462  ;;  %8482 = vtanh.f32 %v3866_v41  ;;  %v3973_v48 = vadd.f32 %v3972_v44, %v9677_v45  ;;  %v3974_v36 = vpop.f32.mrb[165].mxu0  ;;  %7718 = vmatpush1.bf16.msra.mxu1 %v7717_v21  ;;  %5305 = vmatprep.mubr.f32.mxu0 %v11688_v6 }
 0x285   : > { %v8465_v20 = vpop.eup %8464  ;;  %8484 = vtanh.f32 %v3868_v31  ;;  %v3975_v2 = vadd.f32 %v3974_v36, %v9677_v45  ;;  %v3871_v49 = vpop.f32.mrb[152].mxu1  ;;  %7260 = vmatmul.mubr.msk.f32.gmra.mrb[204].mxu1 %vm2816_vm3, %v10311_v53 }
 0x286   : > { %v8467_v51 = vpop.eup %8466  ;;  %8486 = vtanh.f32 %v3973_v48  ;;  %v3872_v55 = vadd.f32 %v3871_v49, %v9610_v16  ;;  %v3873_v14 = vpop.f32.mrb[153].mxu1  ;;  %5388 = vmatprep.mubr.f32.mxu1 %v11688_v6 }
 0x287   : > { %v8469_v54 = vpop.eup %8468  ;;  %v10498_v58 = vpop.permute.xlu1 %566  ;;  %8488 = vtanh.f32 %v3975_v2  ;;  %v3874_v52 = vadd.f32 %v3873_v14, %v9610_v16  ;;  %v7709_v63 = vpack.c.bf16 %v8467_v51, %v8459_v40 }
 0x288   : > { %v3978_v62 = vpop.f32.mrb[166].mxu0  ;;  %v8471_v18 = vpop.eup %8470  ;;  %8490 = vtanh.f32 %v3872_v55  ;;  %v7707_v5 = vpack.c.bf16 %v8469_v54, %v8461_v43 }
 0x289   : > { %v3979_v57 = vadd.f32 %v3978_v62, %v9610_v16  ;;  %v3980_v33 = vpop.f32.mrb[167].mxu0  ;;  %v8473_v15 = vpop.eup %8472  ;;  %8492 = vtanh.f32 %v3874_v52  ;;  %v7721_v28 = vpack.c.bf16 %v8471_v18, %v8463_v61 }
 0x28a   : > { %v3981_v53 = vadd.f32 %v3980_v33, %v9610_v16  ;;  %v4049_v24 = vpop.f32.mrb[154].mxu1  ;;  %v8475_v8 = vpop.eup %8474  ;;  %7708 = vmatprep.subr.bf16.mxu0 %v7707_v5  ;;  %v7719_v27 = vpack.c.bf16 %v8473_v15, %v8465_v20 }
 0x28b   : > { %8494 = vtanh.f32 %v3979_v57  ;;  %v4050_v59 = vadd.f32 %v4049_v24, %v9573_v11  ;;  %v4051_v34 = vpop.f32.mrb[155].mxu1  ;;  %v8477_v22 = vpop.eup %8476  ;;  %7710 = vmatpush1.bf16.msra.mxu0 %v7709_v63 }
 0x28c   : > { %8496 = vtanh.f32 %v3981_v53  ;;  %v4052_v21 = vadd.f32 %v4051_v34, %v9573_v11  ;;  %v4156_v40 = vpop.f32.mrb[168].mxu0  ;;  %v8479_v41 = vpop.eup %8478  ;;  %7720 = vmatprep.subr.bf16.mxu1 %v7719_v27 }
 0x28d   : > { %8498 = vtanh.f32 %v4050_v59  ;;  %v4157_v42 = vadd.f32 %v4156_v40, %v9573_v11  ;;  %v4158_v9 = vpop.f32.mrb[169].mxu0  ;;  %v8481_v43 = vpop.eup %8480  ;;  %7722 = vmatpush1.bf16.msra.mxu1 %v7721_v28 }
 0x28e   : > { %v10507_v31 = vpop.permute.xlu1 %570  ;;  %8500 = vtanh.f32 %v4052_v21  ;;  %v4159_v44 = vadd.f32 %v4158_v9, %v9573_v11  ;;  %v4055_v61 = vpop.f32.mrb[156].mxu1 }
 0x28f   : > { %v8483_v48 = vpop.eup %8482  ;;  %8502 = vtanh.f32 %v4157_v42  ;;  %v4056_v36 = vadd.f32 %v4055_v61, %v9655_v46  ;;  %v4057_v20 = vpop.f32.mrb[157].mxu1 }
 0x290   : > { %v8485_v2 = vpop.eup %8484  ;;  %8504 = vtanh.f32 %v4159_v44  ;;  %v4058_v49 = vadd.f32 %v4057_v20, %v9655_v46  ;;  %v4162_v51 = vpop.f32.mrb[170].mxu0  ;;  %v7713_v55 = vpack.c.bf16 %v8483_v48, %v8475_v8 }
 0x291   : > { %v8487_v14 = vpop.eup %8486  ;;  %8506 = vtanh.f32 %v4056_v36  ;;  %v4163_v54 = vadd.f32 %v4162_v51, %v9655_v46  ;;  %v4164_v52 = vpop.f32.mrb[171].mxu0  ;;  %v7711_v62 = vpack.c.bf16 %v8485_v2, %v8477_v22  ;;  %v10531_v51 = vld [vmem:[%s11682_s5] sm:$0xff] }
 0x292   : > { %v8489_v63 = vpop.eup %8488  ;;  %8508 = vtanh.f32 %v4058_v49  ;;  %v4165_v18 = vadd.f32 %v4164_v52, %v9655_v46  ;;  %v4061_v57 = vpop.f32.mrb[158].mxu1  ;;  %v7725_v33 = vpack.c.bf16 %v8487_v14, %v8479_v41 }
 0x293   : > { %v8491_v5 = vpop.eup %8490  ;;  %8510 = vtanh.f32 %v4163_v54  ;;  %v4062_v15 = vadd.f32 %v4061_v57, %v9587_v12  ;;  %v4063_v53 = vpop.f32.mrb[159].mxu1  ;;  %7712 = vmatprep.subr.bf16.mxu0 %v7711_v62  ;;  %v7723_v24 = vpack.c.bf16 %v8489_v63, %v8481_v43 }
 0x294   : > { %v8493_v28 = vpop.eup %8492  ;;  %v10515_v8 = vpop.permute.xlu1 %574  ;;  %8512 = vtanh.f32 %v4165_v18  ;;  %v4064_v59 = vadd.f32 %v4063_v53, %v9587_v12  ;;  %7714 = vmatpush1.bf16.msra.mxu0 %v7713_v55 }
 0x295   : > { %v4168_v34 = vpop.f32.mrb[172].mxu0  ;;  %v8495_v27 = vpop.eup %8494  ;;  %8514 = vtanh.f32 %v4062_v15  ;;  %7261 = vmatprep.subr.msk.mxu0 %vm1157_vm0, %v8493_v28  ;;  %7724 = vmatprep.subr.bf16.mxu1 %v7723_v24 }
 0x296   : > { %v4169_v22 = vadd.f32 %v4168_v34, %v9587_v12  ;;  %v4170_v21 = vpop.f32.mrb[173].mxu0  ;;  %v8497_v40 = vpop.eup %8496  ;;  %8516 = vtanh.f32 %v4064_v59  ;;  %7726 = vmatpush1.bf16.msra.mxu1 %v7725_v33  ;;  %v10553_v34 = vld [vmem:[%s11682_s5 + $0x8] sm:$0xff] }
 0x297   : > { %v4171_v41 = vadd.f32 %v4170_v21, %v9587_v12  ;;  %v4067_v42 = vpop.f32.mrb[160].mxu1  ;;  %v8499_v9 = vpop.eup %8498  ;;  %7266 = vmatprep.subr.msk.mxu1 %vm1157_vm0, %v8497_v40 }
 0x298   : > { %8518 = vtanh.f32 %v4169_v22  ;;  %v4068_v43 = vadd.f32 %v4067_v42, %v9667_v23  ;;  %v4069_v44 = vpop.f32.mrb[161].mxu1  ;;  %v8501_v61 = vpop.eup %8500  ;;  %7262 = vmatpush1.msk.msra.mxu0 %vm1157_vm0, %v8491_v5 }
 0x299   : > { %8520 = vtanh.f32 %v4171_v41  ;;  %v4070_v48 = vadd.f32 %v4069_v44, %v9667_v23  ;;  %v4174_v36 = vpop.f32.mrb[174].mxu0  ;;  %v10525_v20 = vpop.eup %8502  ;;  %7263 = vmatmul.mubr.msk.f32.vlgmr.msra.gmra.mrb[206].mxu0 %vm2816_vm3, %v10531_v51 }
 0x29a   : > { %8522 = vtanh.f32 %v4068_v43  ;;  %v4175_v2 = vadd.f32 %v4174_v36, %v9667_v23  ;;  %v4176_v49 = vpop.f32.mrb[175].mxu0  ;;  %v8505_v55 = vpop.eup %8504  ;;  %7267 = vmatpush1.msk.msra.mxu1 %vm1157_vm0, %v8495_v27  ;;  %5311 = vmatprep.mubr.f32.mxu0 %v11688_v6 }
 0x29b   : > { %v10535_v14 = vpop.permute.xlu1 %578  ;;  %8524 = vtanh.f32 %v4070_v48  ;;  %v4177_v54 = vadd.f32 %v4176_v49, %v9667_v23  ;;  %v4073_v52 = vpop.f32.mrb[162].mxu1  ;;  %7268 = vmatmul.mubr.msk.f32.vlgmr.msra.gmra.mrb[206].mxu1 %vm2816_vm3, %v10531_v51 }
 0x29c   : > { %v8507_v62 = vpop.eup %8506  ;;  %8526 = vtanh.f32 %v4175_v2  ;;  %v4074_v63 = vadd.f32 %v4073_v52, %v9600_v13  ;;  %v4075_v18 = vpop.f32.mrb[163].mxu1  ;;  %5394 = vmatprep.mubr.f32.mxu1 %v11688_v6 }
 0x29d   : > { %v10543_v57 = vpop.permute.xlu0 %484  ;;  %958 = vrot.lane.b32.xlu0 %v9243_v3, %s8808_s17  ;;  %v8509_v33 = vpop.eup %8508  ;;  %8528 = vtanh.f32 %v4177_v54  ;;  %v4076_v5 = vadd.f32 %v4075_v18, %v9600_v13  ;;  %v7729_v53 = vpack.c.bf16 %v8507_v62, %v8499_v9  ;;  %7264 = vmatmul.mubr.msk.f32.gmra.mrb[208].mxu0 %vm2816_vm3, %v10553_v34 }
 0x29e   : > { %v4180_v15 = vpop.f32.mrb[176].mxu0  ;;  %v8511_v24 = vpop.eup %8510  ;;  %8530 = vtanh.f32 %v4074_v63  ;;  %v7727_v3 = vpack.c.bf16 %v8509_v33, %v8501_v61  ;;  %5317 = vmatprep.mubr.f32.mxu0 %v11688_v6 }
 0x29f   : > { %v4181_v28 = vadd.f32 %v4180_v15, %v9600_v13  ;;  %v4182_v59 = vpop.f32.mrb[177].mxu0  ;;  %v8513_v27 = vpop.eup %8512  ;;  %8532 = vtanh.f32 %v4076_v5  ;;  %v7741_v40 = vpack.c.bf16 %v8511_v24, %v10525_v20  ;;  %7269 = vmatmul.mubr.msk.f32.gmra.mrb[208].mxu1 %vm2816_vm3, %v10553_v34 }
 0x2a0   : > { %v4183_v22 = vadd.f32 %v4182_v59, %v9600_v13  ;;  %v4079_v21 = vpop.f32.mrb[164].mxu1  ;;  %v8515_v41 = vpop.eup %8514  ;;  %7728 = vmatprep.subr.bf16.mxu0 %v7727_v3  ;;  %v7739_v43 = vpack.c.bf16 %v8513_v27, %v8505_v55  ;;  %5400 = vmatprep.mubr.f32.mxu1 %v11688_v6  ;;  %v10573_v55 = vld [vmem:[%s11682_s5 + $0x10] sm:$0xf] }
 0x2a1   : > { %8534 = vtanh.f32 %v4181_v28  ;;  %v4080_v42 = vadd.f32 %v4079_v21, %v9677_v45  ;;  %v4081_v9 = vpop.f32.mrb[165].mxu1  ;;  %v10563_v44 = vpop.permute.xlu0 %488  ;;  %7730 = vmatpush1.bf16.msra.mxu0 %v7729_v53 }
 0x2a2   : > { %v8517_v61 = vpop.eup %8516  ;;  %v10565_v48 = vpop.permute.xlu1 %582  ;;  %8536 = vtanh.f32 %v4183_v22  ;;  %v4082_v36 = vadd.f32 %v4081_v9, %v9677_v45  ;;  %7265 = vmatmul.mubr.msk.f32.gmra.mrb[210].mxu0 %vm2816_vm3, %v10573_v55  ;;  %7740 = vmatprep.subr.bf16.mxu1 %v7739_v43 }
 0x2a3   : > { %v4186_v2 = vpop.f32.mrb[178].mxu0  ;;  %v8519_v20 = vpop.eup %8518  ;;  %8538 = vtanh.f32 %v4080_v42  ;;  %7742 = vmatpush1.bf16.msra.mxu1 %v7741_v40  ;;  %5471 = vmatprep.mubr.f32.mxu0 %v11688_v6 }
 0x2a4   : > { %v4187_v49 = vadd.f32 %v4186_v2, %v9677_v45  ;;  %v4188_v54 = vpop.f32.mrb[179].mxu0  ;;  %v8521_v52 = vpop.eup %8520  ;;  %8540 = vtanh.f32 %v4082_v36  ;;  %7270 = vmatmul.mubr.msk.f32.gmra.mrb[210].mxu1 %vm2816_vm3, %v10573_v55 }
 0x2a5   : > { %v4189_v62 = vadd.f32 %v4188_v54, %v9677_v45  ;;  %v4085_v63 = vpop.f32.mrb[166].mxu1  ;;  %v8523_v18 = vpop.eup %8522  ;;  %5554 = vmatprep.mubr.f32.mxu1 %v11688_v6 }
 0x2a6   : > { %8542 = vtanh.f32 %v4187_v49  ;;  %v4087_v33 = vpop.f32.mrb[167].mxu1  ;;  %v10581_v5 = vpop.permute.xlu0 %492  ;;  %v7733_v28 = vpack.c.bf16 %v8523_v18, %v8515_v41  ;;  %v4086_v3 = vadd.f32 %v4085_v63, %v9610_v16 }
 0x2a7   : > { %v8525_v15 = vpop.eup %8524  ;;  %8544 = vtanh.f32 %v4189_v62  ;;  %v4088_v53 = vadd.f32 %v4087_v33, %v9610_v16  ;;  %v4192_v24 = vpop.f32.mrb[180].mxu0 }
 0x2a8   : > { %v8527_v59 = vpop.eup %8526  ;;  %v4194_v27 = vpop.f32.mrb[181].mxu0  ;;  %v7731_v22 = vpack.c.bf16 %v8525_v15, %v8517_v61  ;;  %v4193_v2 = vadd.f32 %v4192_v24, %v9610_v16 }
 0x2a9   : > { %v8529_v21 = vpop.eup %8528  ;;  %v10586_v40 = vpop.permute.xlu1 %586  ;;  %8546 = vtanh.f32 %v4088_v53  ;;  %v4195_v42 = vadd.f32 %v4194_v27, %v9610_v16  ;;  %v7745_v43 = vpack.c.bf16 %v8527_v59, %v8519_v20 }
 0x2aa   : > { %v4263_v9 = vpop.f32.mrb[168].mxu1  ;;  %v8531_v36 = vpop.eup %8530  ;;  %7732 = vmatprep.subr.bf16.mxu0 %v7731_v22  ;;  %v7743_v49 = vpack.c.bf16 %v8529_v21, %v8521_v52 }
 0x2ab   : > { %v7403_v41 = vpop.f32.mrb[169].mxu1  ;;  %v10590_v54 = vpop.permute.xlu0 %496  ;;  %8548 = vtanh.f32 %v4195_v42  ;;  %v4264_v61 = vadd.f32 %v4263_v9, %v9573_v11  ;;  %7734 = vmatpush1.bf16.msra.mxu0 %v7733_v28 }
 0x2ac   : > { %v8533_v62 = vpop.eup %8532  ;;  %8550 = vtanh.f32 %v4086_v3  ;;  %7744 = vmatprep.subr.bf16.mxu1 %v7743_v49  ;;  %v4268_v33 = vpop.f32.mrb[170].mxu1 }
 0x2ad   : > { %v8535_v63 = vpop.eup %8534  ;;  %7746 = vmatpush1.bf16.msra.mxu1 %v7745_v43  ;;  %8552 = vtanh.f32 %v4193_v2  ;;  %v4269_v15 = vadd.f32 %v4268_v33, %v9655_v46  ;;  %v7406_v53 = vpop.f32.mrb[171].mxu1 }
 0x2ae   : > { %v8537_v18 = vpop.eup %8536  ;;  %v10596_v59 = vpop.permute.xlu1 %590  ;;  %8554 = vtanh.f32 %v4264_v61 }
 0x2af   : > { %v8539_v20 = vpop.eup %8538  ;;  %v10594_v24 = vpop.permute.xlu0 %500  ;;  %8556 = vtanh.f32 %v4269_v15 }
 0x2b0   : > { %v8541_v52 = vpop.eup %8540  ;;  %v7737_v27 = vpack.c.bf16 %v8539_v20, %v8531_v36  ;;  %v4273_v22 = vpop.f32.mrb[172].mxu1 }
 0x2b1   : > { %v8543_v11 = vpop.eup %8542  ;;  %v7735_v28 = vpack.c.bf16 %v8541_v52, %v8533_v62  ;;  %v7409_v42 = vpop.f32.mrb[173].mxu1  ;;  %v4274_v2 = vadd.f32 %v4273_v22, %v9587_v12 }
 0x2b2   : > { %v8545_v3 = vpop.eup %8544  ;;  %v7749_v21 = vpack.c.bf16 %v8543_v11, %v8535_v63  ;;  %v10602_v36 = vpop.permute.xlu1 %594 }
 0x2b3   : > { %7736 = vmatprep.subr.bf16.mxu0 %v7735_v28  ;;  %v7747_v9 = vpack.c.bf16 %v8545_v3, %v8537_v18  ;;  %v10598_v43 = vpop.permute.xlu0 %504  ;;  %v8547_v46 = vpop.eup %8546  ;;  %8558 = vtanh.f32 %v4274_v2 }
 0x2b4   : > { %7738 = vmatpush1.bf16.msra.mxu0 %v7737_v27  ;;  %v4278_v49 = vpop.f32.mrb[174].mxu1 }
 0x2b5   : > { %7271 = vmatprep.subr.msk.mxu0 %vm1157_vm0, %v8547_v46  ;;  %7748 = vmatprep.subr.bf16.mxu1 %v7747_v9  ;;  %v8549_v41 = vpop.eup %8548  ;;  %v4279_v61 = vadd.f32 %v4278_v49, %v9667_v23  ;;  %v7412_v63 = vpop.f32.mrb[175].mxu1 }
 0x2b6   : > { %7750 = vmatpush1.bf16.msra.mxu1 %v7749_v21  ;;  %v8551_v62 = vpop.eup %8550  ;;  %v4283_v20 = vpop.f32.mrb[176].mxu1 }
 0x2b7   : > { %7276 = vmatprep.subr.msk.mxu1 %vm1157_vm0, %v8549_v41  ;;  %v10606_v18 = vpop.permute.xlu0 %508  ;;  %v8553_v12 = vpop.eup %8552  ;;  %8560 = vtanh.f32 %v4279_v61  ;;  %v4284_v27 = vadd.f32 %v4283_v20, %v9600_v13 }
 0x2b8   : > { %7272 = vmatpush1.msk.msra.mxu0 %vm1157_vm0, %v8551_v62  ;;  %v8555_v33 = vpop.eup %8554  ;;  %v7415_v15 = vpop.f32.mrb[177].mxu1 }
 0x2b9   : > { %7273 = vmatmul.mubr.msk.f32.vlgmr.msra.gmra.mrb[212].mxu0 %vm2816_vm3, %v10531_v51  ;;  %7751 = vmatprep.subr.bf16.mxu0 %v11687_v29  ;;  %v8557_v23 = vpop.eup %8556  ;;  %v10618_v52 = vpop.permute.xlu1 %598  ;;  %8562 = vtanh.f32 %v4284_v27 }
 0x2ba   : > { %7277 = vmatpush1.msk.msra.mxu1 %vm1157_vm0, %v8553_v12  ;;  %5477 = vmatprep.mubr.f32.mxu0 %v11688_v6  ;;  %v7752_v11 = vpack.c.bf16 %v8557_v23, %v8555_v33  ;;  %v4288_v28 = vpop.f32.mrb[178].mxu1 }
 0x2bb   : > { %7278 = vmatmul.mubr.msk.f32.vlgmr.msra.gmra.mrb[212].mxu1 %vm2816_vm3, %v10531_v51  ;;  %v10616_v53 = vpop.permute.xlu0 %512  ;;  %v4289_v3 = vadd.f32 %v4288_v28, %v9677_v45  ;;  %v7418_v22 = vpop.f32.mrb[179].mxu1  ;;  %v10664_v28 = vand.u32 127, %v352_v1 }
 0x2bc   : > { %5560 = vmatprep.mubr.f32.mxu1 %v11688_v6  ;;  %7753 = vmatpush3.bf16.msra.mxu0 %v7752_v11  ;;  %v4293_v9 = vpop.f32.mrb[180].mxu1 }
 0x2bd   : > { %7274 = vmatmul.mubr.msk.f32.gmra.mrb[214].mxu0 %vm2816_vm3, %v10553_v34  ;;  %7754 = vmatprep.subr.bf16.mxu0 %v11687_v29  ;;  %8564 = vtanh.f32 %v4289_v3  ;;  %v8559_v13 = vpop.eup %8558  ;;  %v10634_v42 = vpop.permute.xlu1 %602  ;;  %v4294_v46 = vadd.f32 %v4293_v9, %v9610_v16  ;;  %vm534_vm4 = vcmp.lt.s32.totalorder %v10664_v28, 10  ;;  %vm610_vm5 = vcmp.lt.s32.totalorder %v10664_v28, 118 }
 0x2be   : > { %5483 = vmatprep.mubr.f32.mxu0 %v11688_v6  ;;  %v7421_v2 = vpop.f32.mrb[181].mxu1  ;;  %v557_v1 = vsel %vm534_vm4, %v10543_v57, %v9650_v39  ;;  %vm884_vm8 = vcmp.lt.s32.totalorder %v10664_v28, 1  ;;  %vm960_vm9 = vcmp.lt.s32.totalorder %v10664_v28, 127 }
 0x2bf   : > { %7279 = vmatmul.mubr.msk.f32.gmra.mrb[214].mxu1 %vm2816_vm3, %v10553_v34  ;;  %v10629_v21 = vpop.permute.xlu0 %516  ;;  %8566 = vtanh.f32 %v4294_v46 }
 0x2c0   : > { %5566 = vmatprep.mubr.f32.mxu1 %v11688_v6 }
 0x2c1   : > { %7275 = vmatmul.mubr.msk.f32.gmra.mrb[216].mxu0 %vm2816_vm3, %v10573_v55  ;;  %v8561_v45 = vpop.eup %8560  ;;  %v10647_v61 = vpop.permute.xlu1 %606 }
 0x2c2   : > { %7436 = vmatprep.mubr.msk.f32.mxu0 %vm8807_vm2, %v11688_v6  ;;  %v7755_v49 = vpack.c.bf16 %v8561_v45, %v8559_v13 }
 0x2c3   : > { %7280 = vmatmul.mubr.msk.f32.gmra.mrb[216].mxu1 %vm2816_vm3, %v10573_v55  ;;  %v10641_v41 = vpop.permute.xlu0 %520  ;;  %v8563_v63 = vpop.eup %8562 }
 0x2c4   : > { %5879 = vmatprep.mubr.f32.mxu1 %v11688_v6  ;;  %7756 = vmatpush3.bf16.msra.mxu0 %v7755_v49  ;;  %v556_v49 = vsel %vm534_vm4, %v9650_v39, %v10563_v44 }
 0x2c5   : > { %7757 = vmatprep.subr.bf16.mxu0 %v11687_v29  ;;  %v10651_v20 = vpop.permute.xlu1 %834 }
 0x2c6   : > { %11737 = vst [vmem:[#allocation10_spill] sm:$0xff] %v10651_v20 }
 0x2c7   : > { %v10645_v62 = vpop.permute.xlu0 %524  ;;  %v8565_v12 = vpop.eup %8564 }
 0x2c8   : > { %v7758_v33 = vpack.c.bf16 %v8565_v12, %v8563_v63  ;;  %v553_v63 = vsel %vm534_vm4, %v10581_v5, %v10350_v60  ;;  %v554_v12 = vsel %vm534_vm4, %v10337_v50, %v10581_v5 }
 0x2c9   : > { %v8567_v15 = vpop.eup %8566  ;;  %v10659_v11 = vpop.permute.xlu1 %838 }
 0x2ca   : > { %7759 = vmatpush3.bf16.msra.mxu0 %v7758_v33  ;;  %11739 = vst [vmem:[#allocation12_spill] sm:$0xff] %v10659_v11 }
 0x2cb   : > { %v10649_v16 = vpop.permute.xlu0 %528  ;;  %7434 = vmatprep.subr.mxu0 %v11688_v6 }
 0x2cd   : > { %v10671_v22 = vpop.permute.xlu1 %842 }
 0x2ce   : > { %7435 = vmatpush3.msk.msra.mxu0 %vm1157_vm0, %v8567_v15 }
 0x2cf   : > { %v10654_v23 = vpop.permute.xlu0 %560  ;;  %7437 = vmatmul.mubr.msk.f32.vlgmr.msra.gmra.mrb[218].mxu0 %vm2816_vm3, %v10531_v51 }
 0x2d0   : > { %11738 = vst [vmem:[#allocation11_spill] sm:$0xff] %v10654_v23  ;;  %7439 = vmatprep.mubr.msk.f32.mxu0 %vm8807_vm2, %v11688_v6 }
 0x2d1   : > { %v10693_v46 = vpop.permute.xlu1 %846 }
 0x2d3   : > { %v565_v27 = vpop.permute.xlu0 %564  ;;  %7440 = vmatmul.mubr.msk.f32.gmra.mrb[220].mxu0 %vm2816_vm3, %v10553_v34  ;;  %v558_v34 = vsel %vm534_vm4, %v9631_v25, %v10543_v57  ;;  %v555_v57 = vsel %vm534_vm4, %v10563_v44, %v10337_v50  ;;  %v551_v50 = vsel %vm534_vm4, %v10590_v54, %v10368_v7  ;;  %v8729_v25 = vld [vmem:[%s8930_s21 + $0x10] sm:$0xff] }
 0x2d4   : > { %7442 = vmatprep.mubr.msk.f32.mxu0 %vm8807_vm2, %v11688_v6  ;;  %v632_v13 = vsel %vm610_vm5, %v565_v27, %v10498_v58 }
 0x2d5   : > { %v10691_v9 = vadd.f32 %v632_v13, %v557_v1 }
 0x2d7   : > { %v569_v3 = vpop.permute.xlu0 %568  ;;  %7443 = vmatmul.mubr.msk.f32.gmra.mrb[222].mxu0 %vm2816_vm3, %v10573_v55  ;;  %v633_v55 = vsel %vm610_vm5, %v10481_v35, %v565_v27  ;;  %11740 = vst [vmem:[#allocation13_spill] sm:$0xff] %v10691_v9 }
 0x2d8   : > { %6092 = vmatprep.mubr.f32.mxu0 %v11688_v6  ;;  %v10695_v2 = vadd.f32 %v633_v55, %v558_v34  ;;  %v630_v33 = vsel %vm610_vm5, %v569_v3, %v10507_v31  ;;  %v631_v15 = vsel %vm610_vm5, %v10498_v58, %v569_v3  ;;  %v552_v58 = vsel %vm534_vm4, %v10350_v60, %v10590_v54 }
 0x2d9   : > { %v10729_v5 = vadd.f32 %v631_v15, %v556_v49  ;;  %v10731_v1 = vadd.f32 %v630_v33, %v555_v57  ;;  %v549_v60 = vsel %vm534_vm4, %v10594_v24, %v10383_v30  ;;  %v550_v54 = vsel %vm534_vm4, %v10368_v7, %v10594_v24 }
 0x2da   : > { %11741 = vst [vmem:[#allocation14_spill] sm:$0xff] %v10695_v2  ;;  %v547_v7 = vsel %vm534_vm4, %v10598_v43, %v10391_v56  ;;  %v548_v24 = vsel %vm534_vm4, %v10383_v30, %v10598_v43  ;;  %v545_v30 = vsel %vm534_vm4, %v10606_v18, %v10400_v37  ;;  %v546_v43 = vsel %vm534_vm4, %v10391_v56, %v10606_v18 }
 0x2db   : > { %v573_v51 = vpop.permute.xlu0 %572  ;;  %11742 = vst [vmem:[#allocation15_spill] sm:$0xff] %v10729_v5  ;;  %v543_v56 = vsel %vm534_vm4, %v10616_v53, %v10416_v32  ;;  %v544_v18 = vsel %vm534_vm4, %v10400_v37, %v10616_v53  ;;  %v542_v37 = vsel %vm534_vm4, %v10416_v32, %v10629_v21 }
 0x2dc   : > { %v628_v39 = vsel %vm610_vm5, %v573_v51, %v10515_v8  ;;  %v629_v44 = vsel %vm610_vm5, %v10507_v31, %v573_v51  ;;  %v10744_v51 = vpop.permute.xlu1 %850 }
 0x2dd   : > { %v10737_v3 = vadd.f32 %v629_v44, %v554_v12  ;;  %v10739_v34 = vadd.f32 %v628_v39, %v553_v63 }
 0x2df   : > { %v577_v45 = vpop.permute.xlu0 %576 }
 0x2e0   : > { %v626_v31 = vsel %vm610_vm5, %v577_v45, %v10535_v14  ;;  %v627_v13 = vsel %vm610_vm5, %v10515_v8, %v577_v45  ;;  %v10767_v12 = vpop.permute.xlu1 %854 }
 0x2e1   : > { %v10749_v55 = vadd.f32 %v626_v31, %v551_v50  ;;  %v10751_v49 = vadd.f32 %v627_v13, %v552_v58 }
 0x2e3   : > { %v581_v27 = vpop.permute.xlu0 %580 }
 0x2e4   : > { %v624_v63 = vsel %vm610_vm5, %v581_v27, %v10565_v48  ;;  %v625_v8 = vsel %vm610_vm5, %v10535_v14, %v581_v27  ;;  %v10791_v58 = vpop.permute.xlu1 %858 }
 0x2e5   : > { %v10769_v33 = vadd.f32 %v625_v8, %v550_v54  ;;  %v10771_v15 = vadd.f32 %v624_v63, %v549_v60 }
 0x2e7   : > { %v585_v57 = vpop.permute.xlu0 %584 }
 0x2e8   : > { %v622_v14 = vsel %vm610_vm5, %v585_v57, %v10586_v40  ;;  %v623_v44 = vsel %vm610_vm5, %v10565_v48, %v585_v57  ;;  %v10811_v63 = vpop.permute.xlu1 %862 }
 0x2e9   : > { %v10787_v27 = vadd.f32 %v622_v14, %v547_v7  ;;  %v10789_v50 = vadd.f32 %v623_v44, %v548_v24  ;;  %v541_v14 = vsel %vm534_vm4, %v10629_v21, %v10433_v38 }
 0x2eb   : > { %v589_v45 = vpop.permute.xlu0 %588 }
 0x2ec   : > { %v620_v48 = vsel %vm610_vm5, %v589_v45, %v10596_v59  ;;  %v621_v13 = vsel %vm610_vm5, %v10586_v40, %v589_v45  ;;  %v10839_v53 = vpop.permute.xlu1 %866 }
 0x2ed   : > { %v10807_v57 = vadd.f32 %v621_v13, %v546_v43  ;;  %v10809_v60 = vadd.f32 %v620_v48, %v545_v30  ;;  %v540_v13 = vsel %vm534_vm4, %v10433_v38, %v10641_v41 }
 0x2ef   : > { %v593_v39 = vpop.permute.xlu0 %592  ;;  %11743 = vst [vmem:[#allocation16_spill] sm:$0xff] %v10809_v60 }
 0x2f0   : > { %v618_v40 = vsel %vm610_vm5, %v593_v39, %v10602_v36  ;;  %v619_v8 = vsel %vm610_vm5, %v10596_v59, %v593_v39  ;;  %v539_v59 = vsel %vm534_vm4, %v10641_v41, %v10445_v17 }
 0x2f1   : > { %v10827_v45 = vadd.f32 %v618_v40, %v543_v56  ;;  %v10829_v24 = vadd.f32 %v619_v8, %v544_v18 }
 0x2f3   : > { %v597_v31 = vpop.permute.xlu0 %596  ;;  %11744 = vst [vmem:[#allocation17_spill] sm:$0xff] %v10827_v45  ;;  %11745 = vst [vmem:[#allocation18_spill] sm:$0xff] %v10829_v24 }
 0x2f4   : > { %v4643_v39 = vpop.f32.mrb[182].mxu0  ;;  %v616_v44 = vsel %vm610_vm5, %v597_v31, %v10618_v52  ;;  %v617_v30 = vsel %vm610_vm5, %v10602_v36, %v597_v31 }
 0x2f5   : > { %v4644_v43 = vadd.f32 %v4643_v39, %v9689_v26  ;;  %v4645_v48 = vpop.f32.mrb[183].mxu0  ;;  %v10859_v56 = vadd.f32 %v617_v30, %v542_v37  ;;  %v10861_v18 = vadd.f32 %v616_v44, %v541_v14  ;;  %v10875_v44 = vpop.permute.xlu1 %870 }
 0x2f6   : > { %v4646_v40 = vadd.f32 %v4645_v48, %v9689_v26  ;;  %v4726_v36 = vpop.f32.mrb[182].mxu1  ;;  %11747 = vst [vmem:[#allocation20_spill] sm:$0xff] %v10875_v44 }
 0x2f7   : > { %v601_v54 = vpop.permute.xlu0 %600  ;;  %8568 = vtanh.f32 %v4644_v43  ;;  %v4727_v39 = vadd.f32 %v4726_v36, %v9689_v26  ;;  %v4728_v29 = vpop.f32.mrb[183].mxu1 }
 0x2f8   : > { %v614_v32 = vsel %vm610_vm5, %v601_v54, %v10634_v42  ;;  %v615_v31 = vsel %vm610_vm5, %v10618_v52, %v601_v54  ;;  %8570 = vtanh.f32 %v4646_v40  ;;  %v4729_v38 = vadd.f32 %v4728_v29, %v9689_v26  ;;  %v4649_v41 = vpop.f32.mrb[184].mxu0 }
 0x2f9   : > { %v10867_v8 = vadd.f32 %v614_v32, %v539_v59  ;;  %v10871_v37 = vadd.f32 %v615_v31, %v540_v13  ;;  %8572 = vtanh.f32 %v4727_v39  ;;  %v4650_v30 = vadd.f32 %v4649_v41, %v9620_v19  ;;  %v4651_v52 = vpop.f32.mrb[185].mxu0 }
 0x2fa   : > { %v537_v54 = vsel %vm534_vm4, %v10645_v62, %v10453_v4  ;;  %8574 = vtanh.f32 %v4729_v38  ;;  %v4652_v59 = vadd.f32 %v4651_v52, %v9620_v19  ;;  %v4732_v29 = vpop.f32.mrb[184].mxu1  ;;  %v538_v32 = vsel %vm534_vm4, %v10445_v17, %v10645_v62 }
 0x2fb   : > { %v605_v7 = vpop.permute.xlu0 %604  ;;  %8576 = vtanh.f32 %v4650_v30  ;;  %v4733_v43 = vadd.f32 %v4732_v29, %v9620_v19  ;;  %v4734_v48 = vpop.f32.mrb[185].mxu1  ;;  %v535_v62 = vsel %vm534_vm4, %v10649_v16, %v10463_v0  ;;  %v536_v38 = vsel %vm534_vm4, %v10453_v4, %v10649_v16 }
 0x2fc   : > { %v612_v13 = vsel %vm610_vm5, %v605_v7, %v10647_v61  ;;  %8578 = vtanh.f32 %v4652_v59  ;;  %v4735_v40 = vadd.f32 %v4734_v48, %v9620_v19  ;;  %v613_v36 = vsel %vm610_vm5, %v10634_v42, %v605_v7  ;;  %v10912_v30 = vpop.permute.xlu1 %874 }
 0x2fd   : > { %v10895_v31 = vadd.f32 %v612_v13, %v537_v54  ;;  %8580 = vtanh.f32 %v4733_v43  ;;  %v4655_v17 = vpop.f32.mrb[186].mxu0  ;;  %v10907_v41 = vadd.f32 %v613_v36, %v538_v32  ;;  %11751 = vst [vmem:[#allocation24_spill] sm:$0xff] %v10912_v30 }
 0x2fe   : > { %8582 = vtanh.f32 %v4735_v40  ;;  %v4657_v42 = vpop.f32.mrb[187].mxu0  ;;  %v4656_v52 = vadd.f32 %v4655_v17, %v9699_v47 }
 0x2ff   : > { %v609_v21 = vpop.permute.xlu0 %608  ;;  %11748 = vst [vmem:[#allocation21_spill] sm:$0xff] %v10895_v31  ;;  %11750 = vst [vmem:[#allocation23_spill] sm:$0xff] %v10907_v41  ;;  %v4658_v54 = vadd.f32 %v4657_v42, %v9699_v47  ;;  %v4738_v59 = vpop.f32.mrb[186].mxu1 }
 0x300   : > { %v611_v7 = vsel %vm610_vm5, %v10647_v61, %v609_v21  ;;  %v635_v29 = vsel %vm610_vm5, %v609_v21, %v10654_v23  ;;  %v4740_v4 = vpop.f32.mrb[187].mxu1  ;;  %v10928_v6 = vpop.permute.xlu1 %878  ;;  %v4739_v21 = vadd.f32 %v4738_v59, %v9699_v47  ;;  %v10939_v59 = vld [vmem:[%s11684_s7] sm:$0x3] }
 0x301   : > { %v10919_v16 = vadd.f32 %v611_v7, %v536_v38  ;;  %v10921_v32 = vadd.f32 %v635_v29, %v535_v62  ;;  %v8569_v48 = vpop.eup %8568  ;;  %8584 = vtanh.f32 %v4658_v54  ;;  %v4741_v13 = vadd.f32 %v4740_v4, %v9699_v47  ;;  %11754 = vst [vmem:[#allocation27_spill] sm:$0xff] %v10928_v6  ;;  %11756 = vst [vmem:[#allocation29_spill] sm:$0xff] %v10939_v59 }
 0x302   : > { %v8571_v61 = vpop.eup %8570  ;;  %8586 = vtanh.f32 %v4656_v52 }
 0x303   : > { %v10873_v14 = vpop.permute.xlu0 %836  ;;  %11752 = vst [vmem:[#allocation25_spill] sm:$0xff] %v10919_v16  ;;  %11753 = vst [vmem:[#allocation26_spill] sm:$0xff] %v10921_v32  ;;  %v8573_v40 = vpop.eup %8572  ;;  %8588 = vtanh.f32 %v4741_v13  ;;  %v11757_v13 = vmov 0.0   ;;  %v663_v32 = vmul.f32 2.0, %v8729_v25 }
 0x304   : > { %11746 = vst [vmem:[#allocation19_spill] sm:$0xff] %v10873_v14  ;;  %v8575_v36 = vpop.eup %8574  ;;  %8590 = vtanh.f32 %v4739_v21  ;;  %v10933_v2 = vpop.permute.xlu1 %882 }
 0x305   : > { %v8577_v42 = vpop.eup %8576  ;;  %11755 = vst [vmem:[#allocation28_spill] sm:$0xff] %v10933_v2 }
 0x306   : > { %v8579_v38 = vpop.eup %8578  ;;  %v7762_v62 = vpack.c.bf16 %v8577_v42, %v8569_v48 }
 0x307   : > { %v10897_v39 = vpop.permute.xlu0 %840  ;;  %v8581_v7 = vpop.eup %8580  ;;  %v7760_v29 = vpack.c.bf16 %v8579_v38, %v8571_v61 }
 0x308   : > { %11749 = vst [vmem:[#allocation22_spill] sm:$0xff] %v10897_v39  ;;  %v8583_v5 = vpop.eup %8582  ;;  %v7766_v54 = vpack.c.bf16 %v8581_v7, %v8573_v40 }
 0x309   : > { %7761 = vmatprep.subr.bf16.mxu1 %v7760_v29  ;;  %v7764_v52 = vpack.c.bf16 %v8583_v5, %v8575_v36  ;;  %v10949_v36 = vpop.permute.xlu1 %912 }
 0x30a   : > { %7763 = vmatpush1.bf16.msra.mxu1 %v7762_v62  ;;  %11758 = vst [vmem:[#allocation30_spill] sm:$0xff] %v10949_v36 }
 0x30b   : > { %v10923_v43 = vpop.permute.xlu0 %844  ;;  %v8585_v4 = vpop.eup %8584 }
 0x30c   : > { %7285 = vmatprep.subr.msk.mxu1 %vm5739_vm6, %v8585_v4  ;;  %v8587_v61 = vpop.eup %8586 }
 0x30d   : > { %v8589_v5 = vpop.eup %8588 }
 0x30e   : > { %7286 = vmatpush1.msk.msra.mxu1 %vm5739_vm6, %v8587_v61  ;;  %v8591_v62 = vpop.eup %8590 }
 0x30f   : > { %v10926_v17 = vpop.permute.xlu0 %848  ;;  %7287 = vmatmul.mubr.msk.f32.vlgmr.msra.gmra.mrb[218].mxu1 %vm5735_vm7, %v10939_v59  ;;  %7765 = vmatprep.subr.bf16.mxu1 %v7764_v52 }
 0x310   : > { %7767 = vmatpush1.bf16.msra.mxu1 %v7766_v54  ;;  %5950 = vmatprep.mubr.f32.mxu1 %v11757_v13 }
 0x311   : > { %v4809_v42 = vpop.f32.mrb[188].mxu0  ;;  %7288 = vmatprep.subr.msk.mxu1 %vm5739_vm6, %v8589_v5 }
 0x312   : > { %v4810_v21 = vadd.f32 %v4809_v42, %v9689_v26  ;;  %v4811_v38 = vpop.f32.mrb[189].mxu0 }
 0x313   : > { %v10931_v9 = vpop.permute.xlu0 %852  ;;  %v4812_v7 = vadd.f32 %v4811_v38, %v9689_v26  ;;  %v4892_v29 = vpop.f32.mrb[188].mxu1 }
 0x314   : > { %8592 = vtanh.f32 %v4810_v21  ;;  %v4893_v52 = vadd.f32 %v4892_v29, %v9689_v26  ;;  %v4894_v54 = vpop.f32.mrb[189].mxu1  ;;  %7289 = vmatpush1.msk.msra.mxu1 %vm5739_vm6, %v8591_v62  ;;  %v10963_v21 = vpop.permute.xlu1 %916 }
 0x315   : > { %8594 = vtanh.f32 %v4812_v7  ;;  %v4895_v61 = vadd.f32 %v4894_v54, %v9689_v26  ;;  %v4815_v11 = vpop.f32.mrb[190].mxu0  ;;  %7290 = vmatmul.mubr.msk.f32.vlgmr.msra.gmra.mrb[220].mxu1 %vm5735_vm7, %v10939_v59  ;;  %11760 = vst [vmem:[#allocation32_spill] sm:$0xff] %v10963_v21 }
 0x316   : > { %8596 = vtanh.f32 %v4893_v52  ;;  %v4816_v5 = vadd.f32 %v4815_v11, %v9620_v19  ;;  %v4817_v42 = vpop.f32.mrb[191].mxu0  ;;  %6021 = vmatprep.mubr.f32.mxu1 %v11757_v13 }
 0x317   : > { %v10941_v48 = vpop.permute.xlu0 %856  ;;  %8598 = vtanh.f32 %v4895_v61  ;;  %v4818_v38 = vadd.f32 %v4817_v42, %v9620_v19  ;;  %v4898_v62 = vpop.f32.mrb[190].mxu1 }
 0x318   : > { %8600 = vtanh.f32 %v4816_v5  ;;  %v4899_v7 = vadd.f32 %v4898_v62, %v9620_v19  ;;  %v4900_v29 = vpop.f32.mrb[191].mxu1  ;;  %v10974_v62 = vpop.permute.xlu1 %920 }
 0x319   : > { %8602 = vtanh.f32 %v4818_v38  ;;  %v4901_v52 = vadd.f32 %v4900_v29, %v9620_v19 }
 0x31a   : > { %v4821_v14 = vpop.f32.mrb[192].mxu0  ;;  %8604 = vtanh.f32 %v4899_v7 }
 0x31b   : > { %v10947_v40 = vpop.permute.xlu0 %860  ;;  %v4823_v11 = vpop.f32.mrb[193].mxu0  ;;  %8606 = vtanh.f32 %v4901_v52  ;;  %v4822_v42 = vadd.f32 %v4821_v14, %v9699_v47  ;;  %v8728_v52 = vld [vmem:[%s8930_s21 + $0x8] sm:$0xff] }
 0x31c   : > { %v4824_v21 = vadd.f32 %v4823_v11, %v9699_v47  ;;  %v4904_v61 = vpop.f32.mrb[192].mxu1  ;;  %v662_v11 = vmul.f32 2.0, %v8728_v52  ;;  %v10983_v6 = vpop.permute.xlu1 %924 }
 0x31d   : > { %v4906_v36 = vpop.f32.mrb[193].mxu1  ;;  %v4905_v7 = vadd.f32 %v4904_v61, %v9699_v47 }
 0x31e   : > { %8608 = vtanh.f32 %v4824_v21  ;;  %v4907_v38 = vadd.f32 %v4906_v36, %v9699_v47  ;;  %v8593_v29 = vpop.eup %8592  ;;  %v692_v0 = vcombine.high %v662_v11, %v662_v11  ;;  %v8730_v21 = vld [vmem:[%s8930_s21 + $0x18] sm:$0xff]  ;;  %v10986_v52 = vrot.slane %v662_v11, %v8922_v10  ;;  %v8731_v11 = vld [vmem:[%s8930_s21 + $0x20] sm:$0xff] }
 0x31f   : > { %v10956_v4 = vpop.permute.xlu0 %864  ;;  %v8595_v23 = vpop.eup %8594  ;;  %v664_v36 = vmul.f32 2.0, %v8730_v21  ;;  %v10994_v21 = vrot.slane %v663_v32, %v8922_v10 }
 0x320   : > { %11759 = vst [vmem:[#allocation31_spill] sm:$0xff] %v10956_v4  ;;  %8610 = vtanh.f32 %v4907_v38  ;;  %v8597_v35 = vpop.eup %8596  ;;  %v10991_v25 = vrot.slane %v692_v0, %v8922_v10  ;;  %v11005_v0 = vcombine.high %v10986_v52, %v10986_v52 }
 0x321   : > { %8612 = vtanh.f32 %v4822_v42  ;;  %v8599_v20 = vpop.eup %8598  ;;  %v726_v42 = vcombine.high %v664_v36, %v664_v36 }
 0x322   : > { %v8601_v16 = vpop.eup %8600  ;;  %8614 = vtanh.f32 %v4905_v7 }
 0x323   : > { %v10967_v54 = vpop.permute.xlu0 %868  ;;  %v8603_v2 = vpop.eup %8602  ;;  %v7770_v61 = vpack.c.bf16 %v8601_v16, %v8593_v29  ;;  %v11021_v29 = vcombine.high %v10994_v21, %v10994_v21 }
 0x324   : > { %11761 = vst [vmem:[#allocation33_spill] sm:$0xff] %v10967_v54  ;;  %v8605_v38 = vpop.eup %8604  ;;  %v7768_v30 = vpack.c.bf16 %v8603_v2, %v8595_v23  ;;  %v11000_v2 = vrot.slane %v664_v36, %v8922_v10  ;;  %v11024_v36 = vmul.f32 2.0, %v8731_v11 }
 0x325   : > { %v8607_v54 = vpop.eup %8606  ;;  %v7774_v44 = vpack.c.bf16 %v8605_v38, %v8597_v35  ;;  %v11008_v35 = vrot.slane %v726_v42, %v8922_v10 }
 0x326   : > { %7769 = vmatprep.subr.bf16.mxu1 %v7768_v30  ;;  %v7772_v7 = vpack.c.bf16 %v8607_v54, %v8599_v20  ;;  %v11016_v54 = vcombine.high %v10991_v25, %v10991_v25  ;;  %v11065_v11 = vrot.slane %v11024_v36, %v8922_v10 }
 0x327   : > { %v10972_v5 = vpop.permute.xlu0 %872  ;;  %7771 = vmatpush1.bf16.msra.mxu1 %v7770_v61  ;;  %11765 = vst [vmem:[#allocation37_spill] sm:$0xff] %v11008_v35 }
 0x328   : > { %11762 = vst [vmem:[#allocation34_spill] sm:$0xff] %v10972_v5  ;;  %v709_v5 = vcombine.high %v663_v32, %v663_v32  ;;  %v8609_v16 = vpop.eup %8608  ;;  %7773 = vmatprep.subr.bf16.mxu0 %v7772_v7  ;;  %v11012_v32 = vpop.permute.xlu1 %928  ;;  %11769 = vst [vmem:[#allocation41_spill] sm:$0xff] %v11065_v11  ;;  %v11092_v60 = vcombine.high %v11065_v11, %v11065_v11 }
 0x329   : > { %7291 = vmatprep.subr.msk.mxu1 %vm5739_vm6, %v8609_v16  ;;  %7775 = vmatpush1.bf16.msra.mxu0 %v7774_v44  ;;  %v11033_v44 = vcombine.high %v11000_v2, %v11000_v2  ;;  %v11043_v16 = vcombine.high %v11008_v35, %v11008_v35 }
 0x32a   : > { %v10997_v23 = vrot.slane %v709_v5, %v8922_v10  ;;  %v8611_v30 = vpop.eup %8610 }
 0x32b   : > { %v10979_v14 = vpop.permute.xlu0 %876  ;;  %v8613_v5 = vpop.eup %8612  ;;  %7294 = vmatprep.subr.msk.mxu0 %vm5739_vm6, %v8611_v30  ;;  %11767 = vst [vmem:[#allocation39_spill] sm:$0xff] %v11043_v16 }
 0x32c   : > { %11763 = vst [vmem:[#allocation35_spill] sm:$0xff] %v10979_v14  ;;  %7292 = vmatpush1.msk.msra.mxu1 %vm5739_vm6, %v8613_v5  ;;  %v11029_v61 = vcombine.high %v10997_v23, %v10997_v23  ;;  %v8615_v38 = vpop.eup %8614  ;;  %v11067_v42 = vpop.permute.xlu1 %932 }
 0x32d   : > { %7293 = vmatmul.mubr.msk.f32.vlgmr.msra.gmra.mrb[222].mxu1 %vm5735_vm7, %v10939_v59  ;;  %7295 = vmatpush1.msk.msra.mxu0 %vm5739_vm6, %v8615_v38 }
 0x32e   : > { %6163 = vmatprep.mubr.f32.mxu1 %v11757_v13  ;;  %7296 = vmatmul.mubr.msk.f32.vlgmr.msra.gmra.mrb[224].mxu0 %vm5735_vm7, %v10939_v59 }
 0x32f   : > { %v10988_v14 = vpop.permute.xlu0 %880  ;;  %v4975_v5 = vpop.f32.mrb[194].mxu0  ;;  %6234 = vmatprep.mubr.f32.mxu0 %v11757_v13 }
 0x330   : > { %11764 = vst [vmem:[#allocation36_spill] sm:$0xff] %v10988_v14  ;;  %v4977_v14 = vpop.f32.mrb[195].mxu0 }
 0x331   : > { %v4978_v7 = vadd.f32 %v4977_v14, %v9689_v26  ;;  %v5058_v31 = vpop.f32.mrb[194].mxu1  ;;  %v8732_v14 = vld [vmem:[%s8930_s21 + $0x28] sm:$0xff] }
 0x332   : > { %v5059_v41 = vadd.f32 %v5058_v31, %v9689_v26  ;;  %v5060_v59 = vpop.f32.mrb[195].mxu1  ;;  %v743_v31 = vcombine.high %v11024_v36, %v11024_v36  ;;  %v11100_v45 = vmul.f32 2.0, %v8732_v14 }
 0x333   : > { %v11010_v20 = vpop.permute.xlu0 %910  ;;  %v4981_v38 = vpop.f32.mrb[196].mxu0 }
 0x334   : > { %11766 = vst [vmem:[#allocation38_spill] sm:$0xff] %v11010_v20  ;;  %v4976_v20 = vadd.f32 %v4975_v5, %v9689_v26  ;;  %v5061_v5 = vadd.f32 %v5060_v59, %v9689_v26  ;;  %v4983_v4 = vpop.f32.mrb[197].mxu0  ;;  %v905_v59 = vsel %vm884_vm8, %v10897_v39, %v10671_v22  ;;  %v11112_v39 = vpop.permute.xlu1 %936  ;;  %v11120_v11 = vrot.slane %v743_v31, %v8922_v10 }
 0x336   : > { %8616 = vtanh.f32 %v4976_v20  ;;  %v4982_v20 = vadd.f32 %v4981_v38, %v9620_v19  ;;  %v904_v38 = vsel %vm884_vm8, %v10671_v22, %v10923_v43 }
 0x337   : > { %v11045_v30 = vpop.permute.xlu0 %914  ;;  %8618 = vtanh.f32 %v4978_v7  ;;  %v4984_v7 = vadd.f32 %v4983_v4, %v9620_v19 }
 0x338   : > { %11768 = vst [vmem:[#allocation40_spill] sm:$0xff] %v11045_v30  ;;  %8620 = vtanh.f32 %v5059_v41  ;;  %v5064_v30 = vpop.f32.mrb[196].mxu1 }
 0x339   : > { %8622 = vtanh.f32 %v5061_v5  ;;  %v5065_v41 = vadd.f32 %v5064_v30, %v9620_v19  ;;  %v5066_v36 = vpop.f32.mrb[197].mxu1  ;;  %v903_v30 = vsel %vm884_vm8, %v10923_v43, %v10693_v46  ;;  %v901_v43 = vsel %vm884_vm8, %v10926_v17, %v10744_v51 }
 0x33a   : > { %8624 = vtanh.f32 %v4982_v20  ;;  %v5067_v14 = vadd.f32 %v5066_v36, %v9620_v19  ;;  %v4987_v20 = vpop.f32.mrb[198].mxu0  ;;  %v5070_v16 = vpop.f32.mrb[198].mxu1 }
 0x33b   : > { %v11082_v13 = vpop.permute.xlu0 %918  ;;  %8626 = vtanh.f32 %v4984_v7  ;;  %v4989_v22 = vpop.f32.mrb[199].mxu0  ;;  %v4988_v31 = vadd.f32 %v4987_v20, %v9699_v47 }
 0x33c   : > { %11770 = vst [vmem:[#allocation42_spill] sm:$0xff] %v11082_v13  ;;  %v980_v4 = vsel %vm960_vm9, %v11082_v13, %v10974_v62  ;;  %8628 = vtanh.f32 %v5065_v41  ;;  %v4990_v36 = vadd.f32 %v4989_v22, %v9699_v47  ;;  %v5072_v41 = vpop.f32.mrb[199].mxu1 }
 0x33d   : > { %v990_v24 = vadd.f32 %v980_v4, %v905_v59  ;;  %8630 = vtanh.f32 %v5067_v14  ;;  %v902_v4 = vsel %vm884_vm8, %v10693_v46, %v10926_v17  ;;  %v5073_v22 = vadd.f32 %v5072_v41, %v9699_v47 }
 0x33e   : > { %8632 = vtanh.f32 %v4990_v36  ;;  %v899_v46 = vsel %vm884_vm8, %v10931_v9, %v10767_v12 }
 0x33f   : > { %v923_v5 = vpop.permute.xlu0 %922  ;;  %8634 = vtanh.f32 %v5073_v22 }
 0x340   : > { %v978_v13 = vsel %vm960_vm9, %v923_v5, %v10983_v6  ;;  %v979_v7 = vsel %vm960_vm9, %v10974_v62, %v923_v5  ;;  %v1015_v62 = vsub.f32 %v990_v24, %v10986_v52  ;;  %v8617_v20 = vpop.eup %8616  ;;  %v900_v24 = vsel %vm884_vm8, %v10744_v51, %v10931_v9 }
 0x341   : > { %v991_v59 = vadd.f32 %v979_v7, %v904_v38  ;;  %v992_v5 = vadd.f32 %v978_v13, %v903_v30  ;;  %v5071_v7 = vadd.f32 %v5070_v16, %v9699_v47  ;;  %v8619_v13 = vpop.eup %8618  ;;  %v11156_v30 = vpop.permute.xlu1 %940  ;;  %8636 = vtanh.f32 %v4988_v31 }
 0x342   : > { %v8621_v41 = vpop.eup %8620  ;;  %v11161_v47 = vrot.slane %v11100_v45, %v8922_v10  ;;  %v11771_v9 = vsub.f32 %v10731_v1, %v10986_v52 }
 0x343   : > { %v927_v14 = vpop.permute.xlu0 %926  ;;  %v1016_v35 = vsub.f32 %v991_v59, %v11005_v0  ;;  %v1017_v16 = vsub.f32 %v992_v5, %v10991_v25  ;;  %v8623_v5 = vpop.eup %8622  ;;  %8638 = vtanh.f32 %v5071_v7 }
 0x344   : > { %v976_v38 = vsel %vm960_vm9, %v927_v14, %v11012_v32  ;;  %v977_v17 = vsel %vm960_vm9, %v10983_v6, %v927_v14  ;;  %v11166_v51 = vadd.f32 %v1015_v62, %v11771_v9  ;;  %v11772_v6 = vsub.f32 %v10737_v3, %v11005_v0  ;;  %v8625_v52 = vpop.eup %8624 }
 0x345   : > { %v993_v36 = vadd.f32 %v977_v17, %v902_v4  ;;  %v994_v59 = vadd.f32 %v976_v38, %v901_v43  ;;  %v897_v43 = vsel %vm884_vm8, %v10941_v48, %v10791_v58  ;;  %v898_v3 = vsel %vm884_vm8, %v10767_v12, %v10941_v48  ;;  %v8627_v62 = vpop.eup %8626 }
 0x346   : > { %v11171_v14 = vadd.f32 %v1016_v35, %v11772_v6  ;;  %v7778_v22 = vpack.c.bf16 %v8625_v52, %v8617_v20  ;;  %v11773_v17 = vsub.f32 %v10739_v34, %v10991_v25  ;;  %v8629_v7 = vpop.eup %8628  ;;  %v7776_v9 = vpack.c.bf16 %v8627_v62, %v8619_v13  ;;  %v11204_v34 = vpop.permute.xlu1 %944 }
 0x347   : > { %v931_v19 = vpop.permute.xlu0 %930  ;;  %v1018_v31 = vsub.f32 %v993_v36, %v11016_v54  ;;  %v1019_v38 = vsub.f32 %v994_v59, %v10994_v21  ;;  %v760_v48 = vcombine.high %v11100_v45, %v11100_v45  ;;  %v7782_v25 = vpack.c.bf16 %v8629_v7, %v8621_v41 }
 0x348   : > { %v974_v4 = vsel %vm960_vm9, %v931_v19, %v11067_v42  ;;  %v975_v1 = vsel %vm960_vm9, %v11012_v32, %v931_v19  ;;  %v11192_v36 = vadd.f32 %v1017_v16, %v11773_v17  ;;  %v11774_v19 = vsub.f32 %v10751_v49, %v11016_v54  ;;  %7777 = vmatprep.subr.bf16.mxu1 %v7776_v9 }
 0x349   : > { %v995_v0 = vadd.f32 %v975_v1, %v900_v24  ;;  %v996_v35 = vadd.f32 %v974_v4, %v899_v46  ;;  %v8631_v24 = vpop.eup %8630  ;;  %v11208_v49 = vcombine.high %v11120_v11, %v11120_v11  ;;  %7779 = vmatpush1.bf16.msra.mxu1 %v7778_v22  ;;  %v895_v41 = vsel %vm884_vm8, %v10947_v40, %v10811_v63 }
 0x34a   : > { %v11197_v32 = vadd.f32 %v1018_v31, %v11774_v19  ;;  %v7780_v45 = vpack.c.bf16 %v8631_v24, %v8623_v5  ;;  %v8633_v31 = vpop.eup %8632  ;;  %v896_v4 = vsel %vm884_vm8, %v10791_v58, %v10947_v40  ;;  %v11237_v52 = vrot.slane %v760_v48, %v8922_v10  ;;  %v11266_v9 = vpop.permute.xlu1 %948 }
 0x34b   : > { %v1020_v20 = vsub.f32 %v995_v0, %v11021_v29  ;;  %v935_v46 = vpop.permute.xlu0 %934  ;;  %v1021_v16 = vsub.f32 %v996_v35, %v10997_v23  ;;  %7297 = vmatprep.subr.msk.mxu1 %vm5739_vm6, %v8633_v31  ;;  %v8635_v40 = vpop.eup %8634  ;;  %v11778_v19 = vsub.f32 %v10789_v50, %v11029_v61 }
 0x34c   : > { %v972_v54 = vsel %vm960_vm9, %v935_v46, %v11112_v39  ;;  %v973_v13 = vsel %vm960_vm9, %v11067_v42, %v935_v46  ;;  %v11775_v42 = vsub.f32 %v10749_v55, %v10994_v21  ;;  %7781 = vmatprep.subr.bf16.mxu0 %v7780_v45  ;;  %v8637_v35 = vpop.eup %8636  ;;  %v11781_v46 = vld [vmem:[#allocation23_spill] sm:$0xff] }
 0x34d   : > { %v997_v59 = vadd.f32 %v973_v13, %v898_v3  ;;  %v998_v6 = vadd.f32 %v972_v54, %v897_v43  ;;  %v11776_v43 = vsub.f32 %v10769_v33, %v11021_v29  ;;  %v11241_v3 = vcombine.high %v11161_v47, %v11161_v47  ;;  %7783 = vmatpush1.bf16.msra.mxu0 %v7782_v25  ;;  %v11782_v25 = vld [vmem:[#allocation21_spill] sm:$0xff]  ;;  %v11794_v54 = vld [vmem:[#allocation39_spill] sm:$0xff]  ;;  %v11799_v33 = vld [vmem:[#allocation18_spill] sm:$0xff] }
 0x34e   : > { %v11228_v5 = vadd.f32 %v1019_v38, %v11775_v42  ;;  %7300 = vmatprep.subr.msk.mxu0 %vm5739_vm6, %v8635_v40  ;;  %v11777_v38 = vsub.f32 %v10771_v15, %v10997_v23  ;;  %7298 = vmatpush1.msk.msra.mxu1 %vm5739_vm6, %v8637_v35  ;;  %v11779_v15 = vld [vmem:[#allocation31_spill] sm:$0xff]  ;;  %v11289_v13 = vcombine.high %v11237_v52, %v11237_v52 }
 0x34f   : > { %v11233_v1 = vadd.f32 %v1020_v20, %v11776_v43  ;;  %v1022_v58 = vsub.f32 %v997_v59, %v11029_v61  ;;  %v939_v55 = vpop.permute.xlu0 %938  ;;  %v1023_v21 = vsub.f32 %v998_v6, %v11000_v2  ;;  %v893_v23 = vsel %vm884_vm8, %v11779_v15, %v10839_v53  ;;  %v8639_v61 = vpop.eup %8638  ;;  %v11780_v20 = vld [vmem:[#allocation29_spill] sm:$0xff]  ;;  %v8733_v6 = vld [vmem:[%s8930_s21 + $0x30] sm:$0x3] }
 0x350   : > { %v970_v29 = vsel %vm960_vm9, %v939_v55, %v11156_v30  ;;  %v971_v0 = vsel %vm960_vm9, %v11112_v39, %v939_v55  ;;  %v11259_v17 = vadd.f32 %v1021_v16, %v11777_v38  ;;  %v894_v50 = vsel %vm884_vm8, %v10811_v63, %v11779_v15  ;;  %7299 = vmatmul.mubr.msk.f32.vlgmr.msra.gmra.mrb[224].mxu1 %vm5735_vm7, %v11780_v20  ;;  %v5141_v59 = vpop.f32.mrb[200].mxu0  ;;  %v11787_v15 = vld [vmem:[#allocation24_spill] sm:$0xff] }
 0x351   : > { %v999_v62 = vadd.f32 %v971_v0, %v896_v4  ;;  %v11254_v22 = vadd.f32 %v970_v29, %v895_v41  ;;  %v11264_v7 = vadd.f32 %v1022_v58, %v11778_v19  ;;  %7301 = vmatpush1.msk.msra.mxu0 %vm5739_vm6, %v8639_v61  ;;  %v11783_v63 = vmov 0.0   ;;  %v11784_v41 = vld [vmem:[#allocation20_spill] sm:$0xff]  ;;  %v11785_v4 = vld [vmem:[#allocation33_spill] sm:$0xff]  ;;  %v5143_v40 = vpop.f32.mrb[201].mxu0  ;;  %v5224_v19 = vpop.f32.mrb[200].mxu1  ;;  %v11788_v61 = vld [vmem:[#allocation34_spill] sm:$0xff] }
 0x352   : > { %6305 = vmatprep.mubr.f32.mxu1 %v11783_v63  ;;  %v11295_v31 = vmul.f32 2.0, %v8733_v6  ;;  %v891_v42 = vsel %vm884_vm8, %v11785_v4, %v11784_v41  ;;  %v5142_v55 = vadd.f32 %v5141_v59, %v9689_v26  ;;  %7302 = vmatmul.mubr.msk.f32.vlgmr.msra.gmra.mrb[226].mxu0 %vm5735_vm7, %v11780_v20  ;;  %v11786_v35 = vsub.f32 %v10787_v27, %v11000_v2  ;;  %v11791_v59 = vld [vmem:[#allocation35_spill] sm:$0xff] }
 0x353   : > { %v1024_v45 = vsub.f32 %v999_v62, %v11033_v44  ;;  %v943_v16 = vpop.permute.xlu0 %942  ;;  %v5144_v38 = vadd.f32 %v5143_v40, %v9689_v26  ;;  %6376 = vmatprep.mubr.f32.mxu0 %v11783_v63  ;;  %v11789_v27 = vsub.f32 %v10807_v57, %v11033_v44  ;;  %v5147_v44 = vpop.f32.mrb[202].mxu0  ;;  %v11800_v12 = vsub.f32 %v11799_v33, %v11794_v54 }
 0x354   : > { %v968_v43 = vsel %vm960_vm9, %v943_v16, %v11204_v34  ;;  %v969_v58 = vsel %vm960_vm9, %v11156_v30, %v943_v16  ;;  %v11315_v62 = vadd.f32 %v1023_v21, %v11786_v35  ;;  %v892_v30 = vsel %vm884_vm8, %v10839_v53, %v11785_v4  ;;  %v11790_v53 = vld [vmem:[#allocation27_spill] sm:$0xff]  ;;  %v5149_v40 = vpop.f32.mrb[203].mxu0 }
 0x355   : > { %v1001_v29 = vadd.f32 %v969_v58, %v894_v50  ;;  %v11310_v0 = vadd.f32 %v968_v43, %v893_v23  ;;  %v889_v23 = vsel %vm884_vm8, %v11788_v61, %v11787_v15  ;;  %v11330_v2 = vadd.f32 %v1024_v45, %v11789_v27  ;;  %v5226_v50 = vpop.f32.mrb[201].mxu1  ;;  %v953_v43 = vpop.permute.xlu1 %952  ;;  %v11793_v27 = vld [vmem:[#allocation37_spill] sm:$0xff] }
 0x356   : > { %8640 = vtanh.f32 %v5142_v55  ;;  %v5225_v21 = vadd.f32 %v5224_v19, %v9689_v26  ;;  %v890_v16 = vsel %vm884_vm8, %v11784_v41, %v11788_v61  ;;  %v887_v6 = vsel %vm884_vm8, %v11791_v59, %v11790_v53  ;;  %v11792_v41 = vld [vmem:[#allocation5_spill] sm:$0xff]  ;;  %v5230_v61 = vpop.f32.mrb[202].mxu1 }
 0x357   : > { %v947_v4 = vpop.permute.xlu0 %946  ;;  %8642 = vtanh.f32 %v5144_v38  ;;  %v5227_v57 = vadd.f32 %v5226_v50, %v9689_v26  ;;  %v5148_v55 = vadd.f32 %v5147_v44, %v11792_v41  ;;  %v5150_v38 = vadd.f32 %v5149_v40, %v11792_v41  ;;  %v5232_v39 = vpop.f32.mrb[203].mxu1 }
 0x358   : > { %v966_v45 = vsel %vm960_vm9, %v947_v4, %v11266_v9  ;;  %v967_v58 = vsel %vm960_vm9, %v11204_v34, %v947_v4  ;;  %8644 = vtanh.f32 %v5225_v21  ;;  %v1025_v50 = vsub.f32 %v11254_v22, %v11793_v27  ;;  %v5236_v40 = vpop.f32.mrb[204].mxu1 }
 0x359   : > { %v1003_v35 = vadd.f32 %v967_v58, %v892_v30  ;;  %v1004_v19 = vadd.f32 %v966_v45, %v891_v42  ;;  %8646 = vtanh.f32 %v5227_v57  ;;  %v1026_v24 = vsub.f32 %v1001_v29, %v11794_v54  ;;  %v11795_v30 = vld [vmem:[#allocation41_spill] sm:$0xff]  ;;  %v5153_v57 = vpop.f32.mrb[204].mxu0  ;;  %v957_v58 = vpop.permute.xlu1 %956 }
 0x35a   : > { %8648 = vtanh.f32 %v5148_v55  ;;  %v5231_v48 = vadd.f32 %v5230_v61, %v11792_v41  ;;  %v888_v34 = vsel %vm884_vm8, %v11787_v15, %v11791_v59  ;;  %v1027_v42 = vsub.f32 %v11310_v0, %v11795_v30  ;;  %v5155_v44 = vpop.f32.mrb[205].mxu0  ;;  %v11796_v0 = vld [vmem:[#allocation7_spill] sm:$0xff] }
 0x35b   : > { %v951_v21 = vpop.permute.xlu0 %950  ;;  %8650 = vtanh.f32 %v5150_v38  ;;  %v5233_v4 = vadd.f32 %v5232_v39, %v11792_v41  ;;  %v1028_v45 = vsub.f32 %v1003_v35, %v11092_v60  ;;  %v5156_v55 = vadd.f32 %v5155_v44, %v11796_v0  ;;  %v11797_v39 = vld [vmem:[#allocation16_spill] sm:$0xff]  ;;  %v5238_v35 = vpop.f32.mrb[205].mxu1 }
 0x35c   : > { %v964_v22 = vsel %vm960_vm9, %v951_v21, %v953_v43  ;;  %v965_v29 = vsel %vm960_vm9, %v11266_v9, %v951_v21  ;;  %8652 = vtanh.f32 %v5231_v48  ;;  %v11798_v38 = vsub.f32 %v11797_v39, %v11793_v27 }
 0x35d   : > { %v1005_v15 = vadd.f32 %v965_v29, %v890_v16  ;;  %v1006_v59 = vadd.f32 %v964_v22, %v889_v23  ;;  %8654 = vtanh.f32 %v5233_v4  ;;  %v11376_v9 = vadd.f32 %v1026_v24, %v11800_v12  ;;  %v11801_v16 = vld [vmem:[#allocation28_spill] sm:$0xff] }
 0x35e   : > { %v11371_v61 = vadd.f32 %v1025_v50, %v11798_v38  ;;  %v5154_v48 = vadd.f32 %v5153_v57, %v11796_v0  ;;  %v11802_v23 = vld [vmem:[#allocation36_spill] sm:$0xff]  ;;  %v1029_v4 = vsub.f32 %v1004_v19, %v11120_v11  ;;  %8656 = vtanh.f32 %v5156_v55  ;;  %v11803_v55 = vld [vmem:[#allocation17_spill] sm:$0xff] }
 0x35f   : > { %v885_v21 = vsel %vm884_vm8, %v11802_v23, %v11801_v16  ;;  %v1030_v22 = vsub.f32 %v1005_v15, %v11208_v49  ;;  %v955_v27 = vpop.permute.xlu0 %954  ;;  %v5239_v50 = vadd.f32 %v5238_v35, %v11796_v0  ;;  %v5237_v54 = vadd.f32 %v5236_v40, %v11796_v0 }
 0x360   : > { %v962_v12 = vsel %vm960_vm9, %v955_v27, %v957_v58  ;;  %v963_v33 = vsel %vm960_vm9, %v953_v43, %v955_v27  ;;  %v8641_v24 = vpop.eup %8640  ;;  %v886_v19 = vsel %vm884_vm8, %v11790_v53, %v11802_v23  ;;  %v1031_v15 = vsub.f32 %v1006_v59, %v11161_v47  ;;  %v11809_v27 = vld [vmem:[#allocation38_spill] sm:$0xff] }
 0x361   : > { %v1007_v57 = vadd.f32 %v963_v33, %v888_v34  ;;  %v1008_v29 = vadd.f32 %v962_v12, %v887_v6  ;;  %v8643_v44 = vpop.eup %8642  ;;  %8658 = vtanh.f32 %v5239_v50  ;;  %v11804_v39 = vsub.f32 %v11803_v55, %v11795_v30 }
 0x362   : > { %v11805_v43 = vsub.f32 %v10859_v56, %v11092_v60  ;;  %v8645_v35 = vpop.eup %8644  ;;  %8660 = vtanh.f32 %v5154_v48  ;;  %v11806_v6 = vsub.f32 %v10861_v18, %v11120_v11  ;;  %v11807_v30 = vsub.f32 %v10871_v37, %v11208_v49  ;;  %v11808_v56 = vld [vmem:[#allocation25_spill] sm:$0xff] }
 0x363   : > { %v11399_v38 = vadd.f32 %v1027_v42, %v11804_v39  ;;  %v1032_v53 = vsub.f32 %v1007_v57, %v11241_v3  ;;  %v959_v34 = vpop.permute.xlu0 %958  ;;  %v8647_v59 = vpop.eup %8646  ;;  %v783_v60 = vrot.slane %v11295_v31, %v8922_v10  ;;  %8662 = vtanh.f32 %v5237_v54 }
 0x364   : > { %v11404_v40 = vadd.f32 %v1028_v45, %v11805_v43  ;;  %v11410_v23 = vadd.f32 %v1029_v4, %v11806_v6  ;;  %v11415_v42 = vadd.f32 %v1030_v22, %v11807_v30  ;;  %v832_v45 = vsub.f32 %v11808_v56, %v11289_v13  ;;  %v8649_v11 = vpop.eup %8648 }
 0x365   : > { %v961_v48 = vsel %vm960_vm9, %v957_v58, %v959_v34  ;;  %v985_v18 = vsel %vm960_vm9, %v959_v34, %v11809_v27  ;;  %v1033_v37 = vsub.f32 %v1008_v29, %v11237_v52  ;;  %v8651_v22 = vpop.eup %8650  ;;  %v7786_v50 = vpack.c.bf16 %v8649_v11, %v8641_v24 }
 0x366   : > { %v1009_v49 = vadd.f32 %v961_v48, %v886_v19  ;;  %v1010_v4 = vadd.f32 %v985_v18, %v885_v21  ;;  %v11810_v31 = vsub.f32 %v10867_v8, %v11161_v47  ;;  %v11811_v58 = vsub.f32 %v11781_v46, %v11241_v3  ;;  %v8653_v57 = vpop.eup %8652  ;;  %v11812_v19 = vld [vmem:[#allocation26_spill] sm:$0xff] }
 0x367   : > { %v7784_v55 = vpack.c.bf16 %v8651_v22, %v8643_v44  ;;  %v8655_v39 = vpop.eup %8654  ;;  %v7790_v29 = vpack.c.bf16 %v8653_v57, %v8645_v35  ;;  %v833_v21 = vsub.f32 %v11812_v19, %v783_v60  ;;  %v11813_v47 = vsub.f32 %v11782_v25, %v11237_v52 }
 0x368   : > { %v11430_v12 = vadd.f32 %v1031_v15, %v11810_v31  ;;  %v11435_v33 = vadd.f32 %v1032_v53, %v11811_v58  ;;  %v1034_v54 = vsub.f32 %v1009_v49, %v11289_v13  ;;  %v7788_v24 = vpack.c.bf16 %v8655_v39, %v8647_v59  ;;  %v8657_v3 = vpop.eup %8656 }
 0x369   : > { %7785 = vmatprep.subr.bf16.mxu1 %v7784_v55  ;;  %v1035_v43 = vsub.f32 %v1010_v4, %v783_v60  ;;  %v11442_v8 = vadd.f32 %v1033_v37, %v11813_v47 }
 0x36a   : > { %v11444_v15 = vadd.f32 %v1034_v54, %v832_v45  ;;  %7787 = vmatpush1.bf16.msra.mxu1 %v7786_v50  ;;  %7789 = vmatprep.subr.bf16.mxu0 %v7788_v24 }
 0x36b   : > { %7303 = vmatprep.subr.msk.mxu1 %vm5739_vm6, %v8657_v3  ;;  %v8659_v46 = vpop.eup %8658  ;;  %7791 = vmatpush1.bf16.msra.mxu0 %v7790_v29  ;;  %v11448_v44 = vadd.f32 %v1035_v43, %v833_v21 }
 0x36c   : > { %v8661_v13 = vpop.eup %8660  ;;  %7306 = vmatprep.subr.msk.mxu0 %vm5739_vm6, %v8659_v46  ;;  %v5307_v52 = vpop.f32.mrb[206].mxu0 }
 0x36d   : > { %v8663_v35 = vpop.eup %8662  ;;  %v5308_v25 = vadd.f32 %v5307_v52, %v9689_v26  ;;  %v5309_v53 = vpop.f32.mrb[207].mxu0 }
 0x36e   : > { %7304 = vmatpush1.msk.msra.mxu1 %vm5739_vm6, %v8661_v13  ;;  %v5310_v34 = vadd.f32 %v5309_v53, %v9689_v26  ;;  %v5390_v6 = vpop.f32.mrb[206].mxu1 }
 0x36f   : > { %7305 = vmatmul.mubr.msk.f32.vlgmr.msra.gmra.mrb[226].mxu1 %vm5735_vm7, %v11780_v20  ;;  %7307 = vmatpush1.msk.msra.mxu0 %vm5739_vm6, %v8663_v35  ;;  %8664 = vtanh.f32 %v5308_v25  ;;  %v5391_v30 = vadd.f32 %v5390_v6, %v9689_v26  ;;  %v5392_v59 = vpop.f32.mrb[207].mxu1 }
 0x370   : > { %6447 = vmatprep.mubr.f32.mxu1 %v11783_v63  ;;  %7308 = vmatmul.mubr.msk.f32.vlgmr.msra.gmra.mrb[228].mxu0 %vm5735_vm7, %v11780_v20  ;;  %8666 = vtanh.f32 %v5310_v34  ;;  %v5393_v60 = vadd.f32 %v5392_v59, %v9689_v26  ;;  %v5313_v56 = vpop.f32.mrb[208].mxu0 }
 0x371   : > { %6518 = vmatprep.mubr.f32.mxu0 %v11783_v63  ;;  %8668 = vtanh.f32 %v5391_v30  ;;  %v5314_v45 = vadd.f32 %v5313_v56, %v11792_v41  ;;  %v5315_v48 = vpop.f32.mrb[209].mxu0 }
 0x372   : > { %8670 = vtanh.f32 %v5393_v60  ;;  %v5316_v18 = vadd.f32 %v5315_v48, %v11792_v41  ;;  %v5396_v11 = vpop.f32.mrb[208].mxu1 }
 0x373   : > { %8672 = vtanh.f32 %v5314_v45  ;;  %v5397_v37 = vadd.f32 %v5396_v11, %v11792_v41  ;;  %v5398_v49 = vpop.f32.mrb[209].mxu1 }
 0x374   : > { %8674 = vtanh.f32 %v5316_v18  ;;  %v5399_v4 = vadd.f32 %v5398_v49, %v11792_v41 }
 0x375   : > { %v5319_v22 = vpop.f32.mrb[210].mxu0  ;;  %8676 = vtanh.f32 %v5397_v37 }
 0x376   : > { %v5321_v50 = vpop.f32.mrb[211].mxu0  ;;  %8678 = vtanh.f32 %v5399_v4  ;;  %v5320_v57 = vadd.f32 %v5319_v22, %v11796_v0 }
 0x377   : > { %v5322_v31 = vadd.f32 %v5321_v50, %v11796_v0  ;;  %v5402_v58 = vpop.f32.mrb[210].mxu1 }
 0x378   : > { %v5404_v55 = vpop.f32.mrb[211].mxu1  ;;  %v5403_v29 = vadd.f32 %v5402_v58, %v11796_v0 }
 0x379   : > { %8680 = vtanh.f32 %v5322_v31  ;;  %v5405_v54 = vadd.f32 %v5404_v55, %v11796_v0  ;;  %v8665_v39 = vpop.eup %8664 }
 0x37a   : > { %v8667_v19 = vpop.eup %8666 }
 0x37b   : > { %8682 = vtanh.f32 %v5405_v54  ;;  %v8669_v21 = vpop.eup %8668 }
 0x37c   : > { %8684 = vtanh.f32 %v5320_v57  ;;  %v8671_v24 = vpop.eup %8670 }
 0x37d   : > { %v8673_v43 = vpop.eup %8672  ;;  %8686 = vtanh.f32 %v5403_v29 }
 0x37e   : > { %v8675_v47 = vpop.eup %8674  ;;  %v7794_v3 = vpack.c.bf16 %v8673_v43, %v8665_v39 }
 0x37f   : > { %v8677_v46 = vpop.eup %8676  ;;  %v7792_v13 = vpack.c.bf16 %v8675_v47, %v8667_v19 }
 0x380   : > { %v8679_v35 = vpop.eup %8678  ;;  %v7798_v52 = vpack.c.bf16 %v8677_v46, %v8669_v21 }
 0x381   : > { %7793 = vmatprep.subr.bf16.mxu1 %v7792_v13  ;;  %v7796_v25 = vpack.c.bf16 %v8679_v35, %v8671_v24 }
 0x382   : > { %7795 = vmatpush1.bf16.msra.mxu1 %v7794_v3 }
 0x383   : > { %v8681_v53 = vpop.eup %8680  ;;  %7797 = vmatprep.subr.bf16.mxu0 %v7796_v25 }
 0x384   : > { %7309 = vmatprep.subr.msk.mxu1 %vm5739_vm6, %v8681_v53  ;;  %7799 = vmatpush1.bf16.msra.mxu0 %v7798_v52 }
 0x385   : > { %v8683_v34 = vpop.eup %8682 }
 0x386   : > { %v8685_v6 = vpop.eup %8684  ;;  %7312 = vmatprep.subr.msk.mxu0 %vm5739_vm6, %v8683_v34 }
 0x387   : > { %7310 = vmatpush1.msk.msra.mxu1 %vm5739_vm6, %v8685_v6  ;;  %v8687_v30 = vpop.eup %8686 }
 0x388   : > { %7311 = vmatmul.mubr.msk.f32.vlgmr.msra.gmra.mrb[228].mxu1 %vm5735_vm7, %v11780_v20  ;;  %7313 = vmatpush1.msk.msra.mxu0 %vm5739_vm6, %v8687_v30 }
 0x389   : > { %6589 = vmatprep.mubr.f32.mxu1 %v11783_v63  ;;  %7314 = vmatmul.mubr.msk.f32.vlgmr.msra.gmra.mrb[230].mxu0 %vm5735_vm7, %v11780_v20 }
 0x38a   : > { %6660 = vmatprep.mubr.f32.mxu0 %v11783_v63 }
 0x38c   : > { %v5473_v59 = vpop.f32.mrb[212].mxu0 }
 0x38d   : > { %v5474_v60 = vadd.f32 %v5473_v59, %v9689_v26  ;;  %v5475_v56 = vpop.f32.mrb[213].mxu0 }
 0x38e   : > { %v5476_v45 = vadd.f32 %v5475_v56, %v9689_v26  ;;  %v5556_v48 = vpop.f32.mrb[212].mxu1 }
 0x38f   : > { %8688 = vtanh.f32 %v5474_v60  ;;  %v5557_v18 = vadd.f32 %v5556_v48, %v9689_v26  ;;  %v5558_v11 = vpop.f32.mrb[213].mxu1 }
 0x390   : > { %8690 = vtanh.f32 %v5476_v45  ;;  %v5559_v37 = vadd.f32 %v5558_v11, %v9689_v26  ;;  %v5479_v49 = vpop.f32.mrb[214].mxu0  ;;  %v8734_v11 = vld [vmem:[%s11684_s7] sm:$0x3] }
 0x391   : > { %8692 = vtanh.f32 %v5557_v18  ;;  %v5480_v4 = vadd.f32 %v5479_v49, %v11792_v41  ;;  %v5481_v22 = vpop.f32.mrb[215].mxu0  ;;  %v11814_v49 = vmov 0.0|0.0  }
 0x392   : > { %8694 = vtanh.f32 %v5559_v37  ;;  %v5482_v20 = vadd.f32 %v5481_v22, %v11792_v41  ;;  %v5562_v50 = vpop.f32.mrb[214].mxu1 }
 0x393   : > { %8696 = vtanh.f32 %v5480_v4  ;;  %v5563_v31 = vadd.f32 %v5562_v50, %v11792_v41  ;;  %v5564_v58 = vpop.f32.mrb[215].mxu1 }
 0x394   : > { %8698 = vtanh.f32 %v5482_v20  ;;  %v5565_v57 = vadd.f32 %v5564_v58, %v11792_v41  ;;  %v5485_v55 = vpop.f32.mrb[216].mxu0 }
 0x395   : > { %8700 = vtanh.f32 %v5563_v31  ;;  %v5487_v54 = vpop.f32.mrb[217].mxu0  ;;  %v5486_v19 = vadd.f32 %v5485_v55, %v11796_v0 }
 0x396   : > { %8702 = vtanh.f32 %v5565_v57  ;;  %v5488_v39 = vadd.f32 %v5487_v54, %v11796_v0  ;;  %v5568_v29 = vpop.f32.mrb[216].mxu1 }
 0x397   : > { %v5570_v21 = vpop.f32.mrb[217].mxu1  ;;  %v5569_v47 = vadd.f32 %v5568_v29, %v11796_v0 }
 0x398   : > { %8704 = vtanh.f32 %v5488_v39  ;;  %v5571_v24 = vadd.f32 %v5570_v21, %v11796_v0  ;;  %v11816_v21 = vld [vmem:[#allocation8_spill] sm:$0xff] }
 0x399   : > { %v8689_v43 = vpop.eup %8688 }
 0x39a   : > { %v8691_v3 = vpop.eup %8690  ;;  %8706 = vtanh.f32 %v5571_v24  ;;  %v11817_v24 = vld [vmem:[#allocation10_spill] sm:$0xff] }
 0x39b   : > { %v8693_v46 = vpop.eup %8692  ;;  %8708 = vtanh.f32 %v5486_v19  ;;  %v11815_v19 = vld [vmem:[#allocation6_spill] sm:$0xff] }
 0x39c   : > { %v8695_v13 = vpop.eup %8694  ;;  %8710 = vtanh.f32 %v5569_v47 }
 0x39d   : > { %v8697_v35 = vpop.eup %8696 }
 0x39e   : > { %v8699_v52 = vpop.eup %8698  ;;  %v7802_v25 = vpack.c.bf16 %v8697_v35, %v8689_v43  ;;  %v909_v43 = vsel %vm884_vm8, %v11801_v16, %v11817_v24 }
 0x39f   : > { %v8701_v53 = vpop.eup %8700  ;;  %v7800_v34 = vpack.c.bf16 %v8699_v52, %v8691_v3  ;;  %v11819_v3 = vld [vmem:[#allocation11_spill] sm:$0xff] }
 0x3a0   : > { %v8703_v6 = vpop.eup %8702  ;;  %v7806_v30 = vpack.c.bf16 %v8701_v53, %v8693_v46  ;;  %v11821_v52 = vld [vmem:[#allocation19_spill] sm:$0xff]  ;;  %v11822_v53 = vld [vmem:[#allocation40_spill] sm:$0xff] }
 0x3a1   : > { %7801 = vmatprep.subr.bf16.mxu1 %v7800_v34  ;;  %v7804_v59 = vpack.c.bf16 %v8703_v6, %v8695_v13  ;;  %v11820_v13 = vld [vmem:[#allocation30_spill] sm:$0xff] }
 0x3a2   : > { %v8705_v60 = vpop.eup %8704  ;;  %7803 = vmatpush1.bf16.msra.mxu1 %v7802_v25  ;;  %v5639_v48 = vpop.f32.mrb[218].mxu0  ;;  %v984_v35 = vsel %vm960_vm9, %v11809_v27, %v11820_v13  ;;  %v908_v25 = vsel %vm884_vm8, %v11817_v24, %v11821_v52  ;;  %v983_v16 = vsel %vm960_vm9, %v11820_v13, %v11822_v53 }
 0x3a3   : > { %7315 = vmatprep.subr.msk.mxu1 %vm5739_vm6, %v8705_v60  ;;  %7805 = vmatprep.subr.bf16.mxu0 %v7804_v59  ;;  %v7438_v37 = vpop.f32.mrb[219].mxu0  ;;  %v5640_v4 = vadd.f32 %v5639_v48, %v9689_v26  ;;  %v987_v60 = vadd.f32 %v983_v16, %v908_v25  ;;  %v11824_v48 = vld [vmem:[#allocation32_spill] sm:$0xff] }
 0x3a4   : > { %v8707_v56 = vpop.eup %8706  ;;  %7807 = vmatpush1.bf16.msra.mxu0 %v7806_v30  ;;  %v986_v30 = vadd.f32 %v984_v35, %v909_v43  ;;  %v11825_v37 = vld [vmem:[#allocation22_spill] sm:$0xff] }
 0x3a5   : > { %v8709_v45 = vpop.eup %8708  ;;  %7318 = vmatprep.subr.msk.mxu0 %vm5739_vm6, %v8707_v56  ;;  %8712 = vtanh.f32 %v5640_v4 }
 0x3a6   : > { %7316 = vmatpush1.msk.msra.mxu1 %vm5739_vm6, %v8709_v45  ;;  %v8711_v18 = vpop.eup %8710  ;;  %v5644_v22 = vpop.f32.mrb[220].mxu0  ;;  %v11823_v45 = vld [vmem:[#allocation12_spill] sm:$0xff] }
 0x3a7   : > { %7317 = vmatmul.mubr.msk.f32.vlgmr.msra.gmra.mrb[230].mxu1 %vm5735_vm7, %v8734_v11  ;;  %7808 = vmatprep.subr.bf16.mxu1 %v11814_v49  ;;  %v5645_v20 = vadd.f32 %v5644_v22, %v11792_v41  ;;  %v7441_v50 = vpop.f32.mrb[221].mxu0  ;;  %v8735_v41 = vld [vmem:[%s8930_s21] sm:$0xff]  ;;  %v907_v27 = vsel %vm884_vm8, %v11821_v52, %v11823_v45  ;;  %v906_v49 = vsel %vm884_vm8, %v11823_v45, %v11825_v37  ;;  %v11826_v22 = vld [vmem:[#allocation42_spill] sm:$0xff]  ;;  %s324_s21 = sand.u32 1, %s8791_s10  }
 0x3a8   : > { %7319 = vmatpush1.msk.msra.mxu0 %vm5739_vm6, %v8711_v18  ;;  %7451 = vmatprep.mubr.msk.f32.mxu1 %vm8807_vm2, %v11783_v63  ;;  %v661_v29 = vmul.f32 2.0, %v8735_v41  ;;  %v982_v18 = vsel %vm960_vm9, %v11822_v53, %v11824_v48  ;;  %v11827_v50 = vld [vmem:[#allocation14_spill] sm:$0xff]  ;;  %v11828_v41 = vld [vmem:[#allocation13_spill] sm:$0xff]  ;;  %s7811_s27 = smul.u32 50, %s324_s21  ;;  %s6911_s13 = scalar_lea.sflag [#allocation3], %s324_s21 }
 0x3a9   : > { %7320 = vmatmul.mubr.msk.f32.vlgmr.msra.gmra.mrb[232].mxu0 %vm5735_vm7, %v8734_v11  ;;  %8714 = vtanh.f32 %v5645_v20  ;;  %v981_v20 = vsel %vm960_vm9, %v11824_v48, %v11826_v22 }
 0x3aa   : > { %v5649_v31 = vpop.f32.mrb[222].mxu0  ;;  %v682_v47 = vrot.slane %v661_v29, %v8922_v10  ;;  %v675_v34 = vcombine.high %v661_v29, %v661_v29  ;;  %s11567_s28 = scalar_lea.vmem [#allocation2], %s7811_s27 }
 0x3ab   : > { %v5650_v58 = vadd.f32 %v5649_v31, %v11796_v0  ;;  %v7444_v57 = vpop.f32.mrb[223].mxu0  ;;  %v559_v0 = vsel %vm534_vm4, %v11816_v21, %v11815_v19  ;;  %v11555_v21 = vpop.permute.xlu1 %5732  ;;  %s6925_s16 = sshll.u32 %s11567_s28, 4  ;;  %s11634_s16 = int_to_ptr.vmem [resolvable:$true] %s6925_s16 }
 0x3ac   : > { %v690_v59 = vcombine.high %v682_v47, %v682_v47  ;;  %v689_v56 = vrot.slane %v675_v34, %v8922_v10  ;;  %v1011_v4 = vsub.f32 %v986_v30, %v682_v47  ;;  %v988_v57 = vadd.f32 %v982_v18, %v907_v27  ;;  %s8737_s24 = scalar_lea.vmem %s11634_s16, 800  ;;  %p8744_p0 = scmp.lt.s32.totalorder %s11634_s16, %s8742_s25 }
 0x3ad   : > { %8716 = vtanh.f32 %v5650_v58  ;;  %p8738_p11 = scmp.ne.s32.totalorder %s11634_s16, %s8737_s24  ;;  %p8745_p1 = scmp.lt.s32.totalorder %s8743_s26, %s8737_s24 }
 0x3ae   : > { %v810_v31 = vsub.f32 %v11827_v50, %v690_v59  ;;  %v1012_v58 = vsub.f32 %v987_v60, %v690_v59  ;;  %v811_v29 = vsub.f32 %v11828_v41, %v689_v56  ;;  %v1013_v19 = vsub.f32 %v988_v57, %v689_v56 }
 0x3af   : > { %v8713_v26 = vpop.eup %8712  ;;  %v1066_v50 = vmul.f32 0.001, %v11171_v14  ;;  %v1068_v41 = vmul.f32 0.001, %v11197_v32  ;;  %v1070_v32 = vmul.f32 0.001, %v11233_v1  ;;  %p8739_p12 = pnand %p8738_p11, %p8899_p5  ;;  %p8746_p2 = por %p8745_p1, %p8744_p0 }
 0x3b0   : > { %v1038_v52 = vadd.f32 %v1013_v19, %v811_v29 }
 0x3b1   : > { %p8740_p13 = pneg %p8739_p12 }
 0x3b3   : > { %v8715_v55 = vpop.eup %8714  ;;  %p8747_p3 = pnand %p8746_p2, %p8740_p13 }
 0x3b4   : > { %v7809_v54 = vpack.c.bf16 %v8715_v55, %v8713_v26  ;;  %v691_v26 = vcombine.high %v689_v56, %v689_v56  ;;  %v989_v55 = vadd.f32 %v981_v20, %v906_v49 }
 0x3b6   : > { %7810 = vmatpush3.bf16.msra.mxu1 %v7809_v54  ;;  %v1014_v43 = vsub.f32 %v989_v55, %v691_v26 }
 0x3b7   : > { %7449 = vmatprep.subr.mxu1 %v11783_v63  ;;  %v8717_v39 = vpop.eup %8716  ;;  %v11818_v63 = vld [vmem:[#allocation9_spill] sm:$0xff] }
 0x3b8   : > { %v634_v46 = vsel %vm610_vm5, %v11819_v3, %v11818_v63 }
 0x3b9   : > { %v636_v6 = vadd.f32 %v634_v46, %v559_v0  ;;  %v11829_v0 = vld [vmem:[#allocation15_spill] sm:$0xff] }
 0x3ba   : > { %7450 = vmatpush3.msk.msra.mxu1 %vm5739_vm6, %v8717_v39  ;;  %v1037_v39 = vadd.f32 %v1012_v58, %v810_v31  ;;  %v812_v24 = vsub.f32 %v11829_v0, %v691_v26  ;;  %v1067_v26 = vmul.f32 0.001, %v11192_v36  ;;  %v1069_v36 = vmul.f32 0.001, %v11228_v5 }
 0x3bb   : > { %7452 = vmatmul.mubr.msk.f32.vlgmr.msra.gmra.mrb[232].mxu1 %vm5735_vm7, %v8734_v11  ;;  %v809_v11 = vsub.f32 %v636_v6, %v682_v47  ;;  %v1063_v6 = vmul.f32 0.001, %v1038_v52  ;;  %v1071_v52 = vmul.f32 0.001, %v11259_v17  ;;  %v1073_v17 = vmul.f32 0.001, %v11315_v62 }
 0x3bc   : > { %v1062_v46 = vmul.f32 0.001, %v1037_v39  ;;  %v1039_v53 = vadd.f32 %v1014_v43, %v812_v24 }
 0x3bd   : > { %v1036_v54 = vadd.f32 %v1011_v4, %v809_v11  ;;  %v1065_v4 = vmul.f32 0.001, %v11166_v51 }
 0x3be   : > { %v1064_v60 = vmul.f32 0.001, %v1039_v53 }
 0x3bf   : > { %v1061_v28 = vmul.f32 0.001, %v1036_v54 }
 0x3e2   : > { %v5881_v47 = vpop.f32.mrb[218].mxu1 }
 0x3e3   : > { %v5882_v63 = vadd.f32 %v5881_v47, %v11555_v21  ;;  %v5883_v3 = vpop.f32.mrb[219].mxu1 }
 0x3e4   : > { %v5884_v13 = vadd.f32 %v5883_v3, %v11555_v21 }
 0x3e5   : > { %v6737_v35 = vadd.f32 %v5882_v63, %v1061_v28 }
 0x3e6   : > { %v6738_v25 = vadd.f32 %v5884_v13, %v1062_v46 }
 0x3e8   : > { %v6787_v16 = vcombine.low %v6737_v35, %v6738_v25  ;;  %v5952_v34 = vpop.f32.mrb[220].mxu1 }
 0x3e9   : > { %v5953_v30 = vadd.f32 %v5952_v34, %v11555_v21  ;;  %v5954_v59 = vpop.f32.mrb[221].mxu1  ;;  %v1072_v34 = vmul.f32 0.001, %v11264_v7  ;;  %v1074_v7 = vmul.f32 0.001, %v11330_v2 }
 0x3ea   : > { %v5955_v56 = vadd.f32 %v5954_v59, %v11555_v21  ;;  %v6795_v18 = vrot.slane %v6787_v16, %v8922_v10 }
 0x3eb   : > { %v6739_v45 = vadd.f32 %v5953_v30, %v1063_v6 }
 0x3ec   : > { %v6740_v27 = vadd.f32 %v5955_v56, %v1064_v60 }
 0x3ee   : > { %v6788_v48 = vcombine.low %v6739_v45, %v6740_v27 }
 0x3f0   : > { %v6802_v11 = vrot.slane %v6788_v48, %v8922_v10 }
 0x3f2   : > { %v6803_v37 = vcombine.low %v6795_v18, %v6802_v11 }
 0x3f4   : > { %6903 = vst [vmem:[%s11567_s28] sm:$0xff] %v6803_v37 }
 0x400   : > { %v6023_v49 = vpop.f32.mrb[222].mxu1 }
 0x401   : > { %v6024_v22 = vadd.f32 %v6023_v49, %v11555_v21  ;;  %v6025_v20 = vpop.f32.mrb[223].mxu1  ;;  %v6094_v58 = vpop.f32.mrb[224].mxu0 }
 0x402   : > { %v6026_v31 = vadd.f32 %v6025_v20, %v11555_v21  ;;  %v6095_v55 = vadd.f32 %v6094_v58, %v11555_v21  ;;  %v6096_v54 = vpop.f32.mrb[225].mxu0 }
 0x403   : > { %v6741_v57 = vadd.f32 %v6024_v22, %v1065_v4  ;;  %v6097_v51 = vadd.f32 %v6096_v54, %v11555_v21  ;;  %v1075_v4 = vmul.f32 0.001, %v11371_v61  ;;  %v1077_v61 = vmul.f32 0.001, %v11399_v38 }
 0x404   : > { %v6742_v39 = vadd.f32 %v6026_v31, %v1066_v50  ;;  %v6743_v29 = vadd.f32 %v6095_v55, %v1067_v26  ;;  %v1076_v31 = vmul.f32 0.001, %v11376_v9  ;;  %v1078_v9 = vmul.f32 0.001, %v11404_v40 }
 0x405   : > { %v6744_v0 = vadd.f32 %v6097_v51, %v1068_v41 }
 0x406   : > { %v6804_v19 = vcombine.low %v6741_v57, %v6742_v39 }
 0x407   : > { %v6805_v24 = vcombine.low %v6743_v29, %v6744_v0 }
 0x408   : > { %v6812_v14 = vrot.slane %v6804_v19, %v8922_v10 }
 0x409   : > { %v6819_v43 = vrot.slane %v6805_v24, %v8922_v10 }
 0x40b   : > { %v6820_v47 = vcombine.low %v6812_v14, %v6819_v43  ;;  %v1079_v14 = vmul.f32 0.001, %v11410_v23  ;;  %v1081_v23 = vmul.f32 0.001, %v11430_v12  ;;  %v1084_v12 = vmul.f32 0.001, %v11444_v15 }
 0x40c   : > { %v1085_v15 = vmul.f32 0.001, %v11448_v44 }
 0x40d   : > { %6904 = vst [vmem:[%s11567_s28 + $0x8] sm:$0xff] %v6820_v47 }
 0x423   : > { %v6165_v28 = vpop.f32.mrb[224].mxu1 }
 0x424   : > { %v6166_v63 = vadd.f32 %v6165_v28, %v11555_v21  ;;  %v6167_v3 = vpop.f32.mrb[225].mxu1 }
 0x425   : > { %v6168_v46 = vadd.f32 %v6167_v3, %v11555_v21  ;;  %v6236_v13 = vpop.f32.mrb[226].mxu0 }
 0x426   : > { %v6745_v35 = vadd.f32 %v6166_v63, %v1069_v36  ;;  %v6237_v25 = vadd.f32 %v6236_v13, %v11555_v21  ;;  %v6238_v53 = vpop.f32.mrb[227].mxu0  ;;  %v1080_v36 = vmul.f32 0.001, %v11415_v42  ;;  %v1082_v42 = vmul.f32 0.001, %v11435_v33 }
 0x427   : > { %v6746_v16 = vadd.f32 %v6168_v46, %v1070_v32  ;;  %v6239_v5 = vadd.f32 %v6238_v53, %v11555_v21 }
 0x428   : > { %v6747_v6 = vadd.f32 %v6237_v25, %v1071_v52 }
 0x429   : > { %v6821_v30 = vcombine.low %v6745_v35, %v6746_v16  ;;  %v6748_v59 = vadd.f32 %v6239_v5, %v1072_v34 }
 0x42b   : > { %v6822_v60 = vcombine.low %v6747_v6, %v6748_v59  ;;  %v6829_v1 = vrot.slane %v6821_v30, %v8922_v10  ;;  %v1083_v6 = vmul.f32 0.001, %v11442_v8 }
 0x42d   : > { %v6836_v56 = vrot.slane %v6822_v60, %v8922_v10 }
 0x42f   : > { %v6837_v45 = vcombine.low %v6829_v1, %v6836_v56 }
 0x431   : > { %6905 = vst [vmem:[%s11567_s28 + $0x10] sm:$0xff] %v6837_v45 }
 0x442   : > { %v6307_v27 = vpop.f32.mrb[226].mxu1 }
 0x443   : > { %v6308_v48 = vadd.f32 %v6307_v27, %v11555_v21  ;;  %v6309_v18 = vpop.f32.mrb[227].mxu1  ;;  %v6378_v37 = vpop.f32.mrb[228].mxu0 }
 0x444   : > { %v6310_v11 = vadd.f32 %v6309_v18, %v11555_v21  ;;  %v6379_v22 = vadd.f32 %v6378_v37, %v11555_v21  ;;  %v6380_v20 = vpop.f32.mrb[229].mxu0 }
 0x445   : > { %v6749_v49 = vadd.f32 %v6308_v48, %v1073_v17  ;;  %v6381_v62 = vadd.f32 %v6380_v20, %v11555_v21 }
 0x446   : > { %v6750_v50 = vadd.f32 %v6310_v11, %v1074_v7  ;;  %v6751_v58 = vadd.f32 %v6379_v22, %v1075_v4 }
 0x447   : > { %v6752_v26 = vadd.f32 %v6381_v62, %v1076_v31 }
 0x448   : > { %v6838_v57 = vcombine.low %v6749_v49, %v6750_v50 }
 0x449   : > { %v6839_v55 = vcombine.low %v6751_v58, %v6752_v26 }
 0x44a   : > { %v6846_v2 = vrot.slane %v6838_v57, %v8922_v10 }
 0x44b   : > { %v6853_v54 = vrot.slane %v6839_v55, %v8922_v10 }
 0x44d   : > { %v6854_v39 = vcombine.low %v6846_v2, %v6853_v54 }
 0x44f   : > { %6906 = vst [vmem:[%s11567_s28 + $0x18] sm:$0xff] %v6854_v39 }
 0x45b   : > { %v6449_v41 = vpop.f32.mrb[228].mxu1 }
 0x45c   : > { %v6450_v51 = vadd.f32 %v6449_v41, %v11555_v21  ;;  %v6451_v29 = vpop.f32.mrb[229].mxu1  ;;  %v6520_v0 = vpop.f32.mrb[230].mxu0 }
 0x45d   : > { %v6452_v19 = vadd.f32 %v6451_v29, %v11555_v21  ;;  %v6521_v43 = vadd.f32 %v6520_v0, %v11555_v21  ;;  %v6522_v47 = vpop.f32.mrb[231].mxu0 }
 0x45e   : > { %v6753_v24 = vadd.f32 %v6450_v51, %v1077_v61  ;;  %v6523_v38 = vadd.f32 %v6522_v47, %v11555_v21 }
 0x45f   : > { %v6754_v28 = vadd.f32 %v6452_v19, %v1078_v9  ;;  %v6755_v63 = vadd.f32 %v6521_v43, %v1079_v14 }
 0x460   : > { %v6756_v32 = vadd.f32 %v6523_v38, %v1080_v36 }
 0x461   : > { %v6855_v3 = vcombine.low %v6753_v24, %v6754_v28 }
 0x462   : > { %v6856_v46 = vcombine.low %v6755_v63, %v6756_v32 }
 0x463   : > { %v6863_v40 = vrot.slane %v6855_v3, %v8922_v10 }
 0x464   : > { %v6870_v13 = vrot.slane %v6856_v46, %v8922_v10 }
 0x466   : > { %v6871_v35 = vcombine.low %v6863_v40, %v6870_v13 }
 0x468   : > { %6907 = vst [vmem:[%s11567_s28 + $0x20] sm:$0xff] %v6871_v35 }
 0x47a   : > { %v6591_v52 = vpop.f32.mrb[230].mxu1 }
 0x47b   : > { %v6592_v25 = vadd.f32 %v6591_v52, %v11555_v21  ;;  %v6593_v53 = vpop.f32.mrb[231].mxu1 }
 0x47c   : > { %v6594_v16 = vadd.f32 %v6593_v53, %v11555_v21  ;;  %v6662_v34 = vpop.f32.mrb[232].mxu0 }
 0x47d   : > { %v6757_v5 = vadd.f32 %v6592_v25, %v1081_v23  ;;  %v6663_v30 = vadd.f32 %v6662_v34, %v11555_v21  ;;  %v6664_v59 = vpop.f32.mrb[233].mxu0 }
 0x47e   : > { %v6758_v60 = vadd.f32 %v6594_v16, %v1082_v42  ;;  %v6665_v1 = vadd.f32 %v6664_v59, %v11555_v21 }
 0x47f   : > { %v6759_v56 = vadd.f32 %v6663_v30, %v1083_v6 }
 0x480   : > { %v6872_v45 = vcombine.low %v6757_v5, %v6758_v60  ;;  %v6760_v33 = vadd.f32 %v6665_v1, %v1084_v12 }
 0x482   : > { %v6873_v27 = vcombine.low %v6759_v56, %v6760_v33  ;;  %v6880_v17 = vrot.slane %v6872_v45, %v8922_v10 }
 0x484   : > { %v6887_v48 = vrot.slane %v6873_v27, %v8922_v10 }
 0x486   : > { %v6888_v8 = vcombine.low %v6880_v17, %v6887_v48 }
 0x488   : > { %6908 = vst [vmem:[%s11567_s28 + $0x28] sm:$0xff] %v6888_v8 }
 0x48e   : > { %v6733_v18 = vpop.f32.mrb[232].mxu1 }
 0x48f   : > { %v6734_v7 = vadd.f32 %v6733_v18, %v11555_v21  ;;  %v7453_v11 = vpop.f32.mrb[233].mxu1 }
 0x491   : > { %v6761_v37 = vadd.f32 %v6734_v7, %v1085_v15 }
 0x493   : > { %7323 = vst.sshfl [vmem:[%s11567_s28 + $0x30] sm:$0x3 pattern:$0x76325410] %v6761_v37 }
 0x494   : > { %8750 = shalt.err (!%p8747_p3)
}
 0x495   : > { %s8751_s21 = scalar_lea.hbm %s11632_s22, 800  ;;  %s8755_s29 = scalar_lea.hbm %s11686_s9, 1600 }
 0x496   : > { %p8752_p4 = scmp.ne.s32.totalorder %s11632_s22, %s8751_s21  ;;  %p8756_p9 = scmp.lt.u32.totalorder %s11632_s22, %s11686_s9 }
 0x497   : > { %p8757_p10 = scmp.lt.u32.totalorder %s8755_s29, %s8751_s21  ;;  %p8759_p12 = scmp.lt.u32.totalorder %s8751_s21, %s11632_s22 }
 0x498   : > { %p8753_p7 = pnand %p8752_p4, %p8899_p5 }
 0x499   : > { %p8758_p11 = por %p8757_p10, %p8756_p9 }
 0x49a   : > { %p8754_p8 = pneg %p8753_p7 }
 0x49b   : > { %p8760_p13 = por %p8759_p12, %p8758_p11 }
 0x49d   : > { %p8761_p0 = pnand %p8760_p13, %p8754_p8 }
 0x49f   : > { %8764 = shalt.err (!%p8761_p0)
}
 0x4a0   : > { %7812 = dma.vmem_to_hbm [thread:$0]  (%p8899_p5), %s11634_s16, 800, %s11632_s22, %s6911_s13  }
 0x4a1 PF: > { %p7818_p1 = scmp.ge.s32.totalorder %s8799_s12, 2  ;;  %s6937_s24 = sand.u32 1, %s8787_s30  }
 0x4a2   : > { %s6938_s23 = scalar_lea.sflag [#allocation3], %s6937_s24 }
 0x4a3   : > { %p7815_p2 = pnand %p7818_p1, %p8903_p6 }
 0x4a5   : > { %8782 = dma.done.wait (!%p7815_p2), %s6938_s23, 800  }
 0x4a6   : > { %8784 = vsyncadd (!%p7815_p2), %s6938_s23, 4294966496  ;;  %p19_p3 = scmp.ge.s32.totalorder %s8886_s15, 4   ;;  %s11830_s30 = smov %s8791_s10 }
 0x4a7   : > { %s11831_s10 = smov %s8795_s11  ;;  %s11832_s11 = smov %s8897_s18 }
 0x4a8   : > { %s11833_s12 = smov %s8886_s15  ;;  %21 = sbr.rel (!%p19_p3) target bundleno = 3 (0x3), region = 91 }
 0x4af   :  { %6943 = vsyncpa [#allocation3], 1 }
 0x4b0   :  { %6945 = vsyncpa [#allocation3 + $0x1], 1 }

</bundles_post_ra>
